<compile_context>
chip_gen: v7x
topology: tpu7x:2x2x1
jax: 0.10.0
libtpu: 0.0.40
codegen_flags: <defaults>
</compile_context>

<pallas_src>
import jax
import jax.numpy as jnp
from jax import lax
from jax.experimental import pallas as pl
from jax.experimental.pallas import tpu as pltpu


_LANE = 128
_SUBLANE = 8
_NEG_INF = -1e30


def _round_up(x, m):
    return ((x + m - 1) // m) * m


def _choose_ts(S, max_ts=32):
    """Largest chunk of timesteps <= max_ts that divides S (full unroll inside)."""
    if S <= max_ts:
        return S
    for ts in range(max_ts, 0, -1):
        if S % ts == 0:
            return ts
    return S


# -----------------------------------------------------------------------------
# Kernel
# -----------------------------------------------------------------------------
def discriminator_kernel(emb_ref,
                         wih0_ref, whh0_ref, b0_ref,
                         wih1_ref, whh1_ref, b1_ref,
                         wg2h_ref, bg2h_ref, wh2o_ref, bh2o_ref,
                         out_ref,
                         h0_ref, h1_ref):
    chunk = pl.program_id(0)
    nchunks = pl.num_programs(0)
    TS, B_pad, E_pad = emb_ref.shape
    H_pad = whh0_ref.shape[2]
    f32 = jnp.float32

    @pl.when(chunk == 0)
    def _init():
        # init_hidden: zeros (num_layers=2, B, H)
        h0_ref[...] = jnp.zeros_like(h0_ref)
        h1_ref[...] = jnp.zeros_like(h1_ref)

    # ---- Hoisted layer-0 input projection for the whole chunk -------------
    # One MXU-friendly matmul per gate instead of a per-timestep matmul inside
    # the strictly sequential recurrence.  Biases (already folded for r/z at
    # pack time) are added once per chunk here.
    x = emb_ref[...].reshape(TS * B_pad, E_pad)
    gi0_r = (jnp.dot(x, wih0_ref[0], preferred_element_type=f32)
             + b0_ref[0]).reshape(TS, B_pad, H_pad)
    gi0_z = (jnp.dot(x, wih0_ref[1], preferred_element_type=f32)
             + b0_ref[1]).reshape(TS, B_pad, H_pad)
    gi0_n = (jnp.dot(x, wih0_ref[2], preferred_element_type=f32)
             + b0_ref[2]).reshape(TS, B_pad, H_pad)

    # Recurrent weights / biases: read + broadcast once per chunk (outside the
    # unrolled loop -- JAX does not CSE broadcast_in_dim).
    whh0_r, whh0_z, whh0_n = whh0_ref[0], whh0_ref[1], whh0_ref[2]
    wih1_r, wih1_z, wih1_n = wih1_ref[0], wih1_ref[1], wih1_ref[2]
    whh1_r, whh1_z, whh1_n = whh1_ref[0], whh1_ref[1], whh1_ref[2]
    bhh0_n = jnp.broadcast_to(b0_ref[3], (B_pad, H_pad))
    b1_r = jnp.broadcast_to(b1_ref[0], (B_pad, H_pad))
    b1_z = jnp.broadcast_to(b1_ref[1], (B_pad, H_pad))
    b1_in = jnp.broadcast_to(b1_ref[2], (B_pad, H_pad))
    b1_hn = jnp.broadcast_to(b1_ref[3], (B_pad, H_pad))

    h0 = h0_ref[...]
    h1 = h1_ref[...]

    # ---- Fully-unrolled time loop (TS is static, <= 32) --------------------
    for t in range(TS):
        # GRU layer 0 (input projection hoisted; gate order r, z, n)
        r0 = jax.nn.sigmoid(gi0_r[t] + jnp.dot(h0, whh0_r, preferred_element_type=f32))
        z0 = jax.nn.sigmoid(gi0_z[t] + jnp.dot(h0, whh0_z, preferred_element_type=f32))
        n0 = jnp.tanh(gi0_n[t]
                      + r0 * (jnp.dot(h0, whh0_n, preferred_element_type=f32) + bhh0_n))
        h0 = (1.0 - z0) * n0 + z0 * h0
        # TODO(synk): nn.GRU inter-layer dropout (p=0.2) is training-mode only;
        # eval-mode identity is implemented here.
        # GRU layer 1 (full recurrence)
        r1 = jax.nn.sigmoid(jnp.dot(h0, wih1_r, preferred_element_type=f32)
                            + jnp.dot(h1, whh1_r, preferred_element_type=f32) + b1_r)
        z1 = jax.nn.sigmoid(jnp.dot(h0, wih1_z, preferred_element_type=f32)
                            + jnp.dot(h1, whh1_z, preferred_element_type=f32) + b1_z)
        n1 = jnp.tanh(jnp.dot(h0, wih1_n, preferred_element_type=f32) + b1_in
                      + r1 * (jnp.dot(h1, whh1_n, preferred_element_type=f32) + b1_hn))
        h1 = (1.0 - z1) * n1 + z1 * h1

    h0_ref[...] = h0
    h1_ref[...] = h1

    @pl.when(chunk == nchunks - 1)
    def _finalize():
        # hidden.permute(1,0,2).view(-1, 2H) @ Wg2h  ==  h0 @ W_top + h1 @ W_bot
        # (weight pre-split at pack time: avoids a lane-axis concat).
        hid = jnp.tanh(jnp.dot(h0, wg2h_ref[0], preferred_element_type=f32)
                       + jnp.dot(h1, wg2h_ref[1], preferred_element_type=f32)
                       + bg2h_ref[...])
        # TODO(synk): dropout_linear (p=0.2) is eval-mode identity here.
        logits = jnp.dot(hid, wh2o_ref[...], preferred_element_type=f32) + bh2o_ref[...]
        # Padded vocab lanes carry a -1e30 bias -> exp underflows to 0, so the
        # softmax normalizer only sees real vocab entries.
        m = jnp.max(logits, axis=1, keepdims=True)
        e = jnp.exp(logits - m)
        # One division per forward (outside the recurrence): keep it exact so
        # the f32 reference tolerance holds (approx=True is a free EUP slot
        # if ~1e-3 error were acceptable).
        probs = e * pl.reciprocal(jnp.sum(e, axis=1, keepdims=True), approx=False)
        out_ref[...] = probs.astype(out_ref.dtype)


# -----------------------------------------------------------------------------
# Parameters (raw PyTorch-style layout) and packing into the kernel layout
# -----------------------------------------------------------------------------
def make_params(key, vocab_size, embedding_dim, hidden_dim):
    ks = jax.random.split(key, 12)
    s = 0.1
    return {
        "emb_table": jax.random.normal(ks[0], (vocab_size, embedding_dim), jnp.float32) * s,
        # GRU layer 0 (input size = embedding_dim), gate order [r | z | n]
        "wih0": jax.random.normal(ks[1], (embedding_dim, 3 * hidden_dim), jnp.float32) * s,
        "whh0": jax.random.normal(ks[2], (hidden_dim, 3 * hidden_dim), jnp.float32) * s,
        "bih0": jax.random.normal(ks[3], (1, 3 * hidden_dim), jnp.float32) * s,
        "bhh0": jax.random.normal(ks[4], (1, 3 * hidden_dim), jnp.float32) * s,
        # GRU layer 1 (input size = hidden_dim)
        "wih1": jax.random.normal(ks[5], (hidden_dim, 3 * hidden_dim), jnp.float32) * s,
        "whh1": jax.random.normal(ks[6], (hidden_dim, 3 * hidden_dim), jnp.float32) * s,
        "bih1": jax.random.normal(ks[7], (1, 3 * hidden_dim), jnp.float32) * s,
        "bhh1": jax.random.normal(ks[8], (1, 3 * hidden_dim), jnp.float32) * s,
        # gru2hidden: Linear(2H, H) stored as (in, out)
        "wg2h": jax.random.normal(ks[9], (2 * hidden_dim, hidden_dim), jnp.float32) * s,
        "bg2h": jnp.zeros((1, hidden_dim), jnp.float32),
        # hidden2out: Linear(H, V) stored as (in, out)
        "wh2o": jax.random.normal(ks[10], (hidden_dim, vocab_size), jnp.float32) * s,
        "bh2o": jnp.zeros((1, vocab_size), jnp.float32),
    }


def pack_params(raw):
    """Split gates, fold r/z biases, pad everything to (8,128)-friendly tiles."""
    V, E = raw["emb_table"].shape
    H = raw["whh0"].shape[0]
    E_pad = _round_up(E, _LANE)
    H_pad = _round_up(H, _LANE)
    V_pad = _round_up(V, _LANE)

    def pad2(w, rows, cols):
        return jnp.pad(w, ((0, rows - w.shape[0]), (0, cols - w.shape[1])))

    def gates(w, in_pad):
        # (in, 3H) [r|z|n] -> (3, in_pad, H_pad)
        return jnp.stack([pad2(w[:, g * H:(g + 1) * H], in_pad, H_pad) for g in range(3)])

    def biases(bih, bhh):
        # -> (4, 1, H_pad): rows = [bih_r+bhh_r, bih_z+bhh_z, bih_n, bhh_n]
        bih = bih.reshape(3, H)
        bhh = bhh.reshape(3, H)
        rows = jnp.stack([bih[0] + bhh[0], bih[1] + bhh[1], bih[2], bhh[2]])
        return jnp.pad(rows, ((0, 0), (0, H_pad - H)))[:, None, :]

    wg2h = raw["wg2h"]  # (2H, H)
    packed = {
        "emb_table": jnp.pad(raw["emb_table"], ((0, 0), (0, E_pad - E))),
        "wih0": gates(raw["wih0"], E_pad),
        "whh0": gates(raw["whh0"], H_pad),
        "b0": biases(raw["bih0"], raw["bhh0"]),
        "wih1": gates(raw["wih1"], H_pad),
        "whh1": gates(raw["whh1"], H_pad),
        "b1": biases(raw["bih1"], raw["bhh1"]),
        "wg2h": jnp.stack([pad2(wg2h[:H], H_pad, H_pad), pad2(wg2h[H:], H_pad, H_pad)]),
        "bg2h": pad2(raw["bg2h"], 1, H_pad),
        "wh2o": pad2(raw["wh2o"], H_pad, V_pad),
        "bh2o": jnp.pad(raw["bh2o"], ((0, 0), (0, V_pad - V)), constant_values=_NEG_INF),
    }
    meta = dict(V=V, E=E, H=H, V_pad=V_pad, E_pad=E_pad, H_pad=H_pad)
    return packed, meta


# -----------------------------------------------------------------------------
# Wrapper
# -----------------------------------------------------------------------------
def discriminator_forward(tokens, packed, meta):
    """tokens: (B, S) int32 token ids. Returns (B, V) softmax probabilities."""
    B, S = tokens.shape
    V, V_pad, E_pad, H_pad = meta["V"], meta["V_pad"], meta["E_pad"], meta["H_pad"]
    B_pad = _round_up(max(B, _SUBLANE), _SUBLANE)
    TS = _choose_ts(S)
    n_chunks = S // TS

    # Embedding gather (glue) + permute(1,0,2) -> time-major; pad batch to a
    # full sublane group (padded rows stay zero and are sliced off below).
    emb = jnp.take(packed["emb_table"], tokens, axis=0)       # (B, S, E_pad)
    emb = jnp.transpose(emb, (1, 0, 2)).astype(jnp.float32)   # (S, B, E_pad)
    if B_pad != B:
        emb = jnp.pad(emb, ((0, 0), (0, B_pad - B), (0, 0)))

    def full(shape):
        return pl.BlockSpec(shape, lambda s, _n=len(shape): (0,) * _n)

    in_specs = [
        pl.BlockSpec((TS, B_pad, E_pad), lambda s: (s, 0, 0)),   # emb chunks
        full((3, E_pad, H_pad)), full((3, H_pad, H_pad)), full((4, 1, H_pad)),
        full((3, H_pad, H_pad)), full((3, H_pad, H_pad)), full((4, 1, H_pad)),
        full((2, H_pad, H_pad)), full((1, H_pad)),
        full((H_pad, V_pad)), full((1, V_pad)),
    ]

    out = pl.pallas_call(
        discriminator_kernel,
        out_shape=jax.ShapeDtypeStruct((B_pad, V_pad), jnp.float32),
        grid_spec=pltpu.PrefetchScalarGridSpec(
            num_scalar_prefetch=0,
            grid=(n_chunks,),
            in_specs=in_specs,
            out_specs=pl.BlockSpec((B_pad, V_pad), lambda s: (0, 0)),
            scratch_shapes=[pltpu.VMEM((B_pad, H_pad), jnp.float32),   # h0 carry
                            pltpu.VMEM((B_pad, H_pad), jnp.float32)],  # h1 carry
        ),
        compiler_params=pltpu.CompilerParams(
            dimension_semantics=("arbitrary",),        # time axis is sequential
            vmem_limit_bytes=32 * 1024 * 1024,
        ),
    )(emb, packed["wih0"], packed["whh0"], packed["b0"],
      packed["wih1"], packed["whh1"], packed["b1"],
      packed["wg2h"], packed["bg2h"], packed["wh2o"], packed["bh2o"])
    return out[:B, :V]


# -----------------------------------------------------------------------------
# Pure-JAX reference (eval-mode PyTorch semantics) on the raw params
# -----------------------------------------------------------------------------
def reference_forward(tokens, params):
    H = params["whh0"].shape[0]
    emb = jnp.take(params["emb_table"], tokens, axis=0)
    emb = jnp.transpose(emb, (1, 0, 2))
    B = tokens.shape[0]

    def cell(x, h, wih, whh, bih, bhh):
        gi = x @ wih + bih
        gh = h @ whh + bhh
        r = jax.nn.sigmoid(gi[:, :H] + gh[:, :H])
        z = jax.nn.sigmoid(gi[:, H:2 * H] + gh[:, H:2 * H])
        n = jnp.tanh(gi[:, 2 * H:] + r * gh[:, 2 * H:])
        return (1 - z) * n + z * h

    h0 = jnp.zeros((B, H), jnp.float32)
    h1 = jnp.zeros((B, H), jnp.float32)
    for t in range(tokens.shape[1]):
        h0 = cell(emb[t], h0, params["wih0"], params["whh0"], params["bih0"], params["bhh0"])
        h1 = cell(h0, h1, params["wih1"], params["whh1"], params["bih1"], params["bhh1"])
    hid = jnp.concatenate([h0, h1], axis=1)
    out = jnp.tanh(hid @ params["wg2h"] + params["bg2h"])
    logits = out @ params["wh2o"] + params["bh2o"]
    return jax.nn.softmax(logits, axis=1)


if __name__ == "__main__":
    # Small config consistent with the module: vocab=16, emb=32, hidden=32, seq=8, batch=2
    vocab_size, embedding_dim, hidden_dim = 16, 32, 32
    batch, seq_len = 2, 8

    key = jax.random.PRNGKey(0)
    pkey, tkey = jax.random.split(key)
    raw = make_params(pkey, vocab_size, embedding_dim, hidden_dim)
    packed, meta = pack_params(raw)
    tokens = jax.random.randint(tkey, (batch, seq_len), 0, vocab_size, dtype=jnp.int32)

    out = jax.block_until_ready(discriminator_forward(tokens, packed, meta))
    ref = jax.block_until_ready(reference_forward(tokens, raw))

    assert out.shape == (batch, vocab_size)
    assert jnp.allclose(out, ref, atol=1e-4, rtol=1e-4), "mismatch vs reference"
    assert jnp.allclose(jnp.sum(out, axis=1), 1.0, atol=1e-5), "softmax rows must sum to 1"

    print("KERNEL_OK")
</pallas_src>

<mosaic_0001>
module attributes {stable_mosaic.version = 11 : i64} {
  func.func @discriminator_kernel(%arg0: i32, %arg1: memref<8x8x128xf32, #tpu.memory_space<vmem>>, %arg2: memref<3x128x128xf32, #tpu.memory_space<vmem>>, %arg3: memref<3x128x128xf32, #tpu.memory_space<vmem>>, %arg4: memref<4x1x128xf32, #tpu.memory_space<vmem>>, %arg5: memref<3x128x128xf32, #tpu.memory_space<vmem>>, %arg6: memref<3x128x128xf32, #tpu.memory_space<vmem>>, %arg7: memref<4x1x128xf32, #tpu.memory_space<vmem>>, %arg8: memref<2x128x128xf32, #tpu.memory_space<vmem>>, %arg9: memref<1x128xf32, #tpu.memory_space<vmem>>, %arg10: memref<128x128xf32, #tpu.memory_space<vmem>>, %arg11: memref<1x128xf32, #tpu.memory_space<vmem>>, %arg12: memref<8x128xf32, #tpu.memory_space<vmem>>, %arg13: memref<8x128xf32, #tpu.memory_space<vmem>>, %arg14: memref<8x128xf32, #tpu.memory_space<vmem>>) attributes {dimension_semantics = [#tpu.dimension_semantics<arbitrary>], iteration_bounds = array<i64: 1>, scalar_prefetch = 0 : i64, scratch_operands = 2 : i64, tpu.core_type = #tpu.core_type<tc>, window_params = [{transform_indices = @transform_0, window_bounds = array<i64: 8, 8, 128>}, {pipeline_mode = #tpu.pipeline_mode<synchronous>, transform_indices = @transform_1, window_bounds = array<i64: 3, 128, 128>}, {pipeline_mode = #tpu.pipeline_mode<synchronous>, transform_indices = @transform_2, window_bounds = array<i64: 3, 128, 128>}, {pipeline_mode = #tpu.pipeline_mode<synchronous>, transform_indices = @transform_3, window_bounds = array<i64: 4, 1, 128>}, {pipeline_mode = #tpu.pipeline_mode<synchronous>, transform_indices = @transform_4, window_bounds = array<i64: 3, 128, 128>}, {pipeline_mode = #tpu.pipeline_mode<synchronous>, transform_indices = @transform_5, window_bounds = array<i64: 3, 128, 128>}, {pipeline_mode = #tpu.pipeline_mode<synchronous>, transform_indices = @transform_6, window_bounds = array<i64: 4, 1, 128>}, {pipeline_mode = #tpu.pipeline_mode<synchronous>, transform_indices = @transform_7, window_bounds = array<i64: 2, 128, 128>}, {pipeline_mode = #tpu.pipeline_mode<synchronous>, transform_indices = @transform_8, window_bounds = array<i64: 1, 128>}, {pipeline_mode = #tpu.pipeline_mode<synchronous>, transform_indices = @transform_9, window_bounds = array<i64: 128, 128>}, {pipeline_mode = #tpu.pipeline_mode<synchronous>, transform_indices = @transform_10, window_bounds = array<i64: 1, 128>}, {pipeline_mode = #tpu.pipeline_mode<synchronous>, transform_indices = @transform_11, window_bounds = array<i64: 8, 128>}]} {
    %c0_i32 = arith.constant 0 : i32
    %0 = arith.cmpi eq, %arg0, %c0_i32 : i32
    %1 = arith.extui %0 : i1 to i32
    %c0_i32_0 = arith.constant 0 : i32
    %2 = arith.cmpi ne, %1, %c0_i32_0 : i32
    scf.if %2 {
      %cst_192 = arith.constant 0.000000e+00 : f32
      %554 = vector.broadcast %cst_192 : f32 to vector<8x128xf32>
      %c0_193 = arith.constant 0 : index
      %c0_194 = arith.constant 0 : index
      %555 = vector.load %arg13[%c0_193, %c0_194] : memref<8x128xf32, #tpu.memory_space<vmem>>, vector<8x128xf32>
      tpu.vector_store %arg13[%c0_193, %c0_194], %554 {strides = array<i32>} : memref<8x128xf32, #tpu.memory_space<vmem>>, vector<8x128xf32>,
      %cst_195 = arith.constant 0.000000e+00 : f32
      %556 = vector.broadcast %cst_195 : f32 to vector<8x128xf32>
      %c0_196 = arith.constant 0 : index
      %c0_197 = arith.constant 0 : index
      %557 = vector.load %arg14[%c0_196, %c0_197] : memref<8x128xf32, #tpu.memory_space<vmem>>, vector<8x128xf32>
      tpu.vector_store %arg14[%c0_196, %c0_197], %556 {strides = array<i32>} : memref<8x128xf32, #tpu.memory_space<vmem>>, vector<8x128xf32>,
    } else {
    }
    %c0 = arith.constant 0 : index
    %c0_1 = arith.constant 0 : index
    %c0_2 = arith.constant 0 : index
    %3 = vector.load %arg1[%c0, %c0_1, %c0_2] : memref<8x8x128xf32, #tpu.memory_space<vmem>>, vector<8x8x128xf32>
    %4 = vector.shape_cast %3 : vector<8x8x128xf32> to vector<64x128xf32>
    %c0_3 = arith.constant 0 : index
    %c0_4 = arith.constant 0 : index
    %c0_5 = arith.constant 0 : index
    %5 = vector.load %arg2[%c0_3, %c0_4, %c0_5] : memref<3x128x128xf32, #tpu.memory_space<vmem>>, vector<1x128x128xf32>
    %6 = vector.shape_cast %5 : vector<1x128x128xf32> to vector<128x128xf32>
    %cst = arith.constant dense<0.000000e+00> : vector<64x128xf32>
    %7 = tpu.matmul %4, %6, %cst {dimension_numbers = #tpu.dot_dimension_numbers<[1], [0], [0], [1], [0, 0, 1, 1], [], []>} : vector<64x128xf32>, vector<128x128xf32>, vector<64x128xf32> -> vector<64x128xf32>
    %c0_6 = arith.constant 0 : index
    %c0_7 = arith.constant 0 : index
    %c0_8 = arith.constant 0 : index
    %8 = vector.load %arg4[%c0_6, %c0_7, %c0_8] : memref<4x1x128xf32, #tpu.memory_space<vmem>>, vector<1x1x128xf32>
    %9 = vector.shape_cast %8 : vector<1x1x128xf32> to vector<1x128xf32>
    %10 = vector.broadcast %9 : vector<1x128xf32> to vector<64x128xf32>
    %11 = arith.addf %7, %10 : vector<64x128xf32>
    %12 = vector.shape_cast %11 : vector<64x128xf32> to vector<8x8x128xf32>
    %c1 = arith.constant 1 : index
    %c0_9 = arith.constant 0 : index
    %c0_10 = arith.constant 0 : index
    %13 = vector.load %arg2[%c1, %c0_9, %c0_10] : memref<3x128x128xf32, #tpu.memory_space<vmem>>, vector<1x128x128xf32>
    %14 = vector.shape_cast %13 : vector<1x128x128xf32> to vector<128x128xf32>
    %cst_11 = arith.constant dense<0.000000e+00> : vector<64x128xf32>
    %15 = tpu.matmul %4, %14, %cst_11 {dimension_numbers = #tpu.dot_dimension_numbers<[1], [0], [0], [1], [0, 0, 1, 1], [], []>} : vector<64x128xf32>, vector<128x128xf32>, vector<64x128xf32> -> vector<64x128xf32>
    %c1_12 = arith.constant 1 : index
    %c0_13 = arith.constant 0 : index
    %c0_14 = arith.constant 0 : index
    %16 = vector.load %arg4[%c1_12, %c0_13, %c0_14] : memref<4x1x128xf32, #tpu.memory_space<vmem>>, vector<1x1x128xf32>
    %17 = vector.shape_cast %16 : vector<1x1x128xf32> to vector<1x128xf32>
    %18 = vector.broadcast %17 : vector<1x128xf32> to vector<64x128xf32>
    %19 = arith.addf %15, %18 : vector<64x128xf32>
    %20 = vector.shape_cast %19 : vector<64x128xf32> to vector<8x8x128xf32>
    %c2 = arith.constant 2 : index
    %c0_15 = arith.constant 0 : index
    %c0_16 = arith.constant 0 : index
    %21 = vector.load %arg2[%c2, %c0_15, %c0_16] : memref<3x128x128xf32, #tpu.memory_space<vmem>>, vector<1x128x128xf32>
    %22 = vector.shape_cast %21 : vector<1x128x128xf32> to vector<128x128xf32>
    %cst_17 = arith.constant dense<0.000000e+00> : vector<64x128xf32>
    %23 = tpu.matmul %4, %22, %cst_17 {dimension_numbers = #tpu.dot_dimension_numbers<[1], [0], [0], [1], [0, 0, 1, 1], [], []>} : vector<64x128xf32>, vector<128x128xf32>, vector<64x128xf32> -> vector<64x128xf32>
    %c2_18 = arith.constant 2 : index
    %c0_19 = arith.constant 0 : index
    %c0_20 = arith.constant 0 : index
    %24 = vector.load %arg4[%c2_18, %c0_19, %c0_20] : memref<4x1x128xf32, #tpu.memory_space<vmem>>, vector<1x1x128xf32>
    %25 = vector.shape_cast %24 : vector<1x1x128xf32> to vector<1x128xf32>
    %26 = vector.broadcast %25 : vector<1x128xf32> to vector<64x128xf32>
    %27 = arith.addf %23, %26 : vector<64x128xf32>
    %28 = vector.shape_cast %27 : vector<64x128xf32> to vector<8x8x128xf32>
    %c0_21 = arith.constant 0 : index
    %c0_22 = arith.constant 0 : index
    %c0_23 = arith.constant 0 : index
    %29 = vector.load %arg3[%c0_21, %c0_22, %c0_23] : memref<3x128x128xf32, #tpu.memory_space<vmem>>, vector<1x128x128xf32>
    %30 = vector.shape_cast %29 : vector<1x128x128xf32> to vector<128x128xf32>
    %c1_24 = arith.constant 1 : index
    %c0_25 = arith.constant 0 : index
    %c0_26 = arith.constant 0 : index
    %31 = vector.load %arg3[%c1_24, %c0_25, %c0_26] : memref<3x128x128xf32, #tpu.memory_space<vmem>>, vector<1x128x128xf32>
    %32 = vector.shape_cast %31 : vector<1x128x128xf32> to vector<128x128xf32>
    %c2_27 = arith.constant 2 : index
    %c0_28 = arith.constant 0 : index
    %c0_29 = arith.constant 0 : index
    %33 = vector.load %arg3[%c2_27, %c0_28, %c0_29] : memref<3x128x128xf32, #tpu.memory_space<vmem>>, vector<1x128x128xf32>
    %34 = vector.shape_cast %33 : vector<1x128x128xf32> to vector<128x128xf32>
    %c0_30 = arith.constant 0 : index
    %c0_31 = arith.constant 0 : index
    %c0_32 = arith.constant 0 : index
    %35 = vector.load %arg5[%c0_30, %c0_31, %c0_32] : memref<3x128x128xf32, #tpu.memory_space<vmem>>, vector<1x128x128xf32>
    %36 = vector.shape_cast %35 : vector<1x128x128xf32> to vector<128x128xf32>
    %c1_33 = arith.constant 1 : index
    %c0_34 = arith.constant 0 : index
    %c0_35 = arith.constant 0 : index
    %37 = vector.load %arg5[%c1_33, %c0_34, %c0_35] : memref<3x128x128xf32, #tpu.memory_space<vmem>>, vector<1x128x128xf32>
    %38 = vector.shape_cast %37 : vector<1x128x128xf32> to vector<128x128xf32>
    %c2_36 = arith.constant 2 : index
    %c0_37 = arith.constant 0 : index
    %c0_38 = arith.constant 0 : index
    %39 = vector.load %arg5[%c2_36, %c0_37, %c0_38] : memref<3x128x128xf32, #tpu.memory_space<vmem>>, vector<1x128x128xf32>
    %40 = vector.shape_cast %39 : vector<1x128x128xf32> to vector<128x128xf32>
    %c0_39 = arith.constant 0 : index
    %c0_40 = arith.constant 0 : index
    %c0_41 = arith.constant 0 : index
    %41 = vector.load %arg6[%c0_39, %c0_40, %c0_41] : memref<3x128x128xf32, #tpu.memory_space<vmem>>, vector<1x128x128xf32>
    %42 = vector.shape_cast %41 : vector<1x128x128xf32> to vector<128x128xf32>
    %c1_42 = arith.constant 1 : index
    %c0_43 = arith.constant 0 : index
    %c0_44 = arith.constant 0 : index
    %43 = vector.load %arg6[%c1_42, %c0_43, %c0_44] : memref<3x128x128xf32, #tpu.memory_space<vmem>>, vector<1x128x128xf32>
    %44 = vector.shape_cast %43 : vector<1x128x128xf32> to vector<128x128xf32>
    %c2_45 = arith.constant 2 : index
    %c0_46 = arith.constant 0 : index
    %c0_47 = arith.constant 0 : index
    %45 = vector.load %arg6[%c2_45, %c0_46, %c0_47] : memref<3x128x128xf32, #tpu.memory_space<vmem>>, vector<1x128x128xf32>
    %46 = vector.shape_cast %45 : vector<1x128x128xf32> to vector<128x128xf32>
    %c3 = arith.constant 3 : index
    %c0_48 = arith.constant 0 : index
    %c0_49 = arith.constant 0 : index
    %47 = vector.load %arg4[%c3, %c0_48, %c0_49] : memref<4x1x128xf32, #tpu.memory_space<vmem>>, vector<1x1x128xf32>
    %48 = vector.shape_cast %47 : vector<1x1x128xf32> to vector<1x128xf32>
    %49 = vector.shape_cast %48 : vector<1x128xf32> to vector<1x128xf32>
    %50 = vector.broadcast %49 : vector<1x128xf32> to vector<8x128xf32>
    %c0_50 = arith.constant 0 : index
    %c0_51 = arith.constant 0 : index
    %c0_52 = arith.constant 0 : index
    %51 = vector.load %arg7[%c0_50, %c0_51, %c0_52] : memref<4x1x128xf32, #tpu.memory_space<vmem>>, vector<1x1x128xf32>
    %52 = vector.shape_cast %51 : vector<1x1x128xf32> to vector<1x128xf32>
    %53 = vector.shape_cast %52 : vector<1x128xf32> to vector<1x128xf32>
    %54 = vector.broadcast %53 : vector<1x128xf32> to vector<8x128xf32>
    %c1_53 = arith.constant 1 : index
    %c0_54 = arith.constant 0 : index
    %c0_55 = arith.constant 0 : index
    %55 = vector.load %arg7[%c1_53, %c0_54, %c0_55] : memref<4x1x128xf32, #tpu.memory_space<vmem>>, vector<1x1x128xf32>
    %56 = vector.shape_cast %55 : vector<1x1x128xf32> to vector<1x128xf32>
    %57 = vector.shape_cast %56 : vector<1x128xf32> to vector<1x128xf32>
    %58 = vector.broadcast %57 : vector<1x128xf32> to vector<8x128xf32>
    %c2_56 = arith.constant 2 : index
    %c0_57 = arith.constant 0 : index
    %c0_58 = arith.constant 0 : index
    %59 = vector.load %arg7[%c2_56, %c0_57, %c0_58] : memref<4x1x128xf32, #tpu.memory_space<vmem>>, vector<1x1x128xf32>
    %60 = vector.shape_cast %59 : vector<1x1x128xf32> to vector<1x128xf32>
    %61 = vector.shape_cast %60 : vector<1x128xf32> to vector<1x128xf32>
    %62 = vector.broadcast %61 : vector<1x128xf32> to vector<8x128xf32>
    %c3_59 = arith.constant 3 : index
    %c0_60 = arith.constant 0 : index
    %c0_61 = arith.constant 0 : index
    %63 = vector.load %arg7[%c3_59, %c0_60, %c0_61] : memref<4x1x128xf32, #tpu.memory_space<vmem>>, vector<1x1x128xf32>
    %64 = vector.shape_cast %63 : vector<1x1x128xf32> to vector<1x128xf32>
    %65 = vector.shape_cast %64 : vector<1x128xf32> to vector<1x128xf32>
    %66 = vector.broadcast %65 : vector<1x128xf32> to vector<8x128xf32>
    %c0_62 = arith.constant 0 : index
    %c0_63 = arith.constant 0 : index
    %67 = vector.load %arg13[%c0_62, %c0_63] : memref<8x128xf32, #tpu.memory_space<vmem>>, vector<8x128xf32>
    %c0_64 = arith.constant 0 : index
    %c0_65 = arith.constant 0 : index
    %68 = vector.load %arg14[%c0_64, %c0_65] : memref<8x128xf32, #tpu.memory_space<vmem>>, vector<8x128xf32>
    %69 = vector.extract_strided_slice %12 {offsets = [0, 0, 0], sizes = [1, 8, 128], strides = [1, 1, 1]} : vector<8x8x128xf32> to vector<1x8x128xf32>
    %70 = vector.shape_cast %69 : vector<1x8x128xf32> to vector<8x128xf32>
    %cst_66 = arith.constant dense<0.000000e+00> : vector<8x128xf32>
    %71 = tpu.matmul %67, %30, %cst_66 {dimension_numbers = #tpu.dot_dimension_numbers<[1], [0], [0], [1], [0, 0, 1, 1], [], []>} : vector<8x128xf32>, vector<128x128xf32>, vector<8x128xf32> -> vector<8x128xf32>
    %72 = arith.addf %70, %71 : vector<8x128xf32>
    %73 = arith.negf %72 : vector<8x128xf32>
    %74 = math.exp %73 : vector<8x128xf32>
    %cst_67 = arith.constant 1.000000e+00 : f32
    %75 = vector.broadcast %cst_67 : f32 to vector<8x128xf32>
    %76 = arith.addf %75, %74 : vector<8x128xf32>
    %77 = arith.divf %75, %76 : vector<8x128xf32>
    %78 = vector.extract_strided_slice %20 {offsets = [0, 0, 0], sizes = [1, 8, 128], strides = [1, 1, 1]} : vector<8x8x128xf32> to vector<1x8x128xf32>
    %79 = vector.shape_cast %78 : vector<1x8x128xf32> to vector<8x128xf32>
    %cst_68 = arith.constant dense<0.000000e+00> : vector<8x128xf32>
    %80 = tpu.matmul %67, %32, %cst_68 {dimension_numbers = #tpu.dot_dimension_numbers<[1], [0], [0], [1], [0, 0, 1, 1], [], []>} : vector<8x128xf32>, vector<128x128xf32>, vector<8x128xf32> -> vector<8x128xf32>
    %81 = arith.addf %79, %80 : vector<8x128xf32>
    %82 = arith.negf %81 : vector<8x128xf32>
    %83 = math.exp %82 : vector<8x128xf32>
    %cst_69 = arith.constant 1.000000e+00 : f32
    %84 = vector.broadcast %cst_69 : f32 to vector<8x128xf32>
    %85 = arith.addf %84, %83 : vector<8x128xf32>
    %86 = arith.divf %84, %85 : vector<8x128xf32>
    %87 = vector.extract_strided_slice %28 {offsets = [0, 0, 0], sizes = [1, 8, 128], strides = [1, 1, 1]} : vector<8x8x128xf32> to vector<1x8x128xf32>
    %88 = vector.shape_cast %87 : vector<1x8x128xf32> to vector<8x128xf32>
    %cst_70 = arith.constant dense<0.000000e+00> : vector<8x128xf32>
    %89 = tpu.matmul %67, %34, %cst_70 {dimension_numbers = #tpu.dot_dimension_numbers<[1], [0], [0], [1], [0, 0, 1, 1], [], []>} : vector<8x128xf32>, vector<128x128xf32>, vector<8x128xf32> -> vector<8x128xf32>
    %90 = arith.addf %89, %50 : vector<8x128xf32>
    %91 = arith.mulf %77, %90 : vector<8x128xf32>
    %92 = arith.addf %88, %91 : vector<8x128xf32>
    %93 = math.tanh %92 : vector<8x128xf32>
    %cst_71 = arith.constant 1.000000e+00 : f32
    %94 = vector.broadcast %cst_71 : f32 to vector<8x128xf32>
    %95 = arith.subf %94, %86 : vector<8x128xf32>
    %96 = arith.mulf %95, %93 : vector<8x128xf32>
    %97 = arith.mulf %86, %67 : vector<8x128xf32>
    %98 = arith.addf %96, %97 : vector<8x128xf32>
    %cst_72 = arith.constant dense<0.000000e+00> : vector<8x128xf32>
    %99 = tpu.matmul %98, %36, %cst_72 {dimension_numbers = #tpu.dot_dimension_numbers<[1], [0], [0], [1], [0, 0, 1, 1], [], []>} : vector<8x128xf32>, vector<128x128xf32>, vector<8x128xf32> -> vector<8x128xf32>
    %cst_73 = arith.constant dense<0.000000e+00> : vector<8x128xf32>
    %100 = tpu.matmul %68, %42, %cst_73 {dimension_numbers = #tpu.dot_dimension_numbers<[1], [0], [0], [1], [0, 0, 1, 1], [], []>} : vector<8x128xf32>, vector<128x128xf32>, vector<8x128xf32> -> vector<8x128xf32>
    %101 = arith.addf %99, %100 : vector<8x128xf32>
    %102 = arith.addf %101, %54 : vector<8x128xf32>
    %103 = arith.negf %102 : vector<8x128xf32>
    %104 = math.exp %103 : vector<8x128xf32>
    %cst_74 = arith.constant 1.000000e+00 : f32
    %105 = vector.broadcast %cst_74 : f32 to vector<8x128xf32>
    %106 = arith.addf %105, %104 : vector<8x128xf32>
    %107 = arith.divf %105, %106 : vector<8x128xf32>
    %cst_75 = arith.constant dense<0.000000e+00> : vector<8x128xf32>
    %108 = tpu.matmul %98, %38, %cst_75 {dimension_numbers = #tpu.dot_dimension_numbers<[1], [0], [0], [1], [0, 0, 1, 1], [], []>} : vector<8x128xf32>, vector<128x128xf32>, vector<8x128xf32> -> vector<8x128xf32>
    %cst_76 = arith.constant dense<0.000000e+00> : vector<8x128xf32>
    %109 = tpu.matmul %68, %44, %cst_76 {dimension_numbers = #tpu.dot_dimension_numbers<[1], [0], [0], [1], [0, 0, 1, 1], [], []>} : vector<8x128xf32>, vector<128x128xf32>, vector<8x128xf32> -> vector<8x128xf32>
    %110 = arith.addf %108, %109 : vector<8x128xf32>
    %111 = arith.addf %110, %58 : vector<8x128xf32>
    %112 = arith.negf %111 : vector<8x128xf32>
    %113 = math.exp %112 : vector<8x128xf32>
    %cst_77 = arith.constant 1.000000e+00 : f32
    %114 = vector.broadcast %cst_77 : f32 to vector<8x128xf32>
    %115 = arith.addf %114, %113 : vector<8x128xf32>
    %116 = arith.divf %114, %115 : vector<8x128xf32>
    %cst_78 = arith.constant dense<0.000000e+00> : vector<8x128xf32>
    %117 = tpu.matmul %98, %40, %cst_78 {dimension_numbers = #tpu.dot_dimension_numbers<[1], [0], [0], [1], [0, 0, 1, 1], [], []>} : vector<8x128xf32>, vector<128x128xf32>, vector<8x128xf32> -> vector<8x128xf32>
    %118 = arith.addf %117, %62 : vector<8x128xf32>
    %cst_79 = arith.constant dense<0.000000e+00> : vector<8x128xf32>
    %119 = tpu.matmul %68, %46, %cst_79 {dimension_numbers = #tpu.dot_dimension_numbers<[1], [0], [0], [1], [0, 0, 1, 1], [], []>} : vector<8x128xf32>, vector<128x128xf32>, vector<8x128xf32> -> vector<8x128xf32>
    %120 = arith.addf %119, %66 : vector<8x128xf32>
    %121 = arith.mulf %107, %120 : vector<8x128xf32>
    %122 = arith.addf %118, %121 : vector<8x128xf32>
    %123 = math.tanh %122 : vector<8x128xf32>
    %cst_80 = arith.constant 1.000000e+00 : f32
    %124 = vector.broadcast %cst_80 : f32 to vector<8x128xf32>
    %125 = arith.subf %124, %116 : vector<8x128xf32>
    %126 = arith.mulf %125, %123 : vector<8x128xf32>
    %127 = arith.mulf %116, %68 : vector<8x128xf32>
    %128 = arith.addf %126, %127 : vector<8x128xf32>
    %129 = vector.extract_strided_slice %12 {offsets = [1, 0, 0], sizes = [1, 8, 128], strides = [1, 1, 1]} : vector<8x8x128xf32> to vector<1x8x128xf32>
    %130 = vector.shape_cast %129 : vector<1x8x128xf32> to vector<8x128xf32>
    %cst_81 = arith.constant dense<0.000000e+00> : vector<8x128xf32>
    %131 = tpu.matmul %98, %30, %cst_81 {dimension_numbers = #tpu.dot_dimension_numbers<[1], [0], [0], [1], [0, 0, 1, 1], [], []>} : vector<8x128xf32>, vector<128x128xf32>, vector<8x128xf32> -> vector<8x128xf32>
    %132 = arith.addf %130, %131 : vector<8x128xf32>
    %133 = arith.negf %132 : vector<8x128xf32>
    %134 = math.exp %133 : vector<8x128xf32>
    %cst_82 = arith.constant 1.000000e+00 : f32
    %135 = vector.broadcast %cst_82 : f32 to vector<8x128xf32>
    %136 = arith.addf %135, %134 : vector<8x128xf32>
    %137 = arith.divf %135, %136 : vector<8x128xf32>
    %138 = vector.extract_strided_slice %20 {offsets = [1, 0, 0], sizes = [1, 8, 128], strides = [1, 1, 1]} : vector<8x8x128xf32> to vector<1x8x128xf32>
    %139 = vector.shape_cast %138 : vector<1x8x128xf32> to vector<8x128xf32>
    %cst_83 = arith.constant dense<0.000000e+00> : vector<8x128xf32>
    %140 = tpu.matmul %98, %32, %cst_83 {dimension_numbers = #tpu.dot_dimension_numbers<[1], [0], [0], [1], [0, 0, 1, 1], [], []>} : vector<8x128xf32>, vector<128x128xf32>, vector<8x128xf32> -> vector<8x128xf32>
    %141 = arith.addf %139, %140 : vector<8x128xf32>
    %142 = arith.negf %141 : vector<8x128xf32>
    %143 = math.exp %142 : vector<8x128xf32>
    %cst_84 = arith.constant 1.000000e+00 : f32
    %144 = vector.broadcast %cst_84 : f32 to vector<8x128xf32>
    %145 = arith.addf %144, %143 : vector<8x128xf32>
    %146 = arith.divf %144, %145 : vector<8x128xf32>
    %147 = vector.extract_strided_slice %28 {offsets = [1, 0, 0], sizes = [1, 8, 128], strides = [1, 1, 1]} : vector<8x8x128xf32> to vector<1x8x128xf32>
    %148 = vector.shape_cast %147 : vector<1x8x128xf32> to vector<8x128xf32>
    %cst_85 = arith.constant dense<0.000000e+00> : vector<8x128xf32>
    %149 = tpu.matmul %98, %34, %cst_85 {dimension_numbers = #tpu.dot_dimension_numbers<[1], [0], [0], [1], [0, 0, 1, 1], [], []>} : vector<8x128xf32>, vector<128x128xf32>, vector<8x128xf32> -> vector<8x128xf32>
    %150 = arith.addf %149, %50 : vector<8x128xf32>
    %151 = arith.mulf %137, %150 : vector<8x128xf32>
    %152 = arith.addf %148, %151 : vector<8x128xf32>
    %153 = math.tanh %152 : vector<8x128xf32>
    %cst_86 = arith.constant 1.000000e+00 : f32
    %154 = vector.broadcast %cst_86 : f32 to vector<8x128xf32>
    %155 = arith.subf %154, %146 : vector<8x128xf32>
    %156 = arith.mulf %155, %153 : vector<8x128xf32>
    %157 = arith.mulf %146, %98 : vector<8x128xf32>
    %158 = arith.addf %156, %157 : vector<8x128xf32>
    %cst_87 = arith.constant dense<0.000000e+00> : vector<8x128xf32>
    %159 = tpu.matmul %158, %36, %cst_87 {dimension_numbers = #tpu.dot_dimension_numbers<[1], [0], [0], [1], [0, 0, 1, 1], [], []>} : vector<8x128xf32>, vector<128x128xf32>, vector<8x128xf32> -> vector<8x128xf32>
    %cst_88 = arith.constant dense<0.000000e+00> : vector<8x128xf32>
    %160 = tpu.matmul %128, %42, %cst_88 {dimension_numbers = #tpu.dot_dimension_numbers<[1], [0], [0], [1], [0, 0, 1, 1], [], []>} : vector<8x128xf32>, vector<128x128xf32>, vector<8x128xf32> -> vector<8x128xf32>
    %161 = arith.addf %159, %160 : vector<8x128xf32>
    %162 = arith.addf %161, %54 : vector<8x128xf32>
    %163 = arith.negf %162 : vector<8x128xf32>
    %164 = math.exp %163 : vector<8x128xf32>
    %cst_89 = arith.constant 1.000000e+00 : f32
    %165 = vector.broadcast %cst_89 : f32 to vector<8x128xf32>
    %166 = arith.addf %165, %164 : vector<8x128xf32>
    %167 = arith.divf %165, %166 : vector<8x128xf32>
    %cst_90 = arith.constant dense<0.000000e+00> : vector<8x128xf32>
    %168 = tpu.matmul %158, %38, %cst_90 {dimension_numbers = #tpu.dot_dimension_numbers<[1], [0], [0], [1], [0, 0, 1, 1], [], []>} : vector<8x128xf32>, vector<128x128xf32>, vector<8x128xf32> -> vector<8x128xf32>
    %cst_91 = arith.constant dense<0.000000e+00> : vector<8x128xf32>
    %169 = tpu.matmul %128, %44, %cst_91 {dimension_numbers = #tpu.dot_dimension_numbers<[1], [0], [0], [1], [0, 0, 1, 1], [], []>} : vector<8x128xf32>, vector<128x128xf32>, vector<8x128xf32> -> vector<8x128xf32>
    %170 = arith.addf %168, %169 : vector<8x128xf32>
    %171 = arith.addf %170, %58 : vector<8x128xf32>
    %172 = arith.negf %171 : vector<8x128xf32>
    %173 = math.exp %172 : vector<8x128xf32>
    %cst_92 = arith.constant 1.000000e+00 : f32
    %174 = vector.broadcast %cst_92 : f32 to vector<8x128xf32>
    %175 = arith.addf %174, %173 : vector<8x128xf32>
    %176 = arith.divf %174, %175 : vector<8x128xf32>
    %cst_93 = arith.constant dense<0.000000e+00> : vector<8x128xf32>
    %177 = tpu.matmul %158, %40, %cst_93 {dimension_numbers = #tpu.dot_dimension_numbers<[1], [0], [0], [1], [0, 0, 1, 1], [], []>} : vector<8x128xf32>, vector<128x128xf32>, vector<8x128xf32> -> vector<8x128xf32>
    %178 = arith.addf %177, %62 : vector<8x128xf32>
    %cst_94 = arith.constant dense<0.000000e+00> : vector<8x128xf32>
    %179 = tpu.matmul %128, %46, %cst_94 {dimension_numbers = #tpu.dot_dimension_numbers<[1], [0], [0], [1], [0, 0, 1, 1], [], []>} : vector<8x128xf32>, vector<128x128xf32>, vector<8x128xf32> -> vector<8x128xf32>
    %180 = arith.addf %179, %66 : vector<8x128xf32>
    %181 = arith.mulf %167, %180 : vector<8x128xf32>
    %182 = arith.addf %178, %181 : vector<8x128xf32>
    %183 = math.tanh %182 : vector<8x128xf32>
    %cst_95 = arith.constant 1.000000e+00 : f32
    %184 = vector.broadcast %cst_95 : f32 to vector<8x128xf32>
    %185 = arith.subf %184, %176 : vector<8x128xf32>
    %186 = arith.mulf %185, %183 : vector<8x128xf32>
    %187 = arith.mulf %176, %128 : vector<8x128xf32>
    %188 = arith.addf %186, %187 : vector<8x128xf32>
    %189 = vector.extract_strided_slice %12 {offsets = [2, 0, 0], sizes = [1, 8, 128], strides = [1, 1, 1]} : vector<8x8x128xf32> to vector<1x8x128xf32>
    %190 = vector.shape_cast %189 : vector<1x8x128xf32> to vector<8x128xf32>
    %cst_96 = arith.constant dense<0.000000e+00> : vector<8x128xf32>
    %191 = tpu.matmul %158, %30, %cst_96 {dimension_numbers = #tpu.dot_dimension_numbers<[1], [0], [0], [1], [0, 0, 1, 1], [], []>} : vector<8x128xf32>, vector<128x128xf32>, vector<8x128xf32> -> vector<8x128xf32>
    %192 = arith.addf %190, %191 : vector<8x128xf32>
    %193 = arith.negf %192 : vector<8x128xf32>
    %194 = math.exp %193 : vector<8x128xf32>
    %cst_97 = arith.constant 1.000000e+00 : f32
    %195 = vector.broadcast %cst_97 : f32 to vector<8x128xf32>
    %196 = arith.addf %195, %194 : vector<8x128xf32>
    %197 = arith.divf %195, %196 : vector<8x128xf32>
    %198 = vector.extract_strided_slice %20 {offsets = [2, 0, 0], sizes = [1, 8, 128], strides = [1, 1, 1]} : vector<8x8x128xf32> to vector<1x8x128xf32>
    %199 = vector.shape_cast %198 : vector<1x8x128xf32> to vector<8x128xf32>
    %cst_98 = arith.constant dense<0.000000e+00> : vector<8x128xf32>
    %200 = tpu.matmul %158, %32, %cst_98 {dimension_numbers = #tpu.dot_dimension_numbers<[1], [0], [0], [1], [0, 0, 1, 1], [], []>} : vector<8x128xf32>, vector<128x128xf32>, vector<8x128xf32> -> vector<8x128xf32>
    %201 = arith.addf %199, %200 : vector<8x128xf32>
    %202 = arith.negf %201 : vector<8x128xf32>
    %203 = math.exp %202 : vector<8x128xf32>
    %cst_99 = arith.constant 1.000000e+00 : f32
    %204 = vector.broadcast %cst_99 : f32 to vector<8x128xf32>
    %205 = arith.addf %204, %203 : vector<8x128xf32>
    %206 = arith.divf %204, %205 : vector<8x128xf32>
    %207 = vector.extract_strided_slice %28 {offsets = [2, 0, 0], sizes = [1, 8, 128], strides = [1, 1, 1]} : vector<8x8x128xf32> to vector<1x8x128xf32>
    %208 = vector.shape_cast %207 : vector<1x8x128xf32> to vector<8x128xf32>
    %cst_100 = arith.constant dense<0.000000e+00> : vector<8x128xf32>
    %209 = tpu.matmul %158, %34, %cst_100 {dimension_numbers = #tpu.dot_dimension_numbers<[1], [0], [0], [1], [0, 0, 1, 1], [], []>} : vector<8x128xf32>, vector<128x128xf32>, vector<8x128xf32> -> vector<8x128xf32>
    %210 = arith.addf %209, %50 : vector<8x128xf32>
    %211 = arith.mulf %197, %210 : vector<8x128xf32>
    %212 = arith.addf %208, %211 : vector<8x128xf32>
    %213 = math.tanh %212 : vector<8x128xf32>
    %cst_101 = arith.constant 1.000000e+00 : f32
    %214 = vector.broadcast %cst_101 : f32 to vector<8x128xf32>
    %215 = arith.subf %214, %206 : vector<8x128xf32>
    %216 = arith.mulf %215, %213 : vector<8x128xf32>
    %217 = arith.mulf %206, %158 : vector<8x128xf32>
    %218 = arith.addf %216, %217 : vector<8x128xf32>
    %cst_102 = arith.constant dense<0.000000e+00> : vector<8x128xf32>
    %219 = tpu.matmul %218, %36, %cst_102 {dimension_numbers = #tpu.dot_dimension_numbers<[1], [0], [0], [1], [0, 0, 1, 1], [], []>} : vector<8x128xf32>, vector<128x128xf32>, vector<8x128xf32> -> vector<8x128xf32>
    %cst_103 = arith.constant dense<0.000000e+00> : vector<8x128xf32>
    %220 = tpu.matmul %188, %42, %cst_103 {dimension_numbers = #tpu.dot_dimension_numbers<[1], [0], [0], [1], [0, 0, 1, 1], [], []>} : vector<8x128xf32>, vector<128x128xf32>, vector<8x128xf32> -> vector<8x128xf32>
    %221 = arith.addf %219, %220 : vector<8x128xf32>
    %222 = arith.addf %221, %54 : vector<8x128xf32>
    %223 = arith.negf %222 : vector<8x128xf32>
    %224 = math.exp %223 : vector<8x128xf32>
    %cst_104 = arith.constant 1.000000e+00 : f32
    %225 = vector.broadcast %cst_104 : f32 to vector<8x128xf32>
    %226 = arith.addf %225, %224 : vector<8x128xf32>
    %227 = arith.divf %225, %226 : vector<8x128xf32>
    %cst_105 = arith.constant dense<0.000000e+00> : vector<8x128xf32>
    %228 = tpu.matmul %218, %38, %cst_105 {dimension_numbers = #tpu.dot_dimension_numbers<[1], [0], [0], [1], [0, 0, 1, 1], [], []>} : vector<8x128xf32>, vector<128x128xf32>, vector<8x128xf32> -> vector<8x128xf32>
    %cst_106 = arith.constant dense<0.000000e+00> : vector<8x128xf32>
    %229 = tpu.matmul %188, %44, %cst_106 {dimension_numbers = #tpu.dot_dimension_numbers<[1], [0], [0], [1], [0, 0, 1, 1], [], []>} : vector<8x128xf32>, vector<128x128xf32>, vector<8x128xf32> -> vector<8x128xf32>
    %230 = arith.addf %228, %229 : vector<8x128xf32>
    %231 = arith.addf %230, %58 : vector<8x128xf32>
    %232 = arith.negf %231 : vector<8x128xf32>
    %233 = math.exp %232 : vector<8x128xf32>
    %cst_107 = arith.constant 1.000000e+00 : f32
    %234 = vector.broadcast %cst_107 : f32 to vector<8x128xf32>
    %235 = arith.addf %234, %233 : vector<8x128xf32>
    %236 = arith.divf %234, %235 : vector<8x128xf32>
    %cst_108 = arith.constant dense<0.000000e+00> : vector<8x128xf32>
    %237 = tpu.matmul %218, %40, %cst_108 {dimension_numbers = #tpu.dot_dimension_numbers<[1], [0], [0], [1], [0, 0, 1, 1], [], []>} : vector<8x128xf32>, vector<128x128xf32>, vector<8x128xf32> -> vector<8x128xf32>
    %238 = arith.addf %237, %62 : vector<8x128xf32>
    %cst_109 = arith.constant dense<0.000000e+00> : vector<8x128xf32>
    %239 = tpu.matmul %188, %46, %cst_109 {dimension_numbers = #tpu.dot_dimension_numbers<[1], [0], [0], [1], [0, 0, 1, 1], [], []>} : vector<8x128xf32>, vector<128x128xf32>, vector<8x128xf32> -> vector<8x128xf32>
    %240 = arith.addf %239, %66 : vector<8x128xf32>
    %241 = arith.mulf %227, %240 : vector<8x128xf32>
    %242 = arith.addf %238, %241 : vector<8x128xf32>
    %243 = math.tanh %242 : vector<8x128xf32>
    %cst_110 = arith.constant 1.000000e+00 : f32
    %244 = vector.broadcast %cst_110 : f32 to vector<8x128xf32>
    %245 = arith.subf %244, %236 : vector<8x128xf32>
    %246 = arith.mulf %245, %243 : vector<8x128xf32>
    %247 = arith.mulf %236, %188 : vector<8x128xf32>
    %248 = arith.addf %246, %247 : vector<8x128xf32>
    %249 = vector.extract_strided_slice %12 {offsets = [3, 0, 0], sizes = [1, 8, 128], strides = [1, 1, 1]} : vector<8x8x128xf32> to vector<1x8x128xf32>
    %250 = vector.shape_cast %249 : vector<1x8x128xf32> to vector<8x128xf32>
    %cst_111 = arith.constant dense<0.000000e+00> : vector<8x128xf32>
    %251 = tpu.matmul %218, %30, %cst_111 {dimension_numbers = #tpu.dot_dimension_numbers<[1], [0], [0], [1], [0, 0, 1, 1], [], []>} : vector<8x128xf32>, vector<128x128xf32>, vector<8x128xf32> -> vector<8x128xf32>
    %252 = arith.addf %250, %251 : vector<8x128xf32>
    %253 = arith.negf %252 : vector<8x128xf32>
    %254 = math.exp %253 : vector<8x128xf32>
    %cst_112 = arith.constant 1.000000e+00 : f32
    %255 = vector.broadcast %cst_112 : f32 to vector<8x128xf32>
    %256 = arith.addf %255, %254 : vector<8x128xf32>
    %257 = arith.divf %255, %256 : vector<8x128xf32>
    %258 = vector.extract_strided_slice %20 {offsets = [3, 0, 0], sizes = [1, 8, 128], strides = [1, 1, 1]} : vector<8x8x128xf32> to vector<1x8x128xf32>
    %259 = vector.shape_cast %258 : vector<1x8x128xf32> to vector<8x128xf32>
    %cst_113 = arith.constant dense<0.000000e+00> : vector<8x128xf32>
    %260 = tpu.matmul %218, %32, %cst_113 {dimension_numbers = #tpu.dot_dimension_numbers<[1], [0], [0], [1], [0, 0, 1, 1], [], []>} : vector<8x128xf32>, vector<128x128xf32>, vector<8x128xf32> -> vector<8x128xf32>
    %261 = arith.addf %259, %260 : vector<8x128xf32>
    %262 = arith.negf %261 : vector<8x128xf32>
    %263 = math.exp %262 : vector<8x128xf32>
    %cst_114 = arith.constant 1.000000e+00 : f32
    %264 = vector.broadcast %cst_114 : f32 to vector<8x128xf32>
    %265 = arith.addf %264, %263 : vector<8x128xf32>
    %266 = arith.divf %264, %265 : vector<8x128xf32>
    %267 = vector.extract_strided_slice %28 {offsets = [3, 0, 0], sizes = [1, 8, 128], strides = [1, 1, 1]} : vector<8x8x128xf32> to vector<1x8x128xf32>
    %268 = vector.shape_cast %267 : vector<1x8x128xf32> to vector<8x128xf32>
    %cst_115 = arith.constant dense<0.000000e+00> : vector<8x128xf32>
    %269 = tpu.matmul %218, %34, %cst_115 {dimension_numbers = #tpu.dot_dimension_numbers<[1], [0], [0], [1], [0, 0, 1, 1], [], []>} : vector<8x128xf32>, vector<128x128xf32>, vector<8x128xf32> -> vector<8x128xf32>
    %270 = arith.addf %269, %50 : vector<8x128xf32>
    %271 = arith.mulf %257, %270 : vector<8x128xf32>
    %272 = arith.addf %268, %271 : vector<8x128xf32>
    %273 = math.tanh %272 : vector<8x128xf32>
    %cst_116 = arith.constant 1.000000e+00 : f32
    %274 = vector.broadcast %cst_116 : f32 to vector<8x128xf32>
    %275 = arith.subf %274, %266 : vector<8x128xf32>
    %276 = arith.mulf %275, %273 : vector<8x128xf32>
    %277 = arith.mulf %266, %218 : vector<8x128xf32>
    %278 = arith.addf %276, %277 : vector<8x128xf32>
    %cst_117 = arith.constant dense<0.000000e+00> : vector<8x128xf32>
    %279 = tpu.matmul %278, %36, %cst_117 {dimension_numbers = #tpu.dot_dimension_numbers<[1], [0], [0], [1], [0, 0, 1, 1], [], []>} : vector<8x128xf32>, vector<128x128xf32>, vector<8x128xf32> -> vector<8x128xf32>
    %cst_118 = arith.constant dense<0.000000e+00> : vector<8x128xf32>
    %280 = tpu.matmul %248, %42, %cst_118 {dimension_numbers = #tpu.dot_dimension_numbers<[1], [0], [0], [1], [0, 0, 1, 1], [], []>} : vector<8x128xf32>, vector<128x128xf32>, vector<8x128xf32> -> vector<8x128xf32>
    %281 = arith.addf %279, %280 : vector<8x128xf32>
    %282 = arith.addf %281, %54 : vector<8x128xf32>
    %283 = arith.negf %282 : vector<8x128xf32>
    %284 = math.exp %283 : vector<8x128xf32>
    %cst_119 = arith.constant 1.000000e+00 : f32
    %285 = vector.broadcast %cst_119 : f32 to vector<8x128xf32>
    %286 = arith.addf %285, %284 : vector<8x128xf32>
    %287 = arith.divf %285, %286 : vector<8x128xf32>
    %cst_120 = arith.constant dense<0.000000e+00> : vector<8x128xf32>
    %288 = tpu.matmul %278, %38, %cst_120 {dimension_numbers = #tpu.dot_dimension_numbers<[1], [0], [0], [1], [0, 0, 1, 1], [], []>} : vector<8x128xf32>, vector<128x128xf32>, vector<8x128xf32> -> vector<8x128xf32>
    %cst_121 = arith.constant dense<0.000000e+00> : vector<8x128xf32>
    %289 = tpu.matmul %248, %44, %cst_121 {dimension_numbers = #tpu.dot_dimension_numbers<[1], [0], [0], [1], [0, 0, 1, 1], [], []>} : vector<8x128xf32>, vector<128x128xf32>, vector<8x128xf32> -> vector<8x128xf32>
    %290 = arith.addf %288, %289 : vector<8x128xf32>
    %291 = arith.addf %290, %58 : vector<8x128xf32>
    %292 = arith.negf %291 : vector<8x128xf32>
    %293 = math.exp %292 : vector<8x128xf32>
    %cst_122 = arith.constant 1.000000e+00 : f32
    %294 = vector.broadcast %cst_122 : f32 to vector<8x128xf32>
    %295 = arith.addf %294, %293 : vector<8x128xf32>
    %296 = arith.divf %294, %295 : vector<8x128xf32>
    %cst_123 = arith.constant dense<0.000000e+00> : vector<8x128xf32>
    %297 = tpu.matmul %278, %40, %cst_123 {dimension_numbers = #tpu.dot_dimension_numbers<[1], [0], [0], [1], [0, 0, 1, 1], [], []>} : vector<8x128xf32>, vector<128x128xf32>, vector<8x128xf32> -> vector<8x128xf32>
    %298 = arith.addf %297, %62 : vector<8x128xf32>
    %cst_124 = arith.constant dense<0.000000e+00> : vector<8x128xf32>
    %299 = tpu.matmul %248, %46, %cst_124 {dimension_numbers = #tpu.dot_dimension_numbers<[1], [0], [0], [1], [0, 0, 1, 1], [], []>} : vector<8x128xf32>, vector<128x128xf32>, vector<8x128xf32> -> vector<8x128xf32>
    %300 = arith.addf %299, %66 : vector<8x128xf32>
    %301 = arith.mulf %287, %300 : vector<8x128xf32>
    %302 = arith.addf %298, %301 : vector<8x128xf32>
    %303 = math.tanh %302 : vector<8x128xf32>
    %cst_125 = arith.constant 1.000000e+00 : f32
    %304 = vector.broadcast %cst_125 : f32 to vector<8x128xf32>
    %305 = arith.subf %304, %296 : vector<8x128xf32>
    %306 = arith.mulf %305, %303 : vector<8x128xf32>
    %307 = arith.mulf %296, %248 : vector<8x128xf32>
    %308 = arith.addf %306, %307 : vector<8x128xf32>
    %309 = vector.extract_strided_slice %12 {offsets = [4, 0, 0], sizes = [1, 8, 128], strides = [1, 1, 1]} : vector<8x8x128xf32> to vector<1x8x128xf32>
    %310 = vector.shape_cast %309 : vector<1x8x128xf32> to vector<8x128xf32>
    %cst_126 = arith.constant dense<0.000000e+00> : vector<8x128xf32>
    %311 = tpu.matmul %278, %30, %cst_126 {dimension_numbers = #tpu.dot_dimension_numbers<[1], [0], [0], [1], [0, 0, 1, 1], [], []>} : vector<8x128xf32>, vector<128x128xf32>, vector<8x128xf32> -> vector<8x128xf32>
    %312 = arith.addf %310, %311 : vector<8x128xf32>
    %313 = arith.negf %312 : vector<8x128xf32>
    %314 = math.exp %313 : vector<8x128xf32>
    %cst_127 = arith.constant 1.000000e+00 : f32
    %315 = vector.broadcast %cst_127 : f32 to vector<8x128xf32>
    %316 = arith.addf %315, %314 : vector<8x128xf32>
    %317 = arith.divf %315, %316 : vector<8x128xf32>
    %318 = vector.extract_strided_slice %20 {offsets = [4, 0, 0], sizes = [1, 8, 128], strides = [1, 1, 1]} : vector<8x8x128xf32> to vector<1x8x128xf32>
    %319 = vector.shape_cast %318 : vector<1x8x128xf32> to vector<8x128xf32>
    %cst_128 = arith.constant dense<0.000000e+00> : vector<8x128xf32>
    %320 = tpu.matmul %278, %32, %cst_128 {dimension_numbers = #tpu.dot_dimension_numbers<[1], [0], [0], [1], [0, 0, 1, 1], [], []>} : vector<8x128xf32>, vector<128x128xf32>, vector<8x128xf32> -> vector<8x128xf32>
    %321 = arith.addf %319, %320 : vector<8x128xf32>
    %322 = arith.negf %321 : vector<8x128xf32>
    %323 = math.exp %322 : vector<8x128xf32>
    %cst_129 = arith.constant 1.000000e+00 : f32
    %324 = vector.broadcast %cst_129 : f32 to vector<8x128xf32>
    %325 = arith.addf %324, %323 : vector<8x128xf32>
    %326 = arith.divf %324, %325 : vector<8x128xf32>
    %327 = vector.extract_strided_slice %28 {offsets = [4, 0, 0], sizes = [1, 8, 128], strides = [1, 1, 1]} : vector<8x8x128xf32> to vector<1x8x128xf32>
    %328 = vector.shape_cast %327 : vector<1x8x128xf32> to vector<8x128xf32>
    %cst_130 = arith.constant dense<0.000000e+00> : vector<8x128xf32>
    %329 = tpu.matmul %278, %34, %cst_130 {dimension_numbers = #tpu.dot_dimension_numbers<[1], [0], [0], [1], [0, 0, 1, 1], [], []>} : vector<8x128xf32>, vector<128x128xf32>, vector<8x128xf32> -> vector<8x128xf32>
    %330 = arith.addf %329, %50 : vector<8x128xf32>
    %331 = arith.mulf %317, %330 : vector<8x128xf32>
    %332 = arith.addf %328, %331 : vector<8x128xf32>
    %333 = math.tanh %332 : vector<8x128xf32>
    %cst_131 = arith.constant 1.000000e+00 : f32
    %334 = vector.broadcast %cst_131 : f32 to vector<8x128xf32>
    %335 = arith.subf %334, %326 : vector<8x128xf32>
    %336 = arith.mulf %335, %333 : vector<8x128xf32>
    %337 = arith.mulf %326, %278 : vector<8x128xf32>
    %338 = arith.addf %336, %337 : vector<8x128xf32>
    %cst_132 = arith.constant dense<0.000000e+00> : vector<8x128xf32>
    %339 = tpu.matmul %338, %36, %cst_132 {dimension_numbers = #tpu.dot_dimension_numbers<[1], [0], [0], [1], [0, 0, 1, 1], [], []>} : vector<8x128xf32>, vector<128x128xf32>, vector<8x128xf32> -> vector<8x128xf32>
    %cst_133 = arith.constant dense<0.000000e+00> : vector<8x128xf32>
    %340 = tpu.matmul %308, %42, %cst_133 {dimension_numbers = #tpu.dot_dimension_numbers<[1], [0], [0], [1], [0, 0, 1, 1], [], []>} : vector<8x128xf32>, vector<128x128xf32>, vector<8x128xf32> -> vector<8x128xf32>
    %341 = arith.addf %339, %340 : vector<8x128xf32>
    %342 = arith.addf %341, %54 : vector<8x128xf32>
    %343 = arith.negf %342 : vector<8x128xf32>
    %344 = math.exp %343 : vector<8x128xf32>
    %cst_134 = arith.constant 1.000000e+00 : f32
    %345 = vector.broadcast %cst_134 : f32 to vector<8x128xf32>
    %346 = arith.addf %345, %344 : vector<8x128xf32>
    %347 = arith.divf %345, %346 : vector<8x128xf32>
    %cst_135 = arith.constant dense<0.000000e+00> : vector<8x128xf32>
    %348 = tpu.matmul %338, %38, %cst_135 {dimension_numbers = #tpu.dot_dimension_numbers<[1], [0], [0], [1], [0, 0, 1, 1], [], []>} : vector<8x128xf32>, vector<128x128xf32>, vector<8x128xf32> -> vector<8x128xf32>
    %cst_136 = arith.constant dense<0.000000e+00> : vector<8x128xf32>
    %349 = tpu.matmul %308, %44, %cst_136 {dimension_numbers = #tpu.dot_dimension_numbers<[1], [0], [0], [1], [0, 0, 1, 1], [], []>} : vector<8x128xf32>, vector<128x128xf32>, vector<8x128xf32> -> vector<8x128xf32>
    %350 = arith.addf %348, %349 : vector<8x128xf32>
    %351 = arith.addf %350, %58 : vector<8x128xf32>
    %352 = arith.negf %351 : vector<8x128xf32>
    %353 = math.exp %352 : vector<8x128xf32>
    %cst_137 = arith.constant 1.000000e+00 : f32
    %354 = vector.broadcast %cst_137 : f32 to vector<8x128xf32>
    %355 = arith.addf %354, %353 : vector<8x128xf32>
    %356 = arith.divf %354, %355 : vector<8x128xf32>
    %cst_138 = arith.constant dense<0.000000e+00> : vector<8x128xf32>
    %357 = tpu.matmul %338, %40, %cst_138 {dimension_numbers = #tpu.dot_dimension_numbers<[1], [0], [0], [1], [0, 0, 1, 1], [], []>} : vector<8x128xf32>, vector<128x128xf32>, vector<8x128xf32> -> vector<8x128xf32>
    %358 = arith.addf %357, %62 : vector<8x128xf32>
    %cst_139 = arith.constant dense<0.000000e+00> : vector<8x128xf32>
    %359 = tpu.matmul %308, %46, %cst_139 {dimension_numbers = #tpu.dot_dimension_numbers<[1], [0], [0], [1], [0, 0, 1, 1], [], []>} : vector<8x128xf32>, vector<128x128xf32>, vector<8x128xf32> -> vector<8x128xf32>
    %360 = arith.addf %359, %66 : vector<8x128xf32>
    %361 = arith.mulf %347, %360 : vector<8x128xf32>
    %362 = arith.addf %358, %361 : vector<8x128xf32>
    %363 = math.tanh %362 : vector<8x128xf32>
    %cst_140 = arith.constant 1.000000e+00 : f32
    %364 = vector.broadcast %cst_140 : f32 to vector<8x128xf32>
    %365 = arith.subf %364, %356 : vector<8x128xf32>
    %366 = arith.mulf %365, %363 : vector<8x128xf32>
    %367 = arith.mulf %356, %308 : vector<8x128xf32>
    %368 = arith.addf %366, %367 : vector<8x128xf32>
    %369 = vector.extract_strided_slice %12 {offsets = [5, 0, 0], sizes = [1, 8, 128], strides = [1, 1, 1]} : vector<8x8x128xf32> to vector<1x8x128xf32>
    %370 = vector.shape_cast %369 : vector<1x8x128xf32> to vector<8x128xf32>
    %cst_141 = arith.constant dense<0.000000e+00> : vector<8x128xf32>
    %371 = tpu.matmul %338, %30, %cst_141 {dimension_numbers = #tpu.dot_dimension_numbers<[1], [0], [0], [1], [0, 0, 1, 1], [], []>} : vector<8x128xf32>, vector<128x128xf32>, vector<8x128xf32> -> vector<8x128xf32>
    %372 = arith.addf %370, %371 : vector<8x128xf32>
    %373 = arith.negf %372 : vector<8x128xf32>
    %374 = math.exp %373 : vector<8x128xf32>
    %cst_142 = arith.constant 1.000000e+00 : f32
    %375 = vector.broadcast %cst_142 : f32 to vector<8x128xf32>
    %376 = arith.addf %375, %374 : vector<8x128xf32>
    %377 = arith.divf %375, %376 : vector<8x128xf32>
    %378 = vector.extract_strided_slice %20 {offsets = [5, 0, 0], sizes = [1, 8, 128], strides = [1, 1, 1]} : vector<8x8x128xf32> to vector<1x8x128xf32>
    %379 = vector.shape_cast %378 : vector<1x8x128xf32> to vector<8x128xf32>
    %cst_143 = arith.constant dense<0.000000e+00> : vector<8x128xf32>
    %380 = tpu.matmul %338, %32, %cst_143 {dimension_numbers = #tpu.dot_dimension_numbers<[1], [0], [0], [1], [0, 0, 1, 1], [], []>} : vector<8x128xf32>, vector<128x128xf32>, vector<8x128xf32> -> vector<8x128xf32>
    %381 = arith.addf %379, %380 : vector<8x128xf32>
    %382 = arith.negf %381 : vector<8x128xf32>
    %383 = math.exp %382 : vector<8x128xf32>
    %cst_144 = arith.constant 1.000000e+00 : f32
    %384 = vector.broadcast %cst_144 : f32 to vector<8x128xf32>
    %385 = arith.addf %384, %383 : vector<8x128xf32>
    %386 = arith.divf %384, %385 : vector<8x128xf32>
    %387 = vector.extract_strided_slice %28 {offsets = [5, 0, 0], sizes = [1, 8, 128], strides = [1, 1, 1]} : vector<8x8x128xf32> to vector<1x8x128xf32>
    %388 = vector.shape_cast %387 : vector<1x8x128xf32> to vector<8x128xf32>
    %cst_145 = arith.constant dense<0.000000e+00> : vector<8x128xf32>
    %389 = tpu.matmul %338, %34, %cst_145 {dimension_numbers = #tpu.dot_dimension_numbers<[1], [0], [0], [1], [0, 0, 1, 1], [], []>} : vector<8x128xf32>, vector<128x128xf32>, vector<8x128xf32> -> vector<8x128xf32>
    %390 = arith.addf %389, %50 : vector<8x128xf32>
    %391 = arith.mulf %377, %390 : vector<8x128xf32>
    %392 = arith.addf %388, %391 : vector<8x128xf32>
    %393 = math.tanh %392 : vector<8x128xf32>
    %cst_146 = arith.constant 1.000000e+00 : f32
    %394 = vector.broadcast %cst_146 : f32 to vector<8x128xf32>
    %395 = arith.subf %394, %386 : vector<8x128xf32>
    %396 = arith.mulf %395, %393 : vector<8x128xf32>
    %397 = arith.mulf %386, %338 : vector<8x128xf32>
    %398 = arith.addf %396, %397 : vector<8x128xf32>
    %cst_147 = arith.constant dense<0.000000e+00> : vector<8x128xf32>
    %399 = tpu.matmul %398, %36, %cst_147 {dimension_numbers = #tpu.dot_dimension_numbers<[1], [0], [0], [1], [0, 0, 1, 1], [], []>} : vector<8x128xf32>, vector<128x128xf32>, vector<8x128xf32> -> vector<8x128xf32>
    %cst_148 = arith.constant dense<0.000000e+00> : vector<8x128xf32>
    %400 = tpu.matmul %368, %42, %cst_148 {dimension_numbers = #tpu.dot_dimension_numbers<[1], [0], [0], [1], [0, 0, 1, 1], [], []>} : vector<8x128xf32>, vector<128x128xf32>, vector<8x128xf32> -> vector<8x128xf32>
    %401 = arith.addf %399, %400 : vector<8x128xf32>
    %402 = arith.addf %401, %54 : vector<8x128xf32>
    %403 = arith.negf %402 : vector<8x128xf32>
    %404 = math.exp %403 : vector<8x128xf32>
    %cst_149 = arith.constant 1.000000e+00 : f32
    %405 = vector.broadcast %cst_149 : f32 to vector<8x128xf32>
    %406 = arith.addf %405, %404 : vector<8x128xf32>
    %407 = arith.divf %405, %406 : vector<8x128xf32>
    %cst_150 = arith.constant dense<0.000000e+00> : vector<8x128xf32>
    %408 = tpu.matmul %398, %38, %cst_150 {dimension_numbers = #tpu.dot_dimension_numbers<[1], [0], [0], [1], [0, 0, 1, 1], [], []>} : vector<8x128xf32>, vector<128x128xf32>, vector<8x128xf32> -> vector<8x128xf32>
    %cst_151 = arith.constant dense<0.000000e+00> : vector<8x128xf32>
    %409 = tpu.matmul %368, %44, %cst_151 {dimension_numbers = #tpu.dot_dimension_numbers<[1], [0], [0], [1], [0, 0, 1, 1], [], []>} : vector<8x128xf32>, vector<128x128xf32>, vector<8x128xf32> -> vector<8x128xf32>
    %410 = arith.addf %408, %409 : vector<8x128xf32>
    %411 = arith.addf %410, %58 : vector<8x128xf32>
    %412 = arith.negf %411 : vector<8x128xf32>
    %413 = math.exp %412 : vector<8x128xf32>
    %cst_152 = arith.constant 1.000000e+00 : f32
    %414 = vector.broadcast %cst_152 : f32 to vector<8x128xf32>
    %415 = arith.addf %414, %413 : vector<8x128xf32>
    %416 = arith.divf %414, %415 : vector<8x128xf32>
    %cst_153 = arith.constant dense<0.000000e+00> : vector<8x128xf32>
    %417 = tpu.matmul %398, %40, %cst_153 {dimension_numbers = #tpu.dot_dimension_numbers<[1], [0], [0], [1], [0, 0, 1, 1], [], []>} : vector<8x128xf32>, vector<128x128xf32>, vector<8x128xf32> -> vector<8x128xf32>
    %418 = arith.addf %417, %62 : vector<8x128xf32>
    %cst_154 = arith.constant dense<0.000000e+00> : vector<8x128xf32>
    %419 = tpu.matmul %368, %46, %cst_154 {dimension_numbers = #tpu.dot_dimension_numbers<[1], [0], [0], [1], [0, 0, 1, 1], [], []>} : vector<8x128xf32>, vector<128x128xf32>, vector<8x128xf32> -> vector<8x128xf32>
    %420 = arith.addf %419, %66 : vector<8x128xf32>
    %421 = arith.mulf %407, %420 : vector<8x128xf32>
    %422 = arith.addf %418, %421 : vector<8x128xf32>
    %423 = math.tanh %422 : vector<8x128xf32>
    %cst_155 = arith.constant 1.000000e+00 : f32
    %424 = vector.broadcast %cst_155 : f32 to vector<8x128xf32>
    %425 = arith.subf %424, %416 : vector<8x128xf32>
    %426 = arith.mulf %425, %423 : vector<8x128xf32>
    %427 = arith.mulf %416, %368 : vector<8x128xf32>
    %428 = arith.addf %426, %427 : vector<8x128xf32>
    %429 = vector.extract_strided_slice %12 {offsets = [6, 0, 0], sizes = [1, 8, 128], strides = [1, 1, 1]} : vector<8x8x128xf32> to vector<1x8x128xf32>
    %430 = vector.shape_cast %429 : vector<1x8x128xf32> to vector<8x128xf32>
    %cst_156 = arith.constant dense<0.000000e+00> : vector<8x128xf32>
    %431 = tpu.matmul %398, %30, %cst_156 {dimension_numbers = #tpu.dot_dimension_numbers<[1], [0], [0], [1], [0, 0, 1, 1], [], []>} : vector<8x128xf32>, vector<128x128xf32>, vector<8x128xf32> -> vector<8x128xf32>
    %432 = arith.addf %430, %431 : vector<8x128xf32>
    %433 = arith.negf %432 : vector<8x128xf32>
    %434 = math.exp %433 : vector<8x128xf32>
    %cst_157 = arith.constant 1.000000e+00 : f32
    %435 = vector.broadcast %cst_157 : f32 to vector<8x128xf32>
    %436 = arith.addf %435, %434 : vector<8x128xf32>
    %437 = arith.divf %435, %436 : vector<8x128xf32>
    %438 = vector.extract_strided_slice %20 {offsets = [6, 0, 0], sizes = [1, 8, 128], strides = [1, 1, 1]} : vector<8x8x128xf32> to vector<1x8x128xf32>
    %439 = vector.shape_cast %438 : vector<1x8x128xf32> to vector<8x128xf32>
    %cst_158 = arith.constant dense<0.000000e+00> : vector<8x128xf32>
    %440 = tpu.matmul %398, %32, %cst_158 {dimension_numbers = #tpu.dot_dimension_numbers<[1], [0], [0], [1], [0, 0, 1, 1], [], []>} : vector<8x128xf32>, vector<128x128xf32>, vector<8x128xf32> -> vector<8x128xf32>
    %441 = arith.addf %439, %440 : vector<8x128xf32>
    %442 = arith.negf %441 : vector<8x128xf32>
    %443 = math.exp %442 : vector<8x128xf32>
    %cst_159 = arith.constant 1.000000e+00 : f32
    %444 = vector.broadcast %cst_159 : f32 to vector<8x128xf32>
    %445 = arith.addf %444, %443 : vector<8x128xf32>
    %446 = arith.divf %444, %445 : vector<8x128xf32>
    %447 = vector.extract_strided_slice %28 {offsets = [6, 0, 0], sizes = [1, 8, 128], strides = [1, 1, 1]} : vector<8x8x128xf32> to vector<1x8x128xf32>
    %448 = vector.shape_cast %447 : vector<1x8x128xf32> to vector<8x128xf32>
    %cst_160 = arith.constant dense<0.000000e+00> : vector<8x128xf32>
    %449 = tpu.matmul %398, %34, %cst_160 {dimension_numbers = #tpu.dot_dimension_numbers<[1], [0], [0], [1], [0, 0, 1, 1], [], []>} : vector<8x128xf32>, vector<128x128xf32>, vector<8x128xf32> -> vector<8x128xf32>
    %450 = arith.addf %449, %50 : vector<8x128xf32>
    %451 = arith.mulf %437, %450 : vector<8x128xf32>
    %452 = arith.addf %448, %451 : vector<8x128xf32>
    %453 = math.tanh %452 : vector<8x128xf32>
    %cst_161 = arith.constant 1.000000e+00 : f32
    %454 = vector.broadcast %cst_161 : f32 to vector<8x128xf32>
    %455 = arith.subf %454, %446 : vector<8x128xf32>
    %456 = arith.mulf %455, %453 : vector<8x128xf32>
    %457 = arith.mulf %446, %398 : vector<8x128xf32>
    %458 = arith.addf %456, %457 : vector<8x128xf32>
    %cst_162 = arith.constant dense<0.000000e+00> : vector<8x128xf32>
    %459 = tpu.matmul %458, %36, %cst_162 {dimension_numbers = #tpu.dot_dimension_numbers<[1], [0], [0], [1], [0, 0, 1, 1], [], []>} : vector<8x128xf32>, vector<128x128xf32>, vector<8x128xf32> -> vector<8x128xf32>
    %cst_163 = arith.constant dense<0.000000e+00> : vector<8x128xf32>
    %460 = tpu.matmul %428, %42, %cst_163 {dimension_numbers = #tpu.dot_dimension_numbers<[1], [0], [0], [1], [0, 0, 1, 1], [], []>} : vector<8x128xf32>, vector<128x128xf32>, vector<8x128xf32> -> vector<8x128xf32>
    %461 = arith.addf %459, %460 : vector<8x128xf32>
    %462 = arith.addf %461, %54 : vector<8x128xf32>
    %463 = arith.negf %462 : vector<8x128xf32>
    %464 = math.exp %463 : vector<8x128xf32>
    %cst_164 = arith.constant 1.000000e+00 : f32
    %465 = vector.broadcast %cst_164 : f32 to vector<8x128xf32>
    %466 = arith.addf %465, %464 : vector<8x128xf32>
    %467 = arith.divf %465, %466 : vector<8x128xf32>
    %cst_165 = arith.constant dense<0.000000e+00> : vector<8x128xf32>
    %468 = tpu.matmul %458, %38, %cst_165 {dimension_numbers = #tpu.dot_dimension_numbers<[1], [0], [0], [1], [0, 0, 1, 1], [], []>} : vector<8x128xf32>, vector<128x128xf32>, vector<8x128xf32> -> vector<8x128xf32>
    %cst_166 = arith.constant dense<0.000000e+00> : vector<8x128xf32>
    %469 = tpu.matmul %428, %44, %cst_166 {dimension_numbers = #tpu.dot_dimension_numbers<[1], [0], [0], [1], [0, 0, 1, 1], [], []>} : vector<8x128xf32>, vector<128x128xf32>, vector<8x128xf32> -> vector<8x128xf32>
    %470 = arith.addf %468, %469 : vector<8x128xf32>
    %471 = arith.addf %470, %58 : vector<8x128xf32>
    %472 = arith.negf %471 : vector<8x128xf32>
    %473 = math.exp %472 : vector<8x128xf32>
    %cst_167 = arith.constant 1.000000e+00 : f32
    %474 = vector.broadcast %cst_167 : f32 to vector<8x128xf32>
    %475 = arith.addf %474, %473 : vector<8x128xf32>
    %476 = arith.divf %474, %475 : vector<8x128xf32>
    %cst_168 = arith.constant dense<0.000000e+00> : vector<8x128xf32>
    %477 = tpu.matmul %458, %40, %cst_168 {dimension_numbers = #tpu.dot_dimension_numbers<[1], [0], [0], [1], [0, 0, 1, 1], [], []>} : vector<8x128xf32>, vector<128x128xf32>, vector<8x128xf32> -> vector<8x128xf32>
    %478 = arith.addf %477, %62 : vector<8x128xf32>
    %cst_169 = arith.constant dense<0.000000e+00> : vector<8x128xf32>
    %479 = tpu.matmul %428, %46, %cst_169 {dimension_numbers = #tpu.dot_dimension_numbers<[1], [0], [0], [1], [0, 0, 1, 1], [], []>} : vector<8x128xf32>, vector<128x128xf32>, vector<8x128xf32> -> vector<8x128xf32>
    %480 = arith.addf %479, %66 : vector<8x128xf32>
    %481 = arith.mulf %467, %480 : vector<8x128xf32>
    %482 = arith.addf %478, %481 : vector<8x128xf32>
    %483 = math.tanh %482 : vector<8x128xf32>
    %cst_170 = arith.constant 1.000000e+00 : f32
    %484 = vector.broadcast %cst_170 : f32 to vector<8x128xf32>
    %485 = arith.subf %484, %476 : vector<8x128xf32>
    %486 = arith.mulf %485, %483 : vector<8x128xf32>
    %487 = arith.mulf %476, %428 : vector<8x128xf32>
    %488 = arith.addf %486, %487 : vector<8x128xf32>
    %489 = vector.extract_strided_slice %12 {offsets = [7, 0, 0], sizes = [1, 8, 128], strides = [1, 1, 1]} : vector<8x8x128xf32> to vector<1x8x128xf32>
    %490 = vector.shape_cast %489 : vector<1x8x128xf32> to vector<8x128xf32>
    %cst_171 = arith.constant dense<0.000000e+00> : vector<8x128xf32>
    %491 = tpu.matmul %458, %30, %cst_171 {dimension_numbers = #tpu.dot_dimension_numbers<[1], [0], [0], [1], [0, 0, 1, 1], [], []>} : vector<8x128xf32>, vector<128x128xf32>, vector<8x128xf32> -> vector<8x128xf32>
    %492 = arith.addf %490, %491 : vector<8x128xf32>
    %493 = arith.negf %492 : vector<8x128xf32>
    %494 = math.exp %493 : vector<8x128xf32>
    %cst_172 = arith.constant 1.000000e+00 : f32
    %495 = vector.broadcast %cst_172 : f32 to vector<8x128xf32>
    %496 = arith.addf %495, %494 : vector<8x128xf32>
    %497 = arith.divf %495, %496 : vector<8x128xf32>
    %498 = vector.extract_strided_slice %20 {offsets = [7, 0, 0], sizes = [1, 8, 128], strides = [1, 1, 1]} : vector<8x8x128xf32> to vector<1x8x128xf32>
    %499 = vector.shape_cast %498 : vector<1x8x128xf32> to vector<8x128xf32>
    %cst_173 = arith.constant dense<0.000000e+00> : vector<8x128xf32>
    %500 = tpu.matmul %458, %32, %cst_173 {dimension_numbers = #tpu.dot_dimension_numbers<[1], [0], [0], [1], [0, 0, 1, 1], [], []>} : vector<8x128xf32>, vector<128x128xf32>, vector<8x128xf32> -> vector<8x128xf32>
    %501 = arith.addf %499, %500 : vector<8x128xf32>
    %502 = arith.negf %501 : vector<8x128xf32>
    %503 = math.exp %502 : vector<8x128xf32>
    %cst_174 = arith.constant 1.000000e+00 : f32
    %504 = vector.broadcast %cst_174 : f32 to vector<8x128xf32>
    %505 = arith.addf %504, %503 : vector<8x128xf32>
    %506 = arith.divf %504, %505 : vector<8x128xf32>
    %507 = vector.extract_strided_slice %28 {offsets = [7, 0, 0], sizes = [1, 8, 128], strides = [1, 1, 1]} : vector<8x8x128xf32> to vector<1x8x128xf32>
    %508 = vector.shape_cast %507 : vector<1x8x128xf32> to vector<8x128xf32>
    %cst_175 = arith.constant dense<0.000000e+00> : vector<8x128xf32>
    %509 = tpu.matmul %458, %34, %cst_175 {dimension_numbers = #tpu.dot_dimension_numbers<[1], [0], [0], [1], [0, 0, 1, 1], [], []>} : vector<8x128xf32>, vector<128x128xf32>, vector<8x128xf32> -> vector<8x128xf32>
    %510 = arith.addf %509, %50 : vector<8x128xf32>
    %511 = arith.mulf %497, %510 : vector<8x128xf32>
    %512 = arith.addf %508, %511 : vector<8x128xf32>
    %513 = math.tanh %512 : vector<8x128xf32>
    %cst_176 = arith.constant 1.000000e+00 : f32
    %514 = vector.broadcast %cst_176 : f32 to vector<8x128xf32>
    %515 = arith.subf %514, %506 : vector<8x128xf32>
    %516 = arith.mulf %515, %513 : vector<8x128xf32>
    %517 = arith.mulf %506, %458 : vector<8x128xf32>
    %518 = arith.addf %516, %517 : vector<8x128xf32>
    %cst_177 = arith.constant dense<0.000000e+00> : vector<8x128xf32>
    %519 = tpu.matmul %518, %36, %cst_177 {dimension_numbers = #tpu.dot_dimension_numbers<[1], [0], [0], [1], [0, 0, 1, 1], [], []>} : vector<8x128xf32>, vector<128x128xf32>, vector<8x128xf32> -> vector<8x128xf32>
    %cst_178 = arith.constant dense<0.000000e+00> : vector<8x128xf32>
    %520 = tpu.matmul %488, %42, %cst_178 {dimension_numbers = #tpu.dot_dimension_numbers<[1], [0], [0], [1], [0, 0, 1, 1], [], []>} : vector<8x128xf32>, vector<128x128xf32>, vector<8x128xf32> -> vector<8x128xf32>
    %521 = arith.addf %519, %520 : vector<8x128xf32>
    %522 = arith.addf %521, %54 : vector<8x128xf32>
    %523 = arith.negf %522 : vector<8x128xf32>
    %524 = math.exp %523 : vector<8x128xf32>
    %cst_179 = arith.constant 1.000000e+00 : f32
    %525 = vector.broadcast %cst_179 : f32 to vector<8x128xf32>
    %526 = arith.addf %525, %524 : vector<8x128xf32>
    %527 = arith.divf %525, %526 : vector<8x128xf32>
    %cst_180 = arith.constant dense<0.000000e+00> : vector<8x128xf32>
    %528 = tpu.matmul %518, %38, %cst_180 {dimension_numbers = #tpu.dot_dimension_numbers<[1], [0], [0], [1], [0, 0, 1, 1], [], []>} : vector<8x128xf32>, vector<128x128xf32>, vector<8x128xf32> -> vector<8x128xf32>
    %cst_181 = arith.constant dense<0.000000e+00> : vector<8x128xf32>
    %529 = tpu.matmul %488, %44, %cst_181 {dimension_numbers = #tpu.dot_dimension_numbers<[1], [0], [0], [1], [0, 0, 1, 1], [], []>} : vector<8x128xf32>, vector<128x128xf32>, vector<8x128xf32> -> vector<8x128xf32>
    %530 = arith.addf %528, %529 : vector<8x128xf32>
    %531 = arith.addf %530, %58 : vector<8x128xf32>
    %532 = arith.negf %531 : vector<8x128xf32>
    %533 = math.exp %532 : vector<8x128xf32>
    %cst_182 = arith.constant 1.000000e+00 : f32
    %534 = vector.broadcast %cst_182 : f32 to vector<8x128xf32>
    %535 = arith.addf %534, %533 : vector<8x128xf32>
    %536 = arith.divf %534, %535 : vector<8x128xf32>
    %cst_183 = arith.constant dense<0.000000e+00> : vector<8x128xf32>
    %537 = tpu.matmul %518, %40, %cst_183 {dimension_numbers = #tpu.dot_dimension_numbers<[1], [0], [0], [1], [0, 0, 1, 1], [], []>} : vector<8x128xf32>, vector<128x128xf32>, vector<8x128xf32> -> vector<8x128xf32>
    %538 = arith.addf %537, %62 : vector<8x128xf32>
    %cst_184 = arith.constant dense<0.000000e+00> : vector<8x128xf32>
    %539 = tpu.matmul %488, %46, %cst_184 {dimension_numbers = #tpu.dot_dimension_numbers<[1], [0], [0], [1], [0, 0, 1, 1], [], []>} : vector<8x128xf32>, vector<128x128xf32>, vector<8x128xf32> -> vector<8x128xf32>
    %540 = arith.addf %539, %66 : vector<8x128xf32>
    %541 = arith.mulf %527, %540 : vector<8x128xf32>
    %542 = arith.addf %538, %541 : vector<8x128xf32>
    %543 = math.tanh %542 : vector<8x128xf32>
    %cst_185 = arith.constant 1.000000e+00 : f32
    %544 = vector.broadcast %cst_185 : f32 to vector<8x128xf32>
    %545 = arith.subf %544, %536 : vector<8x128xf32>
    %546 = arith.mulf %545, %543 : vector<8x128xf32>
    %547 = arith.mulf %536, %488 : vector<8x128xf32>
    %548 = arith.addf %546, %547 : vector<8x128xf32>
    %c0_186 = arith.constant 0 : index
    %c0_187 = arith.constant 0 : index
    %549 = vector.load %arg13[%c0_186, %c0_187] : memref<8x128xf32, #tpu.memory_space<vmem>>, vector<8x128xf32>
    tpu.vector_store %arg13[%c0_186, %c0_187], %518 {strides = array<i32>} : memref<8x128xf32, #tpu.memory_space<vmem>>, vector<8x128xf32>,
    %c0_188 = arith.constant 0 : index
    %c0_189 = arith.constant 0 : index
    %550 = vector.load %arg14[%c0_188, %c0_189] : memref<8x128xf32, #tpu.memory_space<vmem>>, vector<8x128xf32>
    tpu.vector_store %arg14[%c0_188, %c0_189], %548 {strides = array<i32>} : memref<8x128xf32, #tpu.memory_space<vmem>>, vector<8x128xf32>,
    %c0_i32_190 = arith.constant 0 : i32
    %551 = arith.cmpi eq, %arg0, %c0_i32_190 : i32
    %552 = arith.extui %551 : i1 to i32
    %c0_i32_191 = arith.constant 0 : i32
    %553 = arith.cmpi ne, %552, %c0_i32_191 : i32
    scf.if %553 {
      %c0_192 = arith.constant 0 : index
      %c0_193 = arith.constant 0 : index
      %c0_194 = arith.constant 0 : index
      %554 = vector.load %arg8[%c0_192, %c0_193, %c0_194] : memref<2x128x128xf32, #tpu.memory_space<vmem>>, vector<1x128x128xf32>
      %555 = vector.shape_cast %554 : vector<1x128x128xf32> to vector<128x128xf32>
      %cst_195 = arith.constant dense<0.000000e+00> : vector<8x128xf32>
      %556 = tpu.matmul %518, %555, %cst_195 {dimension_numbers = #tpu.dot_dimension_numbers<[1], [0], [0], [1], [0, 0, 1, 1], [], []>} : vector<8x128xf32>, vector<128x128xf32>, vector<8x128xf32> -> vector<8x128xf32>
      %c1_196 = arith.constant 1 : index
      %c0_197 = arith.constant 0 : index
      %c0_198 = arith.constant 0 : index
      %557 = vector.load %arg8[%c1_196, %c0_197, %c0_198] : memref<2x128x128xf32, #tpu.memory_space<vmem>>, vector<1x128x128xf32>
      %558 = vector.shape_cast %557 : vector<1x128x128xf32> to vector<128x128xf32>
      %cst_199 = arith.constant dense<0.000000e+00> : vector<8x128xf32>
      %559 = tpu.matmul %548, %558, %cst_199 {dimension_numbers = #tpu.dot_dimension_numbers<[1], [0], [0], [1], [0, 0, 1, 1], [], []>} : vector<8x128xf32>, vector<128x128xf32>, vector<8x128xf32> -> vector<8x128xf32>
      %560 = arith.addf %556, %559 : vector<8x128xf32>
      %c0_200 = arith.constant 0 : index
      %c0_201 = arith.constant 0 : index
      %561 = vector.load %arg9[%c0_200, %c0_201] : memref<1x128xf32, #tpu.memory_space<vmem>>, vector<1x128xf32>
      %562 = vector.broadcast %561 : vector<1x128xf32> to vector<8x128xf32>
      %563 = arith.addf %560, %562 : vector<8x128xf32>
      %564 = math.tanh %563 : vector<8x128xf32>
      %c0_202 = arith.constant 0 : index
      %c0_203 = arith.constant 0 : index
      %565 = vector.load %arg10[%c0_202, %c0_203] : memref<128x128xf32, #tpu.memory_space<vmem>>, vector<128x128xf32>
      %cst_204 = arith.constant dense<0.000000e+00> : vector<8x128xf32>
      %566 = tpu.matmul %564, %565, %cst_204 {dimension_numbers = #tpu.dot_dimension_numbers<[1], [0], [0], [1], [0, 0, 1, 1], [], []>} : vector<8x128xf32>, vector<128x128xf32>, vector<8x128xf32> -> vector<8x128xf32>
      %c0_205 = arith.constant 0 : index
      %c0_206 = arith.constant 0 : index
      %567 = vector.load %arg11[%c0_205, %c0_206] : memref<1x128xf32, #tpu.memory_space<vmem>>, vector<1x128xf32>
      %568 = vector.broadcast %567 : vector<1x128xf32> to vector<8x128xf32>
      %569 = arith.addf %566, %568 : vector<8x128xf32>
      %cst_207 = arith.constant dense<0xFF800000> : vector<8xf32>
      %570 = vector.multi_reduction <maximumf>, %569, %cst_207 [1] : vector<8x128xf32> to vector<8xf32>
      %571 = vector.shape_cast %570 : vector<8xf32> to vector<8x1xf32>
      %572 = vector.broadcast %571 : vector<8x1xf32> to vector<8x128xf32>
      %573 = arith.subf %569, %572 : vector<8x128xf32>
      %574 = math.exp %573 : vector<8x128xf32>
      %cst_208 = arith.constant dense<0.000000e+00> : vector<8xf32>
      %575 = vector.multi_reduction <add>, %574, %cst_208 [1] : vector<8x128xf32> to vector<8xf32>
      %576 = vector.shape_cast %575 : vector<8xf32> to vector<8x1xf32>
      %577 = tpu.reciprocal %576 : vector<8x1xf32> -> vector<8x1xf32>
      %578 = vector.broadcast %577 : vector<8x1xf32> to vector<8x128xf32>
      %579 = arith.mulf %574, %578 : vector<8x128xf32>
      %c0_209 = arith.constant 0 : index
      %c0_210 = arith.constant 0 : index
      %580 = vector.load %arg12[%c0_209, %c0_210] : memref<8x128xf32, #tpu.memory_space<vmem>>, vector<8x128xf32>
      tpu.vector_store %arg12[%c0_209, %c0_210], %579 {strides = array<i32>} : memref<8x128xf32, #tpu.memory_space<vmem>>, vector<8x128xf32>,
    } else {
    }
    return
  }
  func.func @transform_0(%arg0: i32) -> (i32, i32, i32) {
    %c0_i32 = arith.constant 0 : i32
    %c0_i32_0 = arith.constant 0 : i32
    %c0_i32_1 = arith.constant 0 : i32
    return %arg0, %c0_i32, %c0_i32_0 : i32, i32, i32
  }
  func.func @transform_1(%arg0: i32) -> (i32, i32, i32) {
    %c0_i32 = arith.constant 0 : i32
    %c0_i32_0 = arith.constant 0 : i32
    %c0_i32_1 = arith.constant 0 : i32
    %c0_i32_2 = arith.constant 0 : i32
    return %c0_i32, %c0_i32_0, %c0_i32_1 : i32, i32, i32
  }
  func.func @transform_2(%arg0: i32) -> (i32, i32, i32) {
    %c0_i32 = arith.constant 0 : i32
    %c0_i32_0 = arith.constant 0 : i32
    %c0_i32_1 = arith.constant 0 : i32
    %c0_i32_2 = arith.constant 0 : i32
    return %c0_i32, %c0_i32_0, %c0_i32_1 : i32, i32, i32
  }
  func.func @transform_3(%arg0: i32) -> (i32, i32, i32) {
    %c0_i32 = arith.constant 0 : i32
    %c0_i32_0 = arith.constant 0 : i32
    %c0_i32_1 = arith.constant 0 : i32
    %c0_i32_2 = arith.constant 0 : i32
    return %c0_i32, %c0_i32_0, %c0_i32_1 : i32, i32, i32
  }
  func.func @transform_4(%arg0: i32) -> (i32, i32, i32) {
    %c0_i32 = arith.constant 0 : i32
    %c0_i32_0 = arith.constant 0 : i32
    %c0_i32_1 = arith.constant 0 : i32
    %c0_i32_2 = arith.constant 0 : i32
    return %c0_i32, %c0_i32_0, %c0_i32_1 : i32, i32, i32
  }
  func.func @transform_5(%arg0: i32) -> (i32, i32, i32) {
    %c0_i32 = arith.constant 0 : i32
    %c0_i32_0 = arith.constant 0 : i32
    %c0_i32_1 = arith.constant 0 : i32
    %c0_i32_2 = arith.constant 0 : i32
    return %c0_i32, %c0_i32_0, %c0_i32_1 : i32, i32, i32
  }
  func.func @transform_6(%arg0: i32) -> (i32, i32, i32) {
    %c0_i32 = arith.constant 0 : i32
    %c0_i32_0 = arith.constant 0 : i32
    %c0_i32_1 = arith.constant 0 : i32
    %c0_i32_2 = arith.constant 0 : i32
    return %c0_i32, %c0_i32_0, %c0_i32_1 : i32, i32, i32
  }
  func.func @transform_7(%arg0: i32) -> (i32, i32, i32) {
    %c0_i32 = arith.constant 0 : i32
    %c0_i32_0 = arith.constant 0 : i32
    %c0_i32_1 = arith.constant 0 : i32
    %c0_i32_2 = arith.constant 0 : i32
    return %c0_i32, %c0_i32_0, %c0_i32_1 : i32, i32, i32
  }
  func.func @transform_8(%arg0: i32) -> (i32, i32) {
    %c0_i32 = arith.constant 0 : i32
    %c0_i32_0 = arith.constant 0 : i32
    %c0_i32_1 = arith.constant 0 : i32
    return %c0_i32, %c0_i32_0 : i32, i32
  }
  func.func @transform_9(%arg0: i32) -> (i32, i32) {
    %c0_i32 = arith.constant 0 : i32
    %c0_i32_0 = arith.constant 0 : i32
    %c0_i32_1 = arith.constant 0 : i32
    return %c0_i32, %c0_i32_0 : i32, i32
  }
  func.func @transform_10(%arg0: i32) -> (i32, i32) {
    %c0_i32 = arith.constant 0 : i32
    %c0_i32_0 = arith.constant 0 : i32
    %c0_i32_1 = arith.constant 0 : i32
    return %c0_i32, %c0_i32_0 : i32, i32
  }
  func.func @transform_11(%arg0: i32) -> (i32, i32) {
    %c0_i32 = arith.constant 0 : i32
    %c0_i32_0 = arith.constant 0 : i32
    %c0_i32_1 = arith.constant 0 : i32
    return %c0_i32, %c0_i32_0 : i32, i32
  }
}

</mosaic_0001>

<bundles_post_ra>
// kernel: tpu_custom_call.1
= control target key start
LH: loop header
LB: loop body
LE: loop exit
PB: predicated region body
PF: predicated region fallthrough
CT: control target
= control target key end

     0   :  { %16 = vsyncpa [#allocation5], 0  ;;  %s14871_s0 = inlined_call_operand.hbm [shape: f32[8,8,128], index: 0, kind: input, shape index: {}]   ;;  %s14872_s1 = inlined_call_operand.hbm [shape: f32[3,128,128], index: 1, kind: input, shape index: {}]   ;;  %s14873_s2 = inlined_call_operand.hbm [shape: f32[3,128,128], index: 2, kind: input, shape index: {}]   ;;  %s14874_s3 = inlined_call_operand.vmem [shape: f32[4,1,128], index: 3, kind: input, shape index: {}]   ;;  %s14875_s4 = inlined_call_operand.hbm [shape: f32[3,128,128], index: 4, kind: input, shape index: {}]   ;;  %s14876_s5 = inlined_call_operand.hbm [shape: f32[3,128,128], index: 5, kind: input, shape index: {}]   ;;  %s14877_s6 = inlined_call_operand.vmem [shape: f32[4,1,128], index: 6, kind: input, shape index: {}]   ;;  %s14878_s7 = inlined_call_operand.hbm [shape: f32[2,128,128], index: 7, kind: input, shape index: {}]   ;;  %s14879_s8 = inlined_call_operand.vmem [shape: f32[1,128], index: 8, kind: input, shape index: {}]   ;;  %s14880_s9 = inlined_call_operand.hbm [shape: f32[128,128], index: 9, kind: input, shape index: {}]   ;;  %s14881_s10 = inlined_call_operand.vmem [shape: f32[1,128], index: 10, kind: input, shape index: {}]   ;;  %s14882_s11 = inlined_call_operand.hbm [shape: f32[8,128], index: 11, kind: output, shape index: {}]  }
   0x1   :  { %17 = vsyncpa [#allocation8], 0 }
   0x2   :  { %18 = vsyncpa [#allocation11], 0 }
   0x3   :  { %19 = vsyncpa [#allocation14], 0 }
   0x4   :  { %20 = vsyncpa [#allocation6], 0  ;;  %s12834_s17 = smov [#allocation7]   ;;  %s12835_s19 = smov [#allocation10]  }
   0x5   :  { %s38_s18 = sshll.u32 %s12834_s17, 4  ;;  %s64_s20 = sshll.u32 %s12835_s19, 4  ;;  %s39_s18 = int_to_ptr.vmem [resolvable:$true] %s38_s18  ;;  %s12907_s20 = int_to_ptr.vmem [resolvable:$true] %s64_s20 }
   0x6   :  { %s12648_s23 = scalar_lea.hbm %s14872_s1, 6144 }
   0x7   :  { %p12649_p0 = scmp.ne.s32.totalorder %s14872_s1, %s12648_s23  ;;  %p12652_p1 = scmp.lt.u32.totalorder %s12648_s23, %s14872_s1 }
   0x9   :  { %p12654_p2 = pnand %p12652_p1, %p12649_p0 }
   0xb   :  { %12657 = shalt.err (!%p12654_p2)
}
   0xc   :  { %s12658_s28 = scalar_lea.vmem %s39_s18, 6144  ;;  %p12663_p4 = scmp.lt.s32.totalorder %s39_s18, %s39_s18 }
   0xd   :  { %p12659_p3 = scmp.ne.s32.totalorder %s39_s18, %s12658_s28  ;;  %p12664_p5 = scmp.lt.s32.totalorder %s12658_s28, %s12658_s28 }
   0xf   :  { %p12665_p6 = por %p12664_p5, %p12663_p4 }
  0x11   :  { %p12666_p7 = pnand %p12665_p6, %p12659_p3 }
  0x13   :  { %12669 = shalt.err (!%p12666_p7)
}
  0x14   :  { %s12836_s29 = smov 128   ;;  %s12837_s30 = smov 8  }
  0x15   :  { %44 = dma.hbm_to_vmem [thread:$0]  %s14872_s1, 6144, %s39_s18, [#allocation8], %s12836_s29, %s12836_s29, %s12837_s30  }
  0x16   :  { %s12670_s16 = scalar_lea.hbm %s14875_s4, 6144 }
  0x17   :  { %p12671_p8 = scmp.ne.s32.totalorder %s14875_s4, %s12670_s16  ;;  %p12674_p9 = scmp.lt.u32.totalorder %s12670_s16, %s14875_s4 }
  0x19   :  { %p12676_p10 = pnand %p12674_p9, %p12671_p8 }
  0x1b   :  { %12679 = shalt.err (!%p12676_p10)
}
  0x1c   :  { %s12680_s23 = scalar_lea.vmem %s12907_s20, 6144  ;;  %p12685_p12 = scmp.lt.s32.totalorder %s12907_s20, %s12907_s20 }
  0x1d   :  { %p12681_p11 = scmp.ne.s32.totalorder %s12907_s20, %s12680_s23  ;;  %p12686_p13 = scmp.lt.s32.totalorder %s12680_s23, %s12680_s23 }
  0x1f   :  { %p12687_p0 = por %p12686_p13, %p12685_p12 }
  0x21   :  { %p12688_p1 = pnand %p12687_p0, %p12681_p11 }
  0x23   :  { %12691 = shalt.err (!%p12688_p1)
}
  0x24   :  { %70 = dma.hbm_to_vmem [thread:$0]  %s14875_s4, 6144, %s12907_s20, [#allocation11], %s12836_s29, %s12836_s29, %s12837_s30  }
  0x25   :  { %s12838_s24 = smov [#allocation13]   ;;  %s12839_s26 = smov [#allocation4]  }
  0x26   :  { %s90_s25 = sshll.u32 %s12838_s24, 4  ;;  %s26_s27 = sshll.u32 %s12839_s26, 4  ;;  %s91_s25 = int_to_ptr.vmem [resolvable:$true] %s90_s25  ;;  %s12944_s27 = int_to_ptr.vmem [resolvable:$true] %s26_s27 }
  0x27   :  { %s12692_s13 = scalar_lea.hbm %s14878_s7, 4096 }
  0x28   :  { %p12693_p2 = scmp.ne.s32.totalorder %s14878_s7, %s12692_s13  ;;  %p12696_p3 = scmp.lt.u32.totalorder %s12692_s13, %s14878_s7 }
  0x2a   :  { %p12698_p4 = pnand %p12696_p3, %p12693_p2 }
  0x2c   :  { %12701 = shalt.err (!%p12698_p4)
}
  0x2d   :  { %s12702_s4 = scalar_lea.vmem %s91_s25, 4096  ;;  %p12707_p6 = scmp.lt.s32.totalorder %s91_s25, %s91_s25 }
  0x2e   :  { %p12703_p5 = scmp.ne.s32.totalorder %s91_s25, %s12702_s4  ;;  %p12708_p7 = scmp.lt.s32.totalorder %s12702_s4, %s12702_s4 }
  0x30   :  { %p12709_p8 = por %p12708_p7, %p12707_p6 }
  0x32   :  { %p12710_p9 = pnand %p12709_p8, %p12703_p5 }
  0x34   :  { %12713 = shalt.err (!%p12710_p9)
}
  0x35   :  { %96 = dma.hbm_to_vmem [thread:$0]  %s14878_s7, 4096, %s91_s25, [#allocation14], %s12836_s29, %s12836_s29, %s12837_s30  }
  0x36   :  { %s12714_s23 = scalar_lea.hbm %s14871_s0, 1024 }
  0x37   :  { %p12715_p10 = scmp.ne.s32.totalorder %s14871_s0, %s12714_s23  ;;  %p12718_p11 = scmp.lt.u32.totalorder %s12714_s23, %s14871_s0 }
  0x39   :  { %p12720_p12 = pnand %p12718_p11, %p12715_p10 }
  0x3b   :  { %12723 = shalt.err (!%p12720_p12)
}
  0x3c   :  { %s12724_s28 = scalar_lea.vmem %s12944_s27, 1024  ;;  %p12729_p0 = scmp.lt.s32.totalorder %s12944_s27, %s12944_s27 }
  0x3d   :  { %p12725_p13 = scmp.ne.s32.totalorder %s12944_s27, %s12724_s28  ;;  %p12730_p1 = scmp.lt.s32.totalorder %s12724_s28, %s12724_s28 }
  0x3f   :  { %p12731_p2 = por %p12730_p1, %p12729_p0 }
  0x41   :  { %p12732_p3 = pnand %p12731_p2, %p12725_p13 }
  0x43   :  { %12735 = shalt.err (!%p12732_p3)
}
  0x44   :  { %32 = dma.hbm_to_vmem [thread:$0]  %s14871_s0, 1024, %s12944_s27, [#allocation5], %s12836_s29, %s12836_s29, %s12837_s30  }
  0x45   :  { %s12840_s12 = smov [#allocation9]   ;;  %s12841_s14 = smov [#allocation12]  }
  0x46   :  { %s50_s13 = sshll.u32 %s12840_s12, 4  ;;  %s76_s15 = sshll.u32 %s12841_s14, 4  ;;  %s51_s13 = int_to_ptr.vmem [resolvable:$true] %s50_s13  ;;  %s12981_s15 = int_to_ptr.vmem [resolvable:$true] %s76_s15 }
  0x47   :  { %s12736_s4 = scalar_lea.hbm %s14873_s2, 6144 }
  0x48   :  { %p12737_p4 = scmp.ne.s32.totalorder %s14873_s2, %s12736_s4  ;;  %p12740_p5 = scmp.lt.u32.totalorder %s12736_s4, %s14873_s2 }
  0x4a   :  { %p12742_p6 = pnand %p12740_p5, %p12737_p4 }
  0x4c   :  { %12745 = shalt.err (!%p12742_p6)
}
  0x4d   :  { %s12746_s0 = scalar_lea.vmem %s51_s13, 6144  ;;  %p12751_p8 = scmp.lt.s32.totalorder %s51_s13, %s51_s13 }
  0x4e   :  { %p12747_p7 = scmp.ne.s32.totalorder %s51_s13, %s12746_s0  ;;  %p12752_p9 = scmp.lt.s32.totalorder %s12746_s0, %s12746_s0 }
  0x50   :  { %p12753_p10 = por %p12752_p9, %p12751_p8 }
  0x52   :  { %p12754_p11 = pnand %p12753_p10, %p12747_p7 }
  0x54   :  { %12757 = shalt.err (!%p12754_p11)
}
  0x55   :  { %56 = dma.hbm_to_vmem [thread:$0]  %s14873_s2, 6144, %s51_s13, [#allocation8], %s12836_s29, %s12836_s29, %s12837_s30  }
  0x56   :  { %s12758_s24 = scalar_lea.hbm %s14876_s5, 6144 }
  0x57   :  { %p12759_p12 = scmp.ne.s32.totalorder %s14876_s5, %s12758_s24  ;;  %p12762_p13 = scmp.lt.u32.totalorder %s12758_s24, %s14876_s5 }
  0x59   :  { %p12764_p0 = pnand %p12762_p13, %p12759_p12 }
  0x5b   :  { %12767 = shalt.err (!%p12764_p0)
}
  0x5c   :  { %s12768_s12 = scalar_lea.vmem %s12981_s15, 6144  ;;  %p12773_p2 = scmp.lt.s32.totalorder %s12981_s15, %s12981_s15 }
  0x5d   :  { %p12769_p1 = scmp.ne.s32.totalorder %s12981_s15, %s12768_s12  ;;  %p12774_p3 = scmp.lt.s32.totalorder %s12768_s12, %s12768_s12 }
  0x5f   :  { %p12775_p4 = por %p12774_p3, %p12773_p2 }
  0x61   :  { %p12776_p5 = pnand %p12775_p4, %p12769_p1 }
  0x63   :  { %12779 = shalt.err (!%p12776_p5)
}
  0x64   :  { %82 = dma.hbm_to_vmem [thread:$0]  %s14876_s5, 6144, %s12981_s15, [#allocation11], %s12836_s29, %s12836_s29, %s12837_s30  }
  0x65   :  { %s12842_s14 = smov [#allocation15]   ;;  %s12780_s20 = scalar_lea.hbm %s14880_s9, 2048 }
  0x66   :  { %s104_s16 = sshll.u32 %s12842_s14, 4  ;;  %p12781_p6 = scmp.ne.s32.totalorder %s14880_s9, %s12780_s20  ;;  %s105_s16 = int_to_ptr.vmem [resolvable:$true] %s104_s16 }
  0x67   :  { %p12784_p7 = scmp.lt.u32.totalorder %s12780_s20, %s14880_s9 }
  0x69   :  { %p12786_p8 = pnand %p12784_p7, %p12781_p6 }
  0x6b   :  { %12789 = shalt.err (!%p12786_p8)
}
  0x6c   :  { %s12790_s27 = scalar_lea.vmem %s105_s16, 2048  ;;  %p12795_p10 = scmp.lt.s32.totalorder %s105_s16, %s105_s16 }
  0x6d   :  { %p12791_p9 = scmp.ne.s32.totalorder %s105_s16, %s12790_s27  ;;  %p12796_p11 = scmp.lt.s32.totalorder %s12790_s27, %s12790_s27 }
  0x6f   :  { %p12797_p12 = por %p12796_p11, %p12795_p10 }
  0x71   :  { %p12798_p13 = pnand %p12797_p12, %p12791_p9 }
  0x73   :  { %12801 = shalt.err (!%p12798_p13)
}
  0x74   :  { %110 = dma.hbm_to_vmem [thread:$0]  %s14880_s9, 2048, %s105_s16, [#allocation14], %s12836_s29, %s12836_s29, %s12837_s30  }
  0x75   :  { %12824 = dma.done.wait [#allocation5], 1024  }
  0x76   :  { %12825 = vsyncadd [#allocation5], 4294966272 }
  0x77   :  { %12826 = dma.done.wait [#allocation8], 12288  }
  0x78   :  { %12827 = vsyncadd [#allocation8], 4294955008 }
  0x79   :  { %12828 = dma.done.wait [#allocation11], 12288  }
  0x7a   :  { %12829 = vsyncadd [#allocation11], 4294955008 }
  0x7b   :  { %12830 = dma.done.wait [#allocation14], 6144  }
  0x7c   :  { %12831 = vsyncadd [#allocation14], 4294961152  ;;  %v148_v0 = vld [vmem:[#allocation7] sm:$0xff]  ;;  %v149_v1 = vld [vmem:[#allocation7 + $0x8] sm:$0xff]  ;;  %v14891_v60 = vmov 0.0|0.0   ;;  %vm12844_vm0 = vmmov 0  }
  0x7d   :  { %v277_v2 = vld [vmem:[#allocation7 + $0x80] sm:$0xff]  ;;  %v10563_v3 = vpack.c.bf16 %v149_v1, %v148_v0  ;;  %v278_v4 = vld [vmem:[#allocation7 + $0x88] sm:$0xff]  ;;  %v150_v5 = vld [vmem:[#allocation7 + $0x10] sm:$0xff] }
  0x7e   :  { %v151_v6 = vld [vmem:[#allocation7 + $0x18] sm:$0xff]  ;;  %v10595_v7 = vpack.c.bf16 %v278_v4, %v277_v2  ;;  %v279_v9 = vld [vmem:[#allocation7 + $0x90] sm:$0xff]  ;;  %v152_v11 = vld [vmem:[#allocation7 + $0x20] sm:$0xff] }
  0x7f   :  { %v10567_v8 = vpack.c.bf16 %v151_v6, %v150_v5  ;;  %v280_v10 = vld [vmem:[#allocation7 + $0x98] sm:$0xff]  ;;  %10564 = vmatprep.subr.bf16.mxu0 %v10563_v3  ;;  %v153_v13 = vld [vmem:[#allocation7 + $0x28] sm:$0xff]  ;;  %v281_v14 = vld [vmem:[#allocation7 + $0xa0] sm:$0xff] }
  0x80   :  { %v10599_v12 = vpack.c.bf16 %v280_v10, %v279_v9  ;;  %v282_v15 = vld [vmem:[#allocation7 + $0xa8] sm:$0xff]  ;;  %10596 = vmatprep.subr.bf16.mxu1 %v10595_v7  ;;  %10566 = vmatpush3.bf16.msra.mxu0 %v10563_v3  ;;  %v10571_v16 = vpack.c.bf16 %v153_v13, %v152_v11  ;;  %v154_v18 = vld [vmem:[#allocation7 + $0x30] sm:$0xff]  ;;  %v155_v19 = vld [vmem:[#allocation7 + $0x38] sm:$0xff] }
  0x81   :  { %10598 = vmatpush3.bf16.msra.mxu1 %v10595_v7  ;;  %10568 = vmatprep.subr.bf16.mxu0 %v10567_v8  ;;  %v10603_v17 = vpack.c.bf16 %v282_v15, %v281_v14  ;;  %v283_v20 = vld [vmem:[#allocation7 + $0xb0] sm:$0xff]  ;;  %v284_v21 = vld [vmem:[#allocation7 + $0xb8] sm:$0xff]  ;;  %v10575_v22 = vpack.c.bf16 %v155_v19, %v154_v18  ;;  %v156_v24 = vld [vmem:[#allocation7 + $0x40] sm:$0xff] }
  0x82   :  { %10600 = vmatprep.subr.bf16.mxu1 %v10599_v12  ;;  %v10607_v23 = vpack.c.bf16 %v284_v21, %v283_v20  ;;  %v157_v25 = vld [vmem:[#allocation7 + $0x48] sm:$0xff]  ;;  %v13033_v26 = vld [vmem:[#allocation4] sm:$0xff]  ;;  %v158_v31 = vld [vmem:[#allocation7 + $0x50] sm:$0xff] }
  0x83   :  { %v285_v27 = vld [vmem:[#allocation7 + $0xc0] sm:$0xff]  ;;  %v286_v28 = vld [vmem:[#allocation7 + $0xc8] sm:$0xff]  ;;  %7838 = vmatprep.mubr.f32.mxu0 %v13033_v26  ;;  %7882 = vmatprep.mubr.f32.mxu1 %v13033_v26  ;;  %v10579_v29 = vpack.c.bf16 %v157_v25, %v156_v24  ;;  %v159_v32 = vld [vmem:[#allocation7 + $0x58] sm:$0xff] }
  0x84   :  { %10570 = vmatpush3.bf16.msra.mxu0 %v10567_v8  ;;  %v10611_v30 = vpack.c.bf16 %v286_v28, %v285_v27  ;;  %v287_v33 = vld [vmem:[#allocation7 + $0xd0] sm:$0xff]  ;;  %v288_v34 = vld [vmem:[#allocation7 + $0xd8] sm:$0xff]  ;;  %v10583_v35 = vpack.c.bf16 %v159_v32, %v158_v31  ;;  %v160_v37 = vld [vmem:[#allocation7 + $0x60] sm:$0xff]  ;;  %v14883_v31 = vmov 0.0  }
  0x85   :  { %10602 = vmatpush3.bf16.msra.mxu1 %v10599_v12  ;;  %10572 = vmatprep.subr.bf16.mxu0 %v10571_v16  ;;  %v10615_v36 = vpack.c.bf16 %v288_v34, %v287_v33  ;;  %v161_v38 = vld [vmem:[#allocation7 + $0x68] sm:$0xff]  ;;  %v289_v39 = vld [vmem:[#allocation7 + $0xe0] sm:$0xff]  ;;  %v162_v43 = vld [vmem:[#allocation7 + $0x70] sm:$0xff] }
  0x86   :  { %10604 = vmatprep.subr.bf16.mxu1 %v10603_v17  ;;  %v290_v40 = vld [vmem:[#allocation7 + $0xe8] sm:$0xff]  ;;  %v10587_v41 = vpack.c.bf16 %v161_v38, %v160_v37  ;;  %v163_v44 = vld [vmem:[#allocation7 + $0x78] sm:$0xff]  ;;  %v291_v45 = vld [vmem:[#allocation7 + $0xf0] sm:$0xff] }
  0x87   :  { %v10619_v42 = vpack.c.bf16 %v290_v40, %v289_v39  ;;  %v292_v46 = vld [vmem:[#allocation7 + $0xf8] sm:$0xff]  ;;  %v10591_v47 = vpack.c.bf16 %v163_v44, %v162_v43  ;;  %v407_v49 = vld [vmem:[#allocation7 + $0x100] sm:$0xff]  ;;  %v408_v50 = vld [vmem:[#allocation7 + $0x108] sm:$0xff] }
  0x88   :  { %10574 = vmatpush3.bf16.msra.mxu0 %v10571_v16  ;;  %v10623_v48 = vpack.c.bf16 %v292_v46, %v291_v45  ;;  %v10627_v51 = vpack.c.bf16 %v408_v50, %v407_v49  ;;  %v536_v52 = vld [vmem:[#allocation9] sm:$0xff]  ;;  %v537_v53 = vld [vmem:[#allocation9 + $0x8] sm:$0xff]  ;;  %v409_v54 = vld [vmem:[#allocation7 + $0x110] sm:$0xff] }
  0x89   :  { %10606 = vmatpush3.bf16.msra.mxu1 %v10603_v17  ;;  %10576 = vmatprep.subr.bf16.mxu0 %v10575_v22  ;;  %v410_v55 = vld [vmem:[#allocation7 + $0x118] sm:$0xff]  ;;  %v13037_v56 = vld [vmem:[#allocation4 + $0x8] sm:$0xff]  ;;  %v13039_v57 = vpack.c.bf16 %v537_v53, %v536_v52  ;;  %v538_v59 = vld [vmem:[#allocation9 + $0x10] sm:$0xff] }
  0x8a   :  { %10608 = vmatprep.subr.bf16.mxu1 %v10607_v23  ;;  %v10631_v58 = vpack.c.bf16 %v410_v55, %v409_v54  ;;  %v539_v61 = vld [vmem:[#allocation9 + $0x18] sm:$0xff]  ;;  %v411_v62 = vld [vmem:[#allocation7 + $0x120] sm:$0xff]  ;;  %v412_v63 = vld [vmem:[#allocation7 + $0x128] sm:$0xff] }
  0x8b   :  { %v13043_v0 = vld [vmem:[#allocation4 + $0x10] sm:$0xff]  ;;  %v13046_v1 = vld [vmem:[#allocation4 + $0x18] sm:$0xff]  ;;  %v13049_v2 = vpack.c.bf16 %v539_v61, %v538_v59  ;;  %v10635_v3 = vpack.c.bf16 %v412_v63, %v411_v62  ;;  %v540_v4 = vld [vmem:[#allocation9 + $0x20] sm:$0xff] }
  0x8c   :  { %10578 = vmatpush3.bf16.msra.mxu0 %v10575_v22  ;;  %v541_v5 = vld [vmem:[#allocation9 + $0x28] sm:$0xff]  ;;  %v413_v6 = vld [vmem:[#allocation7 + $0x130] sm:$0xff]  ;;  %v414_v7 = vld [vmem:[#allocation7 + $0x138] sm:$0xff] }
  0x8d   :  { %10610 = vmatpush3.bf16.msra.mxu1 %v10607_v23  ;;  %10580 = vmatprep.subr.bf16.mxu0 %v10579_v29  ;;  %v13055_v8 = vld [vmem:[#allocation4 + $0x20] sm:$0xff]  ;;  %v13058_v9 = vld [vmem:[#allocation4 + $0x28] sm:$0xff]  ;;  %v13061_v10 = vpack.c.bf16 %v541_v5, %v540_v4  ;;  %v10639_v11 = vpack.c.bf16 %v414_v7, %v413_v6  ;;  %v542_v12 = vld [vmem:[#allocation9 + $0x30] sm:$0xff] }
  0x8e   :  { %10612 = vmatprep.subr.bf16.mxu1 %v10611_v30  ;;  %v543_v13 = vld [vmem:[#allocation9 + $0x38] sm:$0xff]  ;;  %v415_v14 = vld [vmem:[#allocation7 + $0x140] sm:$0xff]  ;;  %v416_v15 = vld [vmem:[#allocation7 + $0x148] sm:$0xff] }
  0x8f   :  { %v13067_v16 = vld [vmem:[#allocation4 + $0x30] sm:$0xff]  ;;  %v13070_v17 = vld [vmem:[#allocation4 + $0x38] sm:$0xff]  ;;  %v13073_v18 = vpack.c.bf16 %v543_v13, %v542_v12  ;;  %v10643_v19 = vpack.c.bf16 %v416_v15, %v415_v14  ;;  %v544_v20 = vld [vmem:[#allocation9 + $0x40] sm:$0xff] }
  0x90   :  { %10582 = vmatpush3.bf16.msra.mxu0 %v10579_v29  ;;  %v545_v21 = vld [vmem:[#allocation9 + $0x48] sm:$0xff]  ;;  %v417_v22 = vld [vmem:[#allocation7 + $0x150] sm:$0xff]  ;;  %v418_v23 = vld [vmem:[#allocation7 + $0x158] sm:$0xff] }
  0x91   :  { %10614 = vmatpush3.bf16.msra.mxu1 %v10611_v30  ;;  %10584 = vmatprep.subr.bf16.mxu0 %v10583_v35  ;;  %v13081_v24 = vpack.c.bf16 %v545_v21, %v544_v20  ;;  %v10647_v25 = vpack.c.bf16 %v418_v23, %v417_v22  ;;  %v546_v27 = vld [vmem:[#allocation9 + $0x50] sm:$0xff]  ;;  %v547_v28 = vld [vmem:[#allocation9 + $0x58] sm:$0xff]  ;;  %v419_v29 = vld [vmem:[#allocation7 + $0x160] sm:$0xff] }
  0x92   :  { %10616 = vmatprep.subr.bf16.mxu1 %v10615_v36  ;;  %v420_v30 = vld [vmem:[#allocation7 + $0x168] sm:$0xff]  ;;  %v13088_v32 = vpack.c.bf16 %v547_v28, %v546_v27  ;;  %v548_v34 = vld [vmem:[#allocation9 + $0x60] sm:$0xff]  ;;  %v422_v37 = vld [vmem:[#allocation7 + $0x178] sm:$0xff] }
  0x93   :  { %v10651_v33 = vpack.c.bf16 %v420_v30, %v419_v29  ;;  %v550_v39 = vld [vmem:[#allocation9 + $0x70] sm:$0xff]  ;;  %v551_v40 = vld [vmem:[#allocation9 + $0x78] sm:$0xff]  ;;  %v554_v43 = vld [vmem:[#allocation9 + $0x88] sm:$0xff] }
  0x94   :  { %10586 = vmatpush3.bf16.msra.mxu0 %v10583_v35  ;;  %v549_v35 = vld [vmem:[#allocation9 + $0x68] sm:$0xff]  ;;  %v570_v44 = vld [vmem:[#allocation9 + $0x100] sm:$0xff]  ;;  %v556_v49 = vld [vmem:[#allocation9 + $0x98] sm:$0xff] }
  0x95   :  { %10618 = vmatpush3.bf16.msra.mxu1 %v10615_v36  ;;  %10588 = vmatprep.subr.bf16.mxu0 %v10587_v41  ;;  %v421_v36 = vld [vmem:[#allocation7 + $0x170] sm:$0xff]  ;;  %v571_v45 = vld [vmem:[#allocation9 + $0x108] sm:$0xff]  ;;  %v557_v54 = vld [vmem:[#allocation9 + $0xa0] sm:$0xff] }
  0x96   :  { %10620 = vmatprep.subr.bf16.mxu1 %v10619_v42  ;;  %v10655_v38 = vpack.c.bf16 %v422_v37, %v421_v36  ;;  %v572_v50 = vld [vmem:[#allocation9 + $0x110] sm:$0xff]  ;;  %v558_v55 = vld [vmem:[#allocation9 + $0xa8] sm:$0xff]  ;;  %v560_v63 = vld [vmem:[#allocation9 + $0xb8] sm:$0xff] }
  0x97   :  { %v575_v59 = vld [vmem:[#allocation9 + $0x128] sm:$0xff]  ;;  %v559_v62 = vld [vmem:[#allocation9 + $0xb0] sm:$0xff]  ;;  %v561_v5 = vld [vmem:[#allocation9 + $0xc0] sm:$0xff] }
  0x98   :  { %10590 = vmatpush3.bf16.msra.mxu0 %v10587_v41  ;;  %v13096_v41 = vpack.c.bf16 %v551_v40, %v550_v39  ;;  %v562_v6 = vld [vmem:[#allocation9 + $0xc8] sm:$0xff]  ;;  %v578_v7 = vld [vmem:[#allocation9 + $0x140] sm:$0xff]  ;;  %v563_v12 = vld [vmem:[#allocation9 + $0xd0] sm:$0xff] }
  0x99   :  { %10622 = vmatpush3.bf16.msra.mxu1 %v10619_v42  ;;  %10592 = vmatprep.subr.bf16.mxu0 %v10591_v47  ;;  %v553_v42 = vld [vmem:[#allocation9 + $0x80] sm:$0xff]  ;;  %v564_v13 = vld [vmem:[#allocation9 + $0xd8] sm:$0xff]  ;;  %v580_v14 = vld [vmem:[#allocation9 + $0x150] sm:$0xff] }
  0x9a   :  { %10624 = vmatprep.subr.bf16.mxu1 %v10623_v48  ;;  %v13099_v46 = vpack.c.bf16 %v554_v43, %v553_v42  ;;  %v581_v15 = vld [vmem:[#allocation9 + $0x158] sm:$0xff]  ;;  %v566_v20 = vld [vmem:[#allocation9 + $0xe8] sm:$0xff]  ;;  %v582_v21 = vld [vmem:[#allocation9 + $0x160] sm:$0xff] }
  0x9b   :  { %v583_v22 = vld [vmem:[#allocation9 + $0x168] sm:$0xff]  ;;  %v567_v27 = vld [vmem:[#allocation9 + $0xf0] sm:$0xff]  ;;  %v568_v28 = vld [vmem:[#allocation9 + $0xf8] sm:$0xff] }
  0x9c   :  { %10594 = vmatpush3.bf16.msra.mxu0 %v10591_v47  ;;  %15004 = vst [vmem:[#allocation22_spill] sm:$0xff] %v13099_v46  ;;  %v13103_v47 = vpack.c.bf16 %v571_v45, %v570_v44  ;;  %v584_v29 = vld [vmem:[#allocation9 + $0x170] sm:$0xff]  ;;  %v585_v30 = vld [vmem:[#allocation9 + $0x178] sm:$0xff]  ;;  %v637_v36 = vld [vmem:[#allocation12 + $0x8] sm:$0xff] }
  0x9d   :  { %10626 = vmatpush3.bf16.msra.mxu1 %v10623_v48  ;;  %10628 = vmatprep.subr.bf16.mxu0 %v10627_v51  ;;  %v555_v48 = vld [vmem:[#allocation9 + $0x90] sm:$0xff]  ;;  %v639_v39 = vld [vmem:[#allocation12 + $0x18] sm:$0xff]  ;;  %v640_v42 = vld [vmem:[#allocation12 + $0x20] sm:$0xff] }
  0x9e   :  { %10659 = vmatprep.subr.bf16.mxu1 %v14891_v60  ;;  %15005 = vst [vmem:[#allocation23_spill] sm:$0xff] %v13103_v47  ;;  %v13109_v52 = vpack.c.bf16 %v556_v49, %v555_v48  ;;  %v641_v43 = vld [vmem:[#allocation12 + $0x28] sm:$0xff]  ;;  %v642_v45 = vld [vmem:[#allocation12 + $0x30] sm:$0xff]  ;;  %v643_v48 = vld [vmem:[#allocation12 + $0x38] sm:$0xff] }
  0x9f   :  { %7839 = vmatmul.mubr.f32.vlgmr.msra.gmra.mrb[0].mxu0 %v13037_v56  ;;  %v13191_v44 = vpack.c.bf16 %v641_v43, %v640_v42  ;;  %v13195_v49 = vpack.c.bf16 %v643_v48, %v642_v45  ;;  %v665_v42 = vld [vmem:[#allocation12 + $0xe0] sm:$0xff]  ;;  %v666_v43 = vld [vmem:[#allocation12 + $0xe8] sm:$0xff]  ;;  %v667_v48 = vld [vmem:[#allocation12 + $0xf0] sm:$0xff] }
  0xa0   :  { %7883 = vmatmul.mubr.f32.vlgmr.msra.gmra.mrb[0].mxu1 %v13037_v56  ;;  %10630 = vmatpush3.bf16.msra.mxu0 %v10627_v51  ;;  %v573_v51 = vld [vmem:[#allocation9 + $0x118] sm:$0xff]  ;;  %15006 = vst [vmem:[#allocation24_spill] sm:$0xff] %v13109_v52  ;;  %v13242_v45 = vpack.c.bf16 %v666_v43, %v665_v42  ;;  %v592_v42 = vld [vmem:[#allocation10 + $0x30] sm:$0xff] }
  0xa1   :  { %10661 = vmatpush3.bf16.msra.mxu1 %v13039_v57  ;;  %10632 = vmatprep.subr.bf16.mxu0 %v10631_v58  ;;  %v13113_v53 = vpack.c.bf16 %v573_v51, %v572_v50  ;;  %15022 = vst [vmem:[#allocation40_spill] sm:$0xff] %v13191_v44  ;;  %15023 = vst [vmem:[#allocation41_spill] sm:$0xff] %v13195_v49  ;;  %v644_v50 = vld [vmem:[#allocation12 + $0x40] sm:$0xff]  ;;  %v645_v51 = vld [vmem:[#allocation12 + $0x48] sm:$0xff] }
  0xa2   :  { %10662 = vmatprep.subr.bf16.mxu1 %v14891_v60  ;;  %7841 = vmatprep.mubr.f32.mxu0 %v13043_v0  ;;  %15034 = vst [vmem:[#allocation52_spill] sm:$0xff] %v13242_v45  ;;  %v593_v43 = vld [vmem:[#allocation10 + $0x38] sm:$0xff] }
  0xa3   :  { %7885 = vmatprep.mubr.f32.mxu1 %v13043_v0  ;;  %7842 = vmatmul.mubr.f32.gmra.mrb[2].mxu0 %v13046_v1  ;;  %15007 = vst [vmem:[#allocation25_spill] sm:$0xff] %v13113_v53 }
  0xa4   :  { %10634 = vmatpush3.bf16.msra.mxu0 %v10631_v58  ;;  %7886 = vmatmul.mubr.f32.gmra.mrb[2].mxu1 %v13046_v1  ;;  %v574_v58 = vld [vmem:[#allocation9 + $0x120] sm:$0xff] }
  0xa5   :  { %10664 = vmatpush3.bf16.msra.mxu1 %v13049_v2  ;;  %10636 = vmatprep.subr.bf16.mxu0 %v10635_v3  ;;  %v13126_v61 = vpack.c.bf16 %v575_v59, %v574_v58  ;;  %v647_v58 = vld [vmem:[#allocation12 + $0x58] sm:$0xff] }
  0xa6   :  { %10665 = vmatprep.subr.bf16.mxu1 %v14891_v60  ;;  %7844 = vmatprep.mubr.f32.mxu0 %v13055_v8 }
  0xa7   :  { %7888 = vmatprep.mubr.f32.mxu1 %v13055_v8  ;;  %7845 = vmatmul.mubr.f32.gmra.mrb[4].mxu0 %v13058_v9  ;;  %15009 = vst [vmem:[#allocation27_spill] sm:$0xff] %v13126_v61 }
  0xa8   :  { %10638 = vmatpush3.bf16.msra.mxu0 %v10635_v3  ;;  %7889 = vmatmul.mubr.f32.gmra.mrb[4].mxu1 %v13058_v9  ;;  %v13131_v3 = vpack.c.bf16 %v560_v63, %v559_v62  ;;  %v648_v62 = vld [vmem:[#allocation12 + $0x60] sm:$0xff]  ;;  %v649_v63 = vld [vmem:[#allocation12 + $0x68] sm:$0xff] }
  0xa9   :  { %10667 = vmatpush3.bf16.msra.mxu1 %v13061_v10  ;;  %10640 = vmatprep.subr.bf16.mxu0 %v10639_v11 }
  0xaa   :  { %10668 = vmatprep.subr.bf16.mxu1 %v14891_v60  ;;  %7847 = vmatprep.mubr.f32.mxu0 %v13067_v16  ;;  %15010 = vst [vmem:[#allocation28_spill] sm:$0xff] %v13131_v3 }
  0xab   :  { %7891 = vmatprep.mubr.f32.mxu1 %v13067_v16  ;;  %7848 = vmatmul.mubr.f32.gmra.mrb[6].mxu0 %v13070_v17 }
  0xac   :  { %10642 = vmatpush3.bf16.msra.mxu0 %v10639_v11  ;;  %7892 = vmatmul.mubr.f32.gmra.mrb[6].mxu1 %v13070_v17 }
  0xad   :  { %10670 = vmatpush3.bf16.msra.mxu1 %v13073_v18  ;;  %10644 = vmatprep.subr.bf16.mxu0 %v10643_v19 }
  0xae   :  { %10671 = vmatprep.subr.bf16.mxu1 %v14891_v60  ;;  %7926 = vmatprep.mubr.f32.mxu0 %v13033_v26  ;;  %v13092_v26 = vpack.c.bf16 %v549_v35, %v548_v34  ;;  %v13171_v34 = vpack.c.bf16 %v585_v30, %v584_v29  ;;  %v636_v35 = vld [vmem:[#allocation12] sm:$0xff]  ;;  %v662_v30 = vld [vmem:[#allocation12 + $0xc8] sm:$0xff] }
  0xaf   :  { %7970 = vmatprep.mubr.msk.f32.mxu1 %vm12844_vm0, %v14883_v31  ;;  %v13184_v37 = vpack.c.bf16 %v637_v36, %v636_v35  ;;  %v661_v29 = vld [vmem:[#allocation12 + $0xc0] sm:$0xff]  ;;  %v663_v36 = vld [vmem:[#allocation12 + $0xd0] sm:$0xff] }
  0xb0   :  { %10646 = vmatpush3.bf16.msra.mxu0 %v10643_v19  ;;  %v565_v19 = vld [vmem:[#allocation9 + $0xe0] sm:$0xff]  ;;  %15019 = vst [vmem:[#allocation37_spill] sm:$0xff] %v13171_v34  ;;  %v13235_v35 = vpack.c.bf16 %v662_v30, %v661_v29 }
  0xb1   :  { %10673 = vmatpush3.bf16.msra.mxu1 %v13081_v24  ;;  %10648 = vmatprep.subr.bf16.mxu0 %v10647_v25  ;;  %v13159_v23 = vpack.c.bf16 %v566_v20, %v565_v19  ;;  %15020 = vst [vmem:[#allocation38_spill] sm:$0xff] %v13184_v37  ;;  %v657_v19 = vld [vmem:[#allocation12 + $0xa0] sm:$0xff]  ;;  %v658_v20 = vld [vmem:[#allocation12 + $0xa8] sm:$0xff] }
  0xb2   :  { %10674 = vmatprep.subr.bf16.mxu1 %v14891_v60  ;;  %15032 = vst [vmem:[#allocation50_spill] sm:$0xff] %v13235_v35  ;;  %v624_v29 = vld [vmem:[#allocation10 + $0x120] sm:$0xff] }
  0xb3   :  { %15016 = vst [vmem:[#allocation34_spill] sm:$0xff] %v13159_v23 }
  0xb4   :  { %10650 = vmatpush3.bf16.msra.mxu0 %v10647_v25  ;;  %v13163_v25 = vpack.c.bf16 %v583_v22, %v582_v21  ;;  %v13227_v21 = vpack.c.bf16 %v658_v20, %v657_v19  ;;  %v659_v22 = vld [vmem:[#allocation12 + $0xb0] sm:$0xff]  ;;  %v623_v19 = vld [vmem:[#allocation10 + $0x118] sm:$0xff] }
  0xb5   :  { %10676 = vmatpush3.bf16.msra.mxu1 %v13088_v32  ;;  %10652 = vmatprep.subr.bf16.mxu0 %v10651_v33 }
  0xb6   :  { %10677 = vmatprep.subr.bf16.mxu1 %v14891_v60  ;;  %15017 = vst [vmem:[#allocation35_spill] sm:$0xff] %v13163_v25  ;;  %15030 = vst [vmem:[#allocation48_spill] sm:$0xff] %v13227_v21 }
  0xb8   :  { %10654 = vmatpush3.bf16.msra.mxu0 %v10651_v33  ;;  %v13167_v33 = vpack.c.bf16 %v568_v28, %v567_v27  ;;  %v660_v27 = vld [vmem:[#allocation12 + $0xb8] sm:$0xff] }
  0xb9   :  { %10679 = vmatpush3.bf16.msra.mxu1 %v13092_v26  ;;  %10656 = vmatprep.subr.bf16.mxu0 %v10655_v38  ;;  %v13231_v28 = vpack.c.bf16 %v660_v27, %v659_v22  ;;  %v590_v22 = vld [vmem:[#allocation10 + $0x20] sm:$0xff]  ;;  %v591_v27 = vld [vmem:[#allocation10 + $0x28] sm:$0xff] }
  0xba   :  { %10680 = vmatprep.subr.bf16.mxu1 %v14891_v60  ;;  %15018 = vst [vmem:[#allocation36_spill] sm:$0xff] %v13167_v33  ;;  %v13270_v30 = vpack.c.bf16 %v591_v27, %v590_v22  ;;  %v596_v22 = vld [vmem:[#allocation10 + $0x50] sm:$0xff]  ;;  %v597_v27 = vld [vmem:[#allocation10 + $0x58] sm:$0xff] }
  0xbb   :  { %15031 = vst [vmem:[#allocation49_spill] sm:$0xff] %v13231_v28 }
  0xbc   :  { %10658 = vmatpush3.bf16.msra.mxu0 %v10655_v38  ;;  %v638_v38 = vld [vmem:[#allocation12 + $0x10] sm:$0xff]  ;;  %15040 = vst [vmem:[#allocation58_spill] sm:$0xff] %v13270_v30 }
  0xbd   :  { %10682 = vmatpush3.bf16.msra.mxu1 %v13096_v41  ;;  %10683 = vmatprep.subr.bf16.mxu0 %v14891_v60  ;;  %v13187_v40 = vpack.c.bf16 %v639_v39, %v638_v38  ;;  %v664_v38 = vld [vmem:[#allocation12 + $0xd8] sm:$0xff] }
  0xbe   :  { %10707 = vmatprep.subr.bf16.mxu1 %v14891_v60  ;;  %v13238_v39 = vpack.c.bf16 %v664_v38, %v663_v36  ;;  %v625_v36 = vld [vmem:[#allocation10 + $0x128] sm:$0xff] }
  0xbf   :  { %7927 = vmatmul.mubr.f32.vlgmr.msra.gmra.mrb[8].mxu0 %v13037_v56  ;;  %v13121_v56 = vpack.c.bf16 %v558_v55, %v557_v54  ;;  %15021 = vst [vmem:[#allocation39_spill] sm:$0xff] %v13187_v40  ;;  %v13199_v54 = vpack.c.bf16 %v645_v51, %v644_v50  ;;  %v646_v55 = vld [vmem:[#allocation12 + $0x50] sm:$0xff]  ;;  %v668_v50 = vld [vmem:[#allocation12 + $0xf8] sm:$0xff]  ;;  %v13272_v38 = vpack.c.bf16 %v625_v36, %v624_v29 }
  0xc0   :  { %7971 = vmatmul.mubr.f32.vlgmr.msra.gmra.mrb[8].mxu1 %v14883_v31  ;;  %10685 = vmatpush3.bf16.msra.mxu0 %v13099_v46  ;;  %v13203_v59 = vpack.c.bf16 %v647_v58, %v646_v55  ;;  %15033 = vst [vmem:[#allocation51_spill] sm:$0xff] %v13238_v39  ;;  %v13246_v51 = vpack.c.bf16 %v668_v50, %v667_v48  ;;  %v586_v55 = vld [vmem:[#allocation10] sm:$0xff]  ;;  %v587_v58 = vld [vmem:[#allocation10 + $0x8] sm:$0xff]  ;;  %v626_v48 = vld [vmem:[#allocation10 + $0x130] sm:$0xff] }
  0xc1   :  { %10709 = vmatpush3.bf16.msra.mxu1 %v13103_v47  ;;  %10686 = vmatprep.subr.bf16.mxu0 %v14891_v60  ;;  %15008 = vst [vmem:[#allocation26_spill] sm:$0xff] %v13121_v56  ;;  %15024 = vst [vmem:[#allocation42_spill] sm:$0xff] %v13199_v54  ;;  %v13278_v50 = vpack.c.bf16 %v593_v43, %v592_v42  ;;  %v630_v29 = vld [vmem:[#allocation10 + $0x150] sm:$0xff]  ;;  %v13294_v36 = vpack.c.bf16 %v597_v27, %v596_v22  ;;  %v631_v42 = vld [vmem:[#allocation10 + $0x158] sm:$0xff] }
  0xc2   :  { %10710 = vmatprep.subr.bf16.mxu1 %v14891_v60  ;;  %7929 = vmatprep.mubr.f32.mxu0 %v13043_v0  ;;  %v576_v0 = vld [vmem:[#allocation9 + $0x130] sm:$0xff]  ;;  %15025 = vst [vmem:[#allocation43_spill] sm:$0xff] %v13203_v59  ;;  %15035 = vst [vmem:[#allocation53_spill] sm:$0xff] %v13246_v51  ;;  %v13296_v43 = vpack.c.bf16 %v631_v42, %v630_v29  ;;  %v601_v27 = vld [vmem:[#allocation10 + $0x78] sm:$0xff] }
  0xc3   :  { %7930 = vmatmul.mubr.f32.gmra.mrb[10].mxu0 %v13046_v1  ;;  %8040 = vmatprep.mubr.msk.f32.mxu1 %vm12844_vm0, %v14883_v31  ;;  %v577_v1 = vld [vmem:[#allocation9 + $0x138] sm:$0xff]  ;;  %15041 = vst [vmem:[#allocation59_spill] sm:$0xff] %v13272_v38  ;;  %15042 = vst [vmem:[#allocation60_spill] sm:$0xff] %v13278_v50  ;;  %v600_v22 = vld [vmem:[#allocation10 + $0x70] sm:$0xff] }
  0xc4   :  { %10688 = vmatpush3.bf16.msra.mxu0 %v13109_v52  ;;  %7932 = vmatprep.mubr.f32.mxu0 %v13055_v8  ;;  %v13136_v4 = vpack.c.bf16 %v577_v1, %v576_v0  ;;  %v579_v8 = vld [vmem:[#allocation9 + $0x148] sm:$0xff]  ;;  %v13207_v0 = vpack.c.bf16 %v649_v63, %v648_v62  ;;  %v650_v1 = vld [vmem:[#allocation12 + $0x70] sm:$0xff]  ;;  %v13251_v62 = vpack.c.bf16 %v587_v58, %v586_v55  ;;  %v620_v63 = vld [vmem:[#allocation10 + $0x100] sm:$0xff] }
  0xc5   :  { %10712 = vmatpush3.bf16.msra.mxu1 %v13113_v53  ;;  %10689 = vmatprep.subr.bf16.mxu0 %v14891_v60  ;;  %v13147_v11 = vpack.c.bf16 %v579_v8, %v578_v7  ;;  %v653_v7 = vld [vmem:[#allocation12 + $0x80] sm:$0xff]  ;;  %v654_v8 = vld [vmem:[#allocation12 + $0x88] sm:$0xff]  ;;  %v627_v55 = vld [vmem:[#allocation10 + $0x138] sm:$0xff]  ;;  %15046 = vst [vmem:[#allocation64_spill] sm:$0xff] %v13294_v36  ;;  %v13310_v42 = vpack.c.bf16 %v601_v27, %v600_v22 }
  0xc6   :  { %10713 = vmatprep.subr.bf16.mxu1 %v14891_v60  ;;  %15011 = vst [vmem:[#allocation29_spill] sm:$0xff] %v13136_v4  ;;  %15026 = vst [vmem:[#allocation44_spill] sm:$0xff] %v13207_v0  ;;  %v13280_v58 = vpack.c.bf16 %v627_v55, %v626_v48  ;;  %v598_v48 = vld [vmem:[#allocation10 + $0x60] sm:$0xff]  ;;  %v599_v55 = vld [vmem:[#allocation10 + $0x68] sm:$0xff] }
  0xc7   :  { %7933 = vmatmul.mubr.f32.gmra.mrb[12].mxu0 %v13058_v9  ;;  %v13141_v9 = vpack.c.bf16 %v562_v6, %v561_v5  ;;  %15013 = vst [vmem:[#allocation31_spill] sm:$0xff] %v13147_v11  ;;  %v651_v5 = vld [vmem:[#allocation12 + $0x78] sm:$0xff]  ;;  %15036 = vst [vmem:[#allocation54_spill] sm:$0xff] %v13251_v62  ;;  %v634_v29 = vld [vmem:[#allocation10 + $0x170] sm:$0xff] }
  0xc8   :  { %10691 = vmatpush3.bf16.msra.mxu0 %v13121_v56  ;;  %7935 = vmatprep.mubr.f32.mxu0 %v13067_v16  ;;  %v13151_v16 = vpack.c.bf16 %v564_v13, %v563_v12  ;;  %v13211_v6 = vpack.c.bf16 %v651_v5, %v650_v1  ;;  %v13216_v12 = vpack.c.bf16 %v654_v8, %v653_v7  ;;  %v655_v13 = vld [vmem:[#allocation12 + $0x90] sm:$0xff]  ;;  %v621_v1 = vld [vmem:[#allocation10 + $0x108] sm:$0xff]  ;;  %v589_v8 = vld [vmem:[#allocation10 + $0x18] sm:$0xff] }
  0xc9   :  { %10715 = vmatpush3.bf16.msra.mxu1 %v13126_v61  ;;  %10692 = vmatprep.subr.bf16.mxu0 %v14891_v60  ;;  %15012 = vst [vmem:[#allocation30_spill] sm:$0xff] %v13141_v9  ;;  %v13254_v5 = vpack.c.bf16 %v621_v1, %v620_v63  ;;  %v588_v7 = vld [vmem:[#allocation10 + $0x10] sm:$0xff]  ;;  %15043 = vst [vmem:[#allocation61_spill] sm:$0xff] %v13280_v58  ;;  %v594_v63 = vld [vmem:[#allocation10 + $0x40] sm:$0xff] }
  0xca   :  { %10716 = vmatprep.subr.bf16.mxu1 %v14891_v60  ;;  %15014 = vst [vmem:[#allocation32_spill] sm:$0xff] %v13151_v16  ;;  %15027 = vst [vmem:[#allocation45_spill] sm:$0xff] %v13211_v6  ;;  %v595_v1 = vld [vmem:[#allocation10 + $0x48] sm:$0xff] }
  0xcb   :  { %7936 = vmatmul.mubr.f32.gmra.mrb[14].mxu0 %v13070_v17  ;;  %v13155_v17 = vpack.c.bf16 %v581_v15, %v580_v14  ;;  %15028 = vst [vmem:[#allocation46_spill] sm:$0xff] %v13216_v12  ;;  %v656_v14 = vld [vmem:[#allocation12 + $0x98] sm:$0xff]  ;;  %15037 = vst [vmem:[#allocation55_spill] sm:$0xff] %v13254_v5 }
  0xcc   :  { %10694 = vmatpush3.bf16.msra.mxu0 %v13131_v3  ;;  %8005 = vmatprep.mubr.msk.f32.mxu0 %vm12844_vm0, %v14883_v31  ;;  %v13223_v15 = vpack.c.bf16 %v656_v14, %v655_v13  ;;  %v622_v13 = vld [vmem:[#allocation10 + $0x110] sm:$0xff]  ;;  %v13262_v14 = vpack.c.bf16 %v589_v8, %v588_v7  ;;  %v628_v7 = vld [vmem:[#allocation10 + $0x140] sm:$0xff]  ;;  %v13286_v8 = vpack.c.bf16 %v595_v1, %v594_v63 }
  0xcd   :  { %10718 = vmatpush3.bf16.msra.mxu1 %v13136_v4  ;;  %10695 = vmatprep.subr.bf16.mxu0 %v14891_v60  ;;  %15015 = vst [vmem:[#allocation33_spill] sm:$0xff] %v13155_v17  ;;  %v13264_v20 = vpack.c.bf16 %v623_v19, %v622_v13  ;;  %v629_v13 = vld [vmem:[#allocation10 + $0x148] sm:$0xff]  ;;  %15047 = vst [vmem:[#allocation65_spill] sm:$0xff] %v13296_v43  ;;  %v632_v63 = vld [vmem:[#allocation10 + $0x160] sm:$0xff]  ;;  %v13302_v1 = vpack.c.bf16 %v599_v55, %v598_v48 }
  0xce   :  { %10719 = vmatprep.subr.bf16.mxu1 %v14891_v60  ;;  %15029 = vst [vmem:[#allocation47_spill] sm:$0xff] %v13223_v15  ;;  %15038 = vst [vmem:[#allocation56_spill] sm:$0xff] %v13262_v14  ;;  %v13288_v19 = vpack.c.bf16 %v629_v13, %v628_v7  ;;  %v633_v7 = vld [vmem:[#allocation10 + $0x168] sm:$0xff]  ;;  %v6411_v48 = vld [vmem:[%s14874_s3] ss:$0 sm:$0xff] }
  0xcf   :  { %15039 = vst [vmem:[#allocation57_spill] sm:$0xff] %v13264_v20  ;;  %15044 = vst [vmem:[#allocation62_spill] sm:$0xff] %v13286_v8  ;;  %v13304_v13 = vpack.c.bf16 %v633_v7, %v632_v63  ;;  %v6413_v55 = vld [vmem:[%s14874_s3 + $0x1] ss:$0 sm:$0xff] }
  0xd0   :  { %10697 = vmatpush3.bf16.msra.mxu0 %v13141_v9  ;;  %15045 = vst [vmem:[#allocation63_spill] sm:$0xff] %v13288_v19  ;;  %15048 = vst [vmem:[#allocation66_spill] sm:$0xff] %v13302_v1 }
  0xd1   :  { %10721 = vmatpush3.bf16.msra.mxu1 %v13147_v11  ;;  %10698 = vmatprep.subr.bf16.mxu0 %v14891_v60  ;;  %15049 = vst [vmem:[#allocation67_spill] sm:$0xff] %v13304_v13  ;;  %15050 = vst [vmem:[#allocation68_spill] sm:$0xff] %v13310_v42 }
  0xd2   :  { %10722 = vmatprep.subr.bf16.mxu1 %v14891_v60 }
  0xd4   :  { %10700 = vmatpush3.bf16.msra.mxu0 %v13151_v16 }
  0xd5   :  { %10724 = vmatpush3.bf16.msra.mxu1 %v13155_v17  ;;  %10701 = vmatprep.subr.bf16.mxu0 %v14891_v60 }
  0xd6   :  { %10725 = vmatprep.subr.bf16.mxu1 %v14891_v60 }
  0xd8   :  { %10703 = vmatpush3.bf16.msra.mxu0 %v13159_v23 }
  0xd9   :  { %10727 = vmatpush3.bf16.msra.mxu1 %v13163_v25  ;;  %10704 = vmatprep.subr.bf16.mxu0 %v14891_v60 }
  0xda   :  { %10728 = vmatprep.subr.bf16.mxu1 %v14891_v60 }
  0xdc   :  { %10706 = vmatpush3.bf16.msra.mxu0 %v13167_v33 }
  0xdd   :  { %10730 = vmatpush3.bf16.msra.mxu1 %v13171_v34  ;;  %10731 = vmatprep.subr.bf16.mxu0 %v14891_v60 }
  0xde   :  { %10755 = vmatprep.subr.bf16.mxu1 %v14891_v60 }
  0xdf   :  { %8006 = vmatmul.mubr.f32.vlgmr.msra.gmra.mrb[16].mxu0 %v14883_v31 }
  0xe0   :  { %8041 = vmatmul.mubr.f32.vlgmr.msra.gmra.mrb[10].mxu1 %v14883_v31  ;;  %8075 = vmatprep.mubr.msk.f32.mxu0 %vm12844_vm0, %v14883_v31 }
  0xe1   :  { %8110 = vmatprep.mubr.msk.f32.mxu1 %vm12844_vm0, %v14883_v31  ;;  %10733 = vmatpush3.bf16.msra.mxu0 %v13184_v37 }
  0xe2   :  { %10734 = vmatprep.subr.bf16.mxu0 %v14891_v60  ;;  %10757 = vmatpush3.bf16.msra.mxu1 %v13251_v62 }
  0xe3   :  { %10758 = vmatprep.subr.bf16.mxu1 %v14891_v60 }
  0xe5   :  { %10736 = vmatpush3.bf16.msra.mxu0 %v13187_v40 }
  0xe6   :  { %10737 = vmatprep.subr.bf16.mxu0 %v14891_v60  ;;  %10760 = vmatpush3.bf16.msra.mxu1 %v13262_v14 }
  0xe7   :  { %10761 = vmatprep.subr.bf16.mxu1 %v14891_v60 }
  0xe9   :  { %10739 = vmatpush3.bf16.msra.mxu0 %v13191_v44 }
  0xea   :  { %10740 = vmatprep.subr.bf16.mxu0 %v14891_v60  ;;  %10763 = vmatpush3.bf16.msra.mxu1 %v13270_v30 }
  0xeb   :  { %10764 = vmatprep.subr.bf16.mxu1 %v14891_v60 }
  0xed   :  { %10742 = vmatpush3.bf16.msra.mxu0 %v13195_v49 }
  0xee   :  { %10743 = vmatprep.subr.bf16.mxu0 %v14891_v60  ;;  %10766 = vmatpush3.bf16.msra.mxu1 %v13278_v50 }
  0xef   :  { %10767 = vmatprep.subr.bf16.mxu1 %v14891_v60 }
  0xf1   :  { %10745 = vmatpush3.bf16.msra.mxu0 %v13199_v54 }
  0xf2   :  { %10746 = vmatprep.subr.bf16.mxu0 %v14891_v60  ;;  %10769 = vmatpush3.bf16.msra.mxu1 %v13286_v8 }
  0xf3   :  { %10770 = vmatprep.subr.bf16.mxu1 %v14891_v60 }
  0xf5   :  { %10748 = vmatpush3.bf16.msra.mxu0 %v13203_v59 }
  0xf6   :  { %10749 = vmatprep.subr.bf16.mxu0 %v14891_v60  ;;  %10772 = vmatpush3.bf16.msra.mxu1 %v13294_v36 }
  0xf7   :  { %10773 = vmatprep.subr.bf16.mxu1 %v14891_v60 }
  0xf9   :  { %10751 = vmatpush3.bf16.msra.mxu0 %v13207_v0 }
  0xfa   :  { %10752 = vmatprep.subr.bf16.mxu0 %v14891_v60  ;;  %10775 = vmatpush3.bf16.msra.mxu1 %v13302_v1 }
  0xfb   :  { %10776 = vmatprep.subr.bf16.mxu1 %v14891_v60 }
  0xfd   :  { %10754 = vmatpush3.bf16.msra.mxu0 %v13211_v6 }
  0xfe   :  { %10779 = vmatprep.subr.bf16.mxu0 %v14891_v60  ;;  %10778 = vmatpush3.bf16.msra.mxu1 %v13310_v42 }
  0xff   :  { %10803 = vmatprep.subr.bf16.mxu1 %v14891_v60 }
 0x100   :  { %8076 = vmatmul.mubr.f32.vlgmr.msra.gmra.mrb[18].mxu0 %v14883_v31 }
 0x101   :  { %10781 = vmatpush3.bf16.msra.mxu0 %v13216_v12  ;;  %8145 = vmatprep.mubr.msk.f32.mxu0 %vm12844_vm0, %v14883_v31 }
 0x102   :  { %10782 = vmatprep.subr.bf16.mxu0 %v14891_v60 }
 0x105   :  { %10784 = vmatpush3.bf16.msra.mxu0 %v13223_v15  ;;  %v604_v15 = vld [vmem:[#allocation10 + $0x88] sm:$0xff] }
 0x106   :  { %10785 = vmatprep.subr.bf16.mxu0 %v14891_v60 }
 0x109   :  { %10787 = vmatpush3.bf16.msra.mxu0 %v13227_v21 }
 0x10a   :  { %10788 = vmatprep.subr.bf16.mxu0 %v14891_v60 }
 0x10d   :  { %10790 = vmatpush3.bf16.msra.mxu0 %v13231_v28 }
 0x10e   :  { %10791 = vmatprep.subr.bf16.mxu0 %v14891_v60 }
 0x111   :  { %10793 = vmatpush3.bf16.msra.mxu0 %v13235_v35 }
 0x112   :  { %10794 = vmatprep.subr.bf16.mxu0 %v14891_v60 }
 0x115   :  { %10796 = vmatpush3.bf16.msra.mxu0 %v13238_v39 }
 0x116   :  { %10797 = vmatprep.subr.bf16.mxu0 %v14891_v60 }
 0x119   :  { %10799 = vmatpush3.bf16.msra.mxu0 %v13242_v45 }
 0x11a   :  { %10800 = vmatprep.subr.bf16.mxu0 %v14891_v60 }
 0x11d   :  { %10802 = vmatpush3.bf16.msra.mxu0 %v13246_v51 }
 0x11e   :  { %10827 = vmatprep.subr.bf16.mxu0 %v14891_v60 }
 0x120   :  { %8146 = vmatmul.mubr.f32.vlgmr.msra.gmra.mrb[20].mxu0 %v14883_v31 }
 0x121   :  { %8215 = vmatprep.mubr.msk.f32.mxu0 %vm12844_vm0, %v14883_v31  ;;  %10829 = vmatpush3.bf16.msra.mxu0 %v13254_v5  ;;  %v635_v31 = vld [vmem:[#allocation10 + $0x178] sm:$0xff] }
 0x122   :  { %10830 = vmatprep.subr.bf16.mxu0 %v14891_v60 }
 0x125   :  { %10832 = vmatpush3.bf16.msra.mxu0 %v13264_v20 }
 0x126   :  { %10833 = vmatprep.subr.bf16.mxu0 %v14891_v60 }
 0x129   :  { %10835 = vmatpush3.bf16.msra.mxu0 %v13272_v38 }
 0x12a   :  { %10836 = vmatprep.subr.bf16.mxu0 %v14891_v60 }
 0x12d   :  { %10838 = vmatpush3.bf16.msra.mxu0 %v13280_v58 }
 0x12e   :  { %10839 = vmatprep.subr.bf16.mxu0 %v14891_v60 }
 0x131   :  { %10841 = vmatpush3.bf16.msra.mxu0 %v13288_v19 }
 0x132   :  { %10842 = vmatprep.subr.bf16.mxu0 %v14891_v60 }
 0x135   :  { %10844 = vmatpush3.bf16.msra.mxu0 %v13296_v43  ;;  %v13312_v43 = vpack.c.bf16 %v635_v31, %v634_v29 }
 0x136   :  { %10845 = vmatprep.subr.bf16.mxu0 %v14891_v60 }
 0x137   :  { %15051 = vst [vmem:[#allocation69_spill] sm:$0xff] %v13312_v43 }
 0x139   :  { %10847 = vmatpush3.bf16.msra.mxu0 %v13304_v13 }
 0x13a   :  { %10848 = vmatprep.subr.bf16.mxu0 %v14891_v60 }
 0x13d   :  { %10850 = vmatpush3.bf16.msra.mxu0 %v13312_v43 }
 0x13e   :  { %10875 = vmatprep.subr.bf16.mxu0 %v14891_v60 }
 0x172   :  { %v7840_v63 = vpop.f32.mrb[0].mxu0 }
 0x173   :  { %v13324_v7 = vadd.f32 %v7840_v63, %v6411_v48  ;;  %v237_v31 = vpop.f32.mrb[1].mxu0  ;;  %v7884_v22 = vpop.f32.mrb[0].mxu1 }
 0x174   :  { %v13326_v27 = vadd.f32 %v7884_v22, %v6413_v55  ;;  %v367_v29 = vpop.f32.mrb[1].mxu1 }
 0x176   :  { %15052 = vst [vmem:[#allocation70_spill] sm:$0xff] %v13326_v27  ;;  %v7843_v43 = vpop.f32.mrb[2].mxu0 }
 0x177   :  { %v13328_v13 = vadd.f32 %v7843_v43, %v6411_v48  ;;  %v247_v60 = vpop.f32.mrb[3].mxu0  ;;  %v7887_v19 = vpop.f32.mrb[2].mxu1 }
 0x178   :  { %v13330_v58 = vadd.f32 %v6411_v48, %v247_v60  ;;  %v13332_v38 = vadd.f32 %v7887_v19, %v6413_v55  ;;  %v377_v20 = vpop.f32.mrb[3].mxu1 }
 0x179   :  { %15053 = vst [vmem:[#allocation71_spill] sm:$0xff] %v13328_v13  ;;  %v13334_v5 = vadd.f32 %v6413_v55, %v377_v20 }
 0x17a   :  { %15054 = vst [vmem:[#allocation72_spill] sm:$0xff] %v13330_v58  ;;  %15055 = vst [vmem:[#allocation73_spill] sm:$0xff] %v13332_v38  ;;  %v7846_v51 = vpop.f32.mrb[4].mxu0 }
 0x17b   :  { %15056 = vst [vmem:[#allocation74_spill] sm:$0xff] %v13334_v5  ;;  %v13336_v63 = vadd.f32 %v7846_v51, %v6411_v48  ;;  %v257_v45 = vpop.f32.mrb[5].mxu0  ;;  %v7890_v39 = vpop.f32.mrb[4].mxu1 }
 0x17c   :  { %v13338_v22 = vadd.f32 %v6411_v48, %v257_v45  ;;  %v13340_v35 = vadd.f32 %v7890_v39, %v6413_v55  ;;  %v387_v43 = vpop.f32.mrb[5].mxu1  ;;  %v6415_v39 = vld [vmem:[%s14874_s3 + $0x2] ss:$0 sm:$0xff]  ;;  %v238_v45 = vadd.f32 %v6411_v48, %v237_v31 }
 0x17d   :  { %15057 = vst [vmem:[#allocation75_spill] sm:$0xff] %v13336_v63  ;;  %v13342_v13 = vadd.f32 %v6413_v55, %v387_v43 }
 0x17e   :  { %15058 = vst [vmem:[#allocation76_spill] sm:$0xff] %v13338_v22  ;;  %15059 = vst [vmem:[#allocation77_spill] sm:$0xff] %v13340_v35  ;;  %v7849_v28 = vpop.f32.mrb[6].mxu0 }
 0x17f   :  { %15060 = vst [vmem:[#allocation78_spill] sm:$0xff] %v13342_v13  ;;  %v13344_v60 = vadd.f32 %v7849_v28, %v6411_v48  ;;  %v267_v19 = vpop.f32.mrb[7].mxu0  ;;  %v7893_v38 = vpop.f32.mrb[6].mxu1 }
 0x180   :  { %v13346_v58 = vadd.f32 %v6411_v48, %v267_v19  ;;  %v13348_v20 = vadd.f32 %v7893_v38, %v6413_v55  ;;  %v397_v51 = vpop.f32.mrb[7].mxu1 }
 0x181   :  { %15061 = vst [vmem:[#allocation79_spill] sm:$0xff] %v13344_v60  ;;  %v13350_v63 = vadd.f32 %v6413_v55, %v397_v51 }
 0x182   :  { %15062 = vst [vmem:[#allocation80_spill] sm:$0xff] %v13346_v58  ;;  %15063 = vst [vmem:[#allocation81_spill] sm:$0xff] %v13348_v20 }
 0x183   :  { %15064 = vst [vmem:[#allocation82_spill] sm:$0xff] %v13350_v63 }
 0x192   :  { %v7928_v35 = vpop.f32.mrb[8].mxu0 }
 0x193   :  { %v13355_v43 = vadd.f32 %v7928_v35, %v6415_v39  ;;  %v793_v13 = vpop.f32.mrb[8].mxu1  ;;  %v497_v28 = vpop.f32.mrb[9].mxu0 }
 0x194   :  { %v797_v60 = vadd.f32 %v793_v13, %v238_v45  ;;  %v7972_v22 = vpop.f32.mrb[9].mxu1  ;;  %v368_v45 = vadd.f32 %v6413_v55, %v367_v29 }
 0x196   :  { %v6425_v5 = vmul.f32 -1.442695, %v797_v60  ;;  %v7931_v19 = vpop.f32.mrb[10].mxu0 }
 0x197   :  { %v13357_v58 = vadd.f32 %v7931_v19, %v6415_v39  ;;  %v507_v38 = vpop.f32.mrb[11].mxu0 }
 0x198   :  { %v13359_v20 = vadd.f32 %v6415_v39, %v507_v38  ;;  %12472 = vpow2.f32 %v6425_v5  ;;  %v13372_v5 = vld [vmem:[%s14874_s3 + $0x3] ss:$0 sm:$0xff] }
 0x199   :  { %15065 = vst [vmem:[#allocation83_spill] sm:$0xff] %v13357_v58 }
 0x19a   :  { %15066 = vst [vmem:[#allocation84_spill] sm:$0xff] %v13359_v20  ;;  %v7934_v51 = vpop.f32.mrb[12].mxu0  ;;  %v603_v20 = vld [vmem:[#allocation10 + $0x80] sm:$0xff] }
 0x19b   :  { %v13361_v63 = vadd.f32 %v7934_v51, %v6415_v39  ;;  %v517_v27 = vpop.f32.mrb[13].mxu0  ;;  %v13375_v12 = vpack.c.bf16 %v604_v15, %v603_v20  ;;  %v607_v15 = vld [vmem:[#allocation10 + $0xa0] sm:$0xff]  ;;  %v15072_v20 = vmov 0.0  }
 0x19c   :  { %v13363_v48 = vadd.f32 %v6415_v39, %v517_v27 }
 0x19d   :  { %15067 = vst [vmem:[#allocation85_spill] sm:$0xff] %v13361_v63 }
 0x19e   :  { %15068 = vst [vmem:[#allocation86_spill] sm:$0xff] %v13363_v48  ;;  %v7937_v35 = vpop.f32.mrb[14].mxu0 }
 0x19f   :  { %v13365_v31 = vadd.f32 %v7937_v35, %v6415_v39  ;;  %v527_v21 = vpop.f32.mrb[15].mxu0 }
 0x1a0   :  { %v13367_v13 = vadd.f32 %v6415_v39, %v527_v21  ;;  %v498_v21 = vadd.f32 %v6415_v39, %v497_v28  ;;  %v606_v39 = vld [vmem:[#allocation10 + $0x98] sm:$0xff]  ;;  %v15071_v28 = vmov 0.0|0.0  }
 0x1a1   :  { %15069 = vst [vmem:[#allocation87_spill] sm:$0xff] %v13365_v31 }
 0x1a2   :  { %15070 = vst [vmem:[#allocation88_spill] sm:$0xff] %v13367_v13  ;;  %v12473_v22 = vpop.eup %12472 }
 0x1a3   :  { %v801_v60 = vadd.f32 1.0, %v12473_v22 }
 0x1a5   :  { %12474 = vrcp.f32 %v801_v60 }
 0x1af   :  { %v12475_v31 = vpop.eup %12474 }
 0x1b2   :  { %v870_v19 = vpop.f32.mrb[16].mxu0 }
 0x1b3   :  { %v874_v38 = vadd.f32 %v870_v19, %v368_v45  ;;  %v947_v51 = vpop.f32.mrb[10].mxu1  ;;  %v8007_v27 = vpop.f32.mrb[17].mxu0 }
 0x1b4   :  { %v948_v63 = vadd.f32 %v13372_v5, %v947_v51  ;;  %v8042_v35 = vpop.f32.mrb[11].mxu1 }
 0x1b5   :  { %v6426_v48 = vmul.f32 -1.442695, %v874_v38  ;;  %v605_v38 = vld [vmem:[#allocation10 + $0x90] sm:$0xff] }
 0x1b6   :  { %v951_v13 = vmul.f32 %v12475_v31, %v948_v63  ;;  %v13383_v63 = vpack.c.bf16 %v606_v39, %v605_v38  ;;  %v609_v31 = vld [vmem:[#allocation10 + $0xb0] sm:$0xff] }
 0x1b7   :  { %12476 = vpow2.f32 %v6426_v48 }
 0x1b8   :  { %v952_v22 = vadd.f32 %v951_v13, %v498_v21  ;;  %v610_v13 = vld [vmem:[#allocation10 + $0xb8] sm:$0xff]  ;;  %v611_v21 = vld [vmem:[#allocation10 + $0xc0] sm:$0xff] }
 0x1b9   :  { %v13399_v35 = vpack.c.bf16 %v610_v13, %v609_v31  ;;  %v618_v31 = vld [vmem:[#allocation10 + $0xf8] sm:$0xff] }
 0x1c1   :  { %v12477_v60 = vpop.eup %12476 }
 0x1c2   :  { %v878_v55 = vadd.f32 1.0, %v12477_v60 }
 0x1c4   :  { %12478 = vrcp.f32 %v878_v55  ;;  %v613_v55 = vld [vmem:[#allocation10 + $0xd0] sm:$0xff] }
 0x1c5   :  { %12480 = vtanh.f32 %v952_v22  ;;  %v612_v22 = vld [vmem:[#allocation10 + $0xc8] sm:$0xff] }
 0x1c6   :  { %v13405_v60 = vpack.c.bf16 %v612_v22, %v611_v21  ;;  %v670_v21 = vld [vmem:[#allocation12 + $0x100] sm:$0xff]  ;;  %v671_v22 = vld [vmem:[#allocation12 + $0x108] sm:$0xff] }
 0x1ce   :  { %v12479_v29 = vpop.eup %12478 }
 0x1cf   :  { %v954_v58 = vsub.f32 1.0, %v12479_v29  ;;  %v12481_v45 = vpop.eup %12480  ;;  %v956_v19 = vmul.f32 0.0, %v12479_v29  ;;  %v614_v29 = vld [vmem:[#allocation10 + $0xd8] sm:$0xff] }
 0x1d1   :  { %v955_v27 = vmul.f32 %v12481_v45, %v954_v58  ;;  %v608_v58 = vld [vmem:[#allocation10 + $0xa8] sm:$0xff]  ;;  %v13411_v45 = vpack.c.bf16 %v614_v29, %v613_v55  ;;  %v13431_v55 = vpack.c.bf16 %v671_v22, %v670_v21  ;;  %v672_v29 = vld [vmem:[#allocation12 + $0x110] sm:$0xff]  ;;  %v677_v22 = vld [vmem:[#allocation12 + $0x138] sm:$0xff] }
 0x1d2   :  { %v13393_v48 = vpack.c.bf16 %v608_v58, %v607_v15  ;;  %v617_v58 = vld [vmem:[#allocation10 + $0xf0] sm:$0xff] }
 0x1d3   :  { %v13377_v51 = vadd.f32 %v956_v19, %v955_v27  ;;  %v615_v19 = vld [vmem:[#allocation10 + $0xe0] sm:$0xff]  ;;  %v616_v27 = vld [vmem:[#allocation10 + $0xe8] sm:$0xff]  ;;  %v13415_v38 = vpop.f32.mrb[18].mxu0  ;;  %v13425_v13 = vpack.c.bf16 %v618_v31, %v617_v58  ;;  %v676_v21 = vld [vmem:[#allocation12 + $0x130] sm:$0xff] }
 0x1d4   :  { %v8077_v39 = vpop.f32.mrb[19].mxu0  ;;  %v13419_v15 = vpack.c.bf16 %v616_v27, %v615_v19  ;;  %v673_v19 = vld [vmem:[#allocation12 + $0x118] sm:$0xff]  ;;  %v675_v58 = vld [vmem:[#allocation12 + $0x128] sm:$0xff] }
 0x1d5   :  { %8111 = vmatmul.mubr.f32.vlgmr.msra.gmra.mrb[12].mxu1 %v13377_v51  ;;  %8216 = vmatmul.mubr.f32.vlgmr.msra.gmra.mrb[22].mxu0 %v13377_v51  ;;  %v13439_v27 = vpack.c.bf16 %v673_v19, %v672_v29  ;;  %v674_v39 = vld [vmem:[#allocation12 + $0x120] sm:$0xff]  ;;  %v13455_v29 = vpack.c.bf16 %v677_v22, %v676_v21 }
 0x1d6   :  { %10805 = vmatpush3.bf16.msra.mxu1 %v13375_v12  ;;  %10877 = vmatpush3.bf16.msra.mxu0 %v13039_v57  ;;  %v13449_v31 = vpack.c.bf16 %v675_v58, %v674_v39  ;;  %v678_v19 = vld [vmem:[#allocation12 + $0x140] sm:$0xff]  ;;  %v680_v58 = vld [vmem:[#allocation12 + $0x150] sm:$0xff] }
 0x1d7   :  { %10806 = vmatprep.subr.bf16.mxu1 %v15071_v28  ;;  %10878 = vmatprep.subr.bf16.mxu0 %v15071_v28  ;;  %v682_v22 = vld [vmem:[#allocation12 + $0x160] sm:$0xff] }
 0x1d8   :  { %8180 = vmatprep.mubr.msk.f32.mxu1 %vm12844_vm0, %v15072_v20  ;;  %8285 = vmatprep.mubr.msk.f32.mxu0 %vm12844_vm0, %v15072_v20 }
 0x1da   :  { %10808 = vmatpush3.bf16.msra.mxu1 %v13383_v63  ;;  %10880 = vmatpush3.bf16.msra.mxu0 %v13049_v2 }
 0x1db   :  { %10809 = vmatprep.subr.bf16.mxu1 %v15071_v28  ;;  %10881 = vmatprep.subr.bf16.mxu0 %v15071_v28 }
 0x1de   :  { %10811 = vmatpush3.bf16.msra.mxu1 %v13393_v48  ;;  %10883 = vmatpush3.bf16.msra.mxu0 %v13061_v10 }
 0x1df   :  { %10812 = vmatprep.subr.bf16.mxu1 %v15071_v28  ;;  %10884 = vmatprep.subr.bf16.mxu0 %v15071_v28 }
 0x1e2   :  { %10814 = vmatpush3.bf16.msra.mxu1 %v13399_v35  ;;  %10886 = vmatpush3.bf16.msra.mxu0 %v13073_v18 }
 0x1e3   :  { %10815 = vmatprep.subr.bf16.mxu1 %v15071_v28  ;;  %10887 = vmatprep.subr.bf16.mxu0 %v15071_v28 }
 0x1e6   :  { %10817 = vmatpush3.bf16.msra.mxu1 %v13405_v60  ;;  %10889 = vmatpush3.bf16.msra.mxu0 %v13081_v24 }
 0x1e7   :  { %10818 = vmatprep.subr.bf16.mxu1 %v15071_v28  ;;  %10890 = vmatprep.subr.bf16.mxu0 %v15071_v28 }
 0x1ea   :  { %10820 = vmatpush3.bf16.msra.mxu1 %v13411_v45  ;;  %10892 = vmatpush3.bf16.msra.mxu0 %v13088_v32 }
 0x1eb   :  { %10821 = vmatprep.subr.bf16.mxu1 %v15071_v28  ;;  %10893 = vmatprep.subr.bf16.mxu0 %v15071_v28 }
 0x1ee   :  { %10823 = vmatpush3.bf16.msra.mxu1 %v13419_v15  ;;  %10895 = vmatpush3.bf16.msra.mxu0 %v13092_v26 }
 0x1ef   :  { %10824 = vmatprep.subr.bf16.mxu1 %v15071_v28  ;;  %10896 = vmatprep.subr.bf16.mxu0 %v15071_v28 }
 0x1f2   :  { %10826 = vmatpush3.bf16.msra.mxu1 %v13425_v13  ;;  %10898 = vmatpush3.bf16.msra.mxu0 %v13096_v41 }
 0x1f3   :  { %10851 = vmatprep.subr.bf16.mxu1 %v15071_v28  ;;  %10923 = vmatprep.subr.bf16.mxu0 %v15071_v28 }
 0x1f5   :  { %8181 = vmatmul.mubr.f32.vlgmr.msra.gmra.mrb[14].mxu1 %v13377_v51  ;;  %8286 = vmatmul.mubr.f32.vlgmr.msra.gmra.mrb[24].mxu0 %v13377_v51 }
 0x1f6   :  { %10853 = vmatpush3.bf16.msra.mxu1 %v13431_v55  ;;  %10925 = vmatpush3.bf16.msra.mxu0 %v13103_v47 }
 0x1f7   :  { %10854 = vmatprep.subr.bf16.mxu1 %v15071_v28  ;;  %10926 = vmatprep.subr.bf16.mxu0 %v15071_v28 }
 0x1f8   :  { %8250 = vmatprep.mubr.msk.f32.mxu1 %vm12844_vm0, %v15072_v20  ;;  %8355 = vmatprep.mubr.msk.f32.mxu0 %vm12844_vm0, %v15072_v20 }
 0x1fa   :  { %10856 = vmatpush3.bf16.msra.mxu1 %v13439_v27  ;;  %10928 = vmatpush3.bf16.msra.mxu0 %v13113_v53  ;;  %v679_v53 = vld [vmem:[#allocation12 + $0x148] sm:$0xff] }
 0x1fb   :  { %10857 = vmatprep.subr.bf16.mxu1 %v15071_v28  ;;  %10929 = vmatprep.subr.bf16.mxu0 %v15071_v28  ;;  %v13461_v39 = vpack.c.bf16 %v679_v53, %v678_v19  ;;  %v13471_v53 = vpop.f32.mrb[20].mxu0 }
 0x1fc   :  { %v8147_v19 = vpop.f32.mrb[21].mxu0 }
 0x1fd   :  { %15073 = vst [vmem:[#allocation89_spill] sm:$0xff] %v13461_v39 }
 0x1fe   :  { %10859 = vmatpush3.bf16.msra.mxu1 %v13449_v31  ;;  %10931 = vmatpush3.bf16.msra.mxu0 %v13126_v61  ;;  %v681_v61 = vld [vmem:[#allocation12 + $0x158] sm:$0xff] }
 0x1ff   :  { %10860 = vmatprep.subr.bf16.mxu1 %v15071_v28  ;;  %10932 = vmatprep.subr.bf16.mxu0 %v15071_v28  ;;  %v13467_v21 = vpack.c.bf16 %v681_v61, %v680_v58  ;;  %v684_v61 = vld [vmem:[#allocation12 + $0x170] sm:$0xff]  ;;  %v685_v58 = vld [vmem:[#allocation12 + $0x178] sm:$0xff] }
 0x201   :  { %15074 = vst [vmem:[#allocation90_spill] sm:$0xff] %v13467_v21 }
 0x202   :  { %10862 = vmatpush3.bf16.msra.mxu1 %v13455_v29  ;;  %10934 = vmatpush3.bf16.msra.mxu0 %v13136_v4  ;;  %v683_v4 = vld [vmem:[#allocation12 + $0x168] sm:$0xff] }
 0x203   :  { %10863 = vmatprep.subr.bf16.mxu1 %v15071_v28  ;;  %10935 = vmatprep.subr.bf16.mxu0 %v15071_v28  ;;  %v13475_v47 = vpack.c.bf16 %v683_v4, %v682_v22 }
 0x205   :  { %15075 = vst [vmem:[#allocation91_spill] sm:$0xff] %v13475_v47 }
 0x206   :  { %10865 = vmatpush3.bf16.msra.mxu1 %v13461_v39  ;;  %10937 = vmatpush3.bf16.msra.mxu0 %v13147_v11  ;;  %v13481_v11 = vpack.c.bf16 %v685_v58, %v684_v61 }
 0x207   :  { %10866 = vmatprep.subr.bf16.mxu1 %v15071_v28  ;;  %10938 = vmatprep.subr.bf16.mxu0 %v15071_v28 }
 0x208   :  { %15076 = vst [vmem:[#allocation92_spill] sm:$0xff] %v13481_v11 }
 0x20a   :  { %10868 = vmatpush3.bf16.msra.mxu1 %v13467_v21  ;;  %10940 = vmatpush3.bf16.msra.mxu0 %v13155_v17 }
 0x20b   :  { %10869 = vmatprep.subr.bf16.mxu1 %v15071_v28  ;;  %10941 = vmatprep.subr.bf16.mxu0 %v15071_v28 }
 0x20e   :  { %10871 = vmatpush3.bf16.msra.mxu1 %v13475_v47  ;;  %10943 = vmatpush3.bf16.msra.mxu0 %v13163_v25 }
 0x20f   :  { %10872 = vmatprep.subr.bf16.mxu1 %v15071_v28  ;;  %10944 = vmatprep.subr.bf16.mxu0 %v15071_v28 }
 0x212   :  { %10874 = vmatpush3.bf16.msra.mxu1 %v13481_v11  ;;  %10946 = vmatpush3.bf16.msra.mxu0 %v13171_v34 }
 0x213   :  { %10899 = vmatprep.subr.bf16.mxu1 %v15071_v28  ;;  %10971 = vmatprep.subr.bf16.mxu0 %v15071_v28 }
 0x215   :  { %8251 = vmatmul.mubr.f32.vlgmr.msra.gmra.mrb[16].mxu1 %v15072_v20  ;;  %8356 = vmatmul.mubr.f32.vlgmr.msra.gmra.mrb[26].mxu0 %v13377_v51 }
 0x216   :  { %10901 = vmatpush3.bf16.msra.mxu1 %v13099_v46  ;;  %8320 = vmatprep.mubr.msk.f32.mxu1 %vm12844_vm0, %v15072_v20 }
 0x217   :  { %10902 = vmatprep.subr.bf16.mxu1 %v15071_v28  ;;  %10973 = vmatpush3.bf16.msra.mxu0 %v13251_v62 }
 0x218   :  { %10974 = vmatprep.subr.bf16.mxu0 %v15071_v28  ;;  %8425 = vmatprep.mubr.msk.f32.mxu0 %vm12844_vm0, %v15072_v20 }
 0x21a   :  { %10904 = vmatpush3.bf16.msra.mxu1 %v13109_v52 }
 0x21b   :  { %10905 = vmatprep.subr.bf16.mxu1 %v15071_v28  ;;  %10976 = vmatpush3.bf16.msra.mxu0 %v13262_v14 }
 0x21c   :  { %10977 = vmatprep.subr.bf16.mxu0 %v15071_v28 }
 0x21e   :  { %10907 = vmatpush3.bf16.msra.mxu1 %v13121_v56 }
 0x21f   :  { %10908 = vmatprep.subr.bf16.mxu1 %v15071_v28  ;;  %10979 = vmatpush3.bf16.msra.mxu0 %v13270_v30 }
 0x220   :  { %10980 = vmatprep.subr.bf16.mxu0 %v15071_v28 }
 0x222   :  { %10910 = vmatpush3.bf16.msra.mxu1 %v13131_v3 }
 0x223   :  { %10911 = vmatprep.subr.bf16.mxu1 %v15071_v28  ;;  %10982 = vmatpush3.bf16.msra.mxu0 %v13278_v50 }
 0x224   :  { %10983 = vmatprep.subr.bf16.mxu0 %v15071_v28 }
 0x226   :  { %10913 = vmatpush3.bf16.msra.mxu1 %v13141_v9 }
 0x227   :  { %10914 = vmatprep.subr.bf16.mxu1 %v15071_v28  ;;  %10985 = vmatpush3.bf16.msra.mxu0 %v13286_v8 }
 0x228   :  { %10986 = vmatprep.subr.bf16.mxu0 %v15071_v28 }
 0x22a   :  { %10916 = vmatpush3.bf16.msra.mxu1 %v13151_v16 }
 0x22b   :  { %10917 = vmatprep.subr.bf16.mxu1 %v15071_v28  ;;  %10988 = vmatpush3.bf16.msra.mxu0 %v13294_v36 }
 0x22c   :  { %10989 = vmatprep.subr.bf16.mxu0 %v15071_v28 }
 0x22e   :  { %10919 = vmatpush3.bf16.msra.mxu1 %v13159_v23 }
 0x22f   :  { %10920 = vmatprep.subr.bf16.mxu1 %v15071_v28  ;;  %10991 = vmatpush3.bf16.msra.mxu0 %v13302_v1 }
 0x230   :  { %10992 = vmatprep.subr.bf16.mxu0 %v15071_v28 }
 0x232   :  { %10922 = vmatpush3.bf16.msra.mxu1 %v13167_v33 }
 0x233   :  { %10947 = vmatprep.subr.bf16.mxu1 %v15071_v28  ;;  %10994 = vmatpush3.bf16.msra.mxu0 %v13310_v42 }
 0x234   :  { %11019 = vmatprep.subr.bf16.mxu0 %v15071_v28 }
 0x235   :  { %8321 = vmatmul.mubr.f32.vlgmr.msra.gmra.mrb[18].mxu1 %v13377_v51 }
 0x236   :  { %10949 = vmatpush3.bf16.msra.mxu1 %v13184_v37  ;;  %8390 = vmatprep.mubr.msk.f32.mxu1 %vm12844_vm0, %v15072_v20 }
 0x237   :  { %10950 = vmatprep.subr.bf16.mxu1 %v15071_v28 }
 0x23a   :  { %10952 = vmatpush3.bf16.msra.mxu1 %v13187_v40 }
 0x23b   :  { %10953 = vmatprep.subr.bf16.mxu1 %v15071_v28 }
 0x23e   :  { %10955 = vmatpush3.bf16.msra.mxu1 %v13191_v44 }
 0x23f   :  { %10956 = vmatprep.subr.bf16.mxu1 %v15071_v28 }
 0x242   :  { %10958 = vmatpush3.bf16.msra.mxu1 %v13195_v49 }
 0x243   :  { %10959 = vmatprep.subr.bf16.mxu1 %v15071_v28 }
 0x246   :  { %10961 = vmatpush3.bf16.msra.mxu1 %v13199_v54 }
 0x247   :  { %10962 = vmatprep.subr.bf16.mxu1 %v15071_v28 }
 0x24a   :  { %10964 = vmatpush3.bf16.msra.mxu1 %v13203_v59  ;;  %v13550_v59 = vld [vmem:[%s14877_s6] ss:$0 sm:$0xff] }
 0x24b   :  { %10965 = vmatprep.subr.bf16.mxu1 %v15071_v28  ;;  %15077 = vst [vmem:[#allocation93_spill] sm:$0xff] %v13550_v59 }
 0x24e   :  { %10967 = vmatpush3.bf16.msra.mxu1 %v13207_v0 }
 0x24f   :  { %10968 = vmatprep.subr.bf16.mxu1 %v15071_v28 }
 0x252   :  { %10970 = vmatpush3.bf16.msra.mxu1 %v13211_v6 }
 0x253   :  { %10995 = vmatprep.subr.bf16.mxu1 %v15071_v28 }
 0x2a8   :  { %v1094_v4 = vpop.f32.mrb[12].mxu1  ;;  %v1318_v22 = vpop.f32.mrb[22].mxu0 }
 0x2a9   :  { %v1095_v19 = vadd.f32 %v1094_v4, %v13415_v38  ;;  %v8112_v61 = vpop.f32.mrb[13].mxu1  ;;  %v8217_v58 = vpop.f32.mrb[23].mxu0  ;;  %v13558_v38 = vld [vmem:[%s14877_s6 + $0x1] ss:$0 sm:$0xff] }
 0x2aa   :  { %15078 = vst [vmem:[#allocation94_spill] sm:$0xff] %v13558_v38 }
 0x2ab   :  { %v1098_v54 = vadd.f32 %v13550_v59, %v1095_v19 }
 0x2ad   :  { %v6427_v36 = vmul.f32 -1.442695, %v1098_v54  ;;  %v13564_v54 = vld [vmem:[%s14877_s6 + $0x3] ss:$0 sm:$0xff] }
 0x2af   :  { %12482 = vpow2.f32 %v6427_v36 }
 0x2b9   :  { %v12483_v61 = vpop.eup %12482 }
 0x2c8   :  { %v1241_v0 = vpop.f32.mrb[14].mxu1  ;;  %v1465_v42 = vpop.f32.mrb[24].mxu0 }
 0x2c9   :  { %v1242_v49 = vadd.f32 %v1241_v0, %v13471_v53  ;;  %v1469_v6 = vadd.f32 %v1465_v42, %v13324_v7  ;;  %v8182_v1 = vpop.f32.mrb[15].mxu1  ;;  %v8287_v44 = vpop.f32.mrb[25].mxu0  ;;  %v1102_v0 = vadd.f32 1.0, %v12483_v61 }
 0x2cb   :  { %v6429_v40 = vmul.f32 -1.442695, %v1469_v6  ;;  %v1245_v4 = vadd.f32 %v13558_v38, %v1242_v49 }
 0x2cd   :  { %12484 = vpow2.f32 %v6429_v40  ;;  %v6428_v19 = vmul.f32 -1.442695, %v1245_v4  ;;  %v13569_v40 = vld [vmem:[%s14877_s6 + $0x2] ss:$0 sm:$0xff] }
 0x2cf   :  { %12486 = vpow2.f32 %v6428_v19 }
 0x2d0   :  { %12488 = vrcp.f32 %v1102_v0 }
 0x2d7   :  { %v12485_v58 = vpop.eup %12484 }
 0x2d8   :  { %v1473_v53 = vadd.f32 1.0, %v12485_v58  ;;  %v1319_v58 = vadd.f32 %v13569_v40, %v1318_v22  ;;  %v15080_v22 = vld [vmem:[#allocation47_spill] sm:$0xff] }
 0x2d9   :  { %v12487_v44 = vpop.eup %12486 }
 0x2da   :  { %12490 = vrcp.f32 %v1473_v53  ;;  %v1249_v6 = vadd.f32 1.0, %v12487_v44  ;;  %v12489_v1 = vpop.eup %12488 }
 0x2dc   :  { %12492 = vrcp.f32 %v1249_v6 }
 0x2e4   :  { %v12491_v61 = vpop.eup %12490 }
 0x2e6   :  { %v12493_v59 = vpop.eup %12492 }
 0x2e7   :  { %v1395_v8 = vsub.f32 1.0, %v12493_v59  ;;  %v1397_v33 = vmul.f32 0.0, %v12493_v59 }
 0x2e8   :  { %v1388_v49 = vpop.f32.mrb[16].mxu1  ;;  %v1619_v36 = vpop.f32.mrb[26].mxu0 }
 0x2e9   :  { %v1389_v42 = vadd.f32 %v13564_v54, %v1388_v49  ;;  %v1620_v7 = vadd.f32 %v13372_v5, %v1619_v36  ;;  %v8252_v4 = vpop.f32.mrb[17].mxu1  ;;  %v8357_v19 = vpop.f32.mrb[27].mxu0  ;;  %v15079_v36 = vld [vmem:[#allocation46_spill] sm:$0xff] }
 0x2ea   :  { %v15086_v4 = vld [vmem:[#allocation52_spill] sm:$0xff] }
 0x2eb   :  { %v1392_v0 = vmul.f32 %v12489_v1, %v1389_v42  ;;  %v1623_v53 = vmul.f32 %v12491_v61, %v1620_v7  ;;  %v15084_v1 = vld [vmem:[#allocation50_spill] sm:$0xff]  ;;  %v15085_v42 = vld [vmem:[#allocation51_spill] sm:$0xff]  ;;  %v15087_v61 = vld [vmem:[#allocation53_spill] sm:$0xff] }
 0x2ed   :  { %v1393_v44 = vadd.f32 %v1392_v0, %v1319_v58  ;;  %v1624_v38 = vadd.f32 %v1623_v53, %v13355_v43  ;;  %v15081_v43 = vld [vmem:[#allocation48_spill] sm:$0xff]  ;;  %v15088_v58 = vld [vmem:[#allocation55_spill] sm:$0xff]  ;;  %v15089_v0 = vld [vmem:[#allocation57_spill] sm:$0xff] }
 0x2ef   :  { %12494 = vtanh.f32 %v1393_v44 }
 0x2f9   :  { %v12495_v37 = vpop.eup %12494 }
 0x2fa   :  { %v1396_v50 = vmul.f32 %v12495_v37, %v1395_v8  ;;  %v15083_v8 = vld [vmem:[#allocation49_spill] sm:$0xff] }
 0x2fc   :  { %v13575_v49 = vadd.f32 %v1397_v33, %v1396_v50  ;;  %v15082_v33 = vld [vmem:[#allocation70_spill] sm:$0xff] }
 0x2fe   :  { %8391 = vmatmul.mubr.f32.vlgmr.msra.gmra.mrb[20].mxu1 %v13575_v49 }
 0x2ff   :  { %10997 = vmatpush3.bf16.msra.mxu1 %v15079_v36  ;;  %8460 = vmatprep.mubr.msk.f32.mxu1 %vm12844_vm0, %v15072_v20 }
 0x300   :  { %10998 = vmatprep.subr.bf16.mxu1 %v15071_v28 }
 0x303   :  { %11000 = vmatpush3.bf16.msra.mxu1 %v15080_v22 }
 0x304   :  { %11001 = vmatprep.subr.bf16.mxu1 %v15071_v28 }
 0x307   :  { %11003 = vmatpush3.bf16.msra.mxu1 %v15081_v43 }
 0x308   :  { %v1542_v6 = vpop.f32.mrb[18].mxu1  ;;  %11004 = vmatprep.subr.bf16.mxu1 %v15071_v28 }
 0x309   :  { %v1546_v37 = vadd.f32 %v1542_v6, %v15082_v33  ;;  %v8322_v59 = vpop.f32.mrb[19].mxu1 }
 0x30b   :  { %v6430_v50 = vmul.f32 -1.442695, %v1546_v37  ;;  %11006 = vmatpush3.bf16.msra.mxu1 %v15083_v8  ;;  %v15090_v37 = vld [vmem:[#allocation59_spill] sm:$0xff] }
 0x30c   :  { %11007 = vmatprep.subr.bf16.mxu1 %v15071_v28 }
 0x30d   :  { %12496 = vpow2.f32 %v6430_v50  ;;  %v15091_v50 = vld [vmem:[#allocation61_spill] sm:$0xff] }
 0x30f   :  { %11009 = vmatpush3.bf16.msra.mxu1 %v15084_v1 }
 0x310   :  { %11010 = vmatprep.subr.bf16.mxu1 %v15071_v28 }
 0x313   :  { %11012 = vmatpush3.bf16.msra.mxu1 %v15085_v42 }
 0x314   :  { %11013 = vmatprep.subr.bf16.mxu1 %v15071_v28 }
 0x317   :  { %v12497_v7 = vpop.eup %12496  ;;  %11015 = vmatpush3.bf16.msra.mxu1 %v15086_v4 }
 0x318   :  { %v1550_v19 = vadd.f32 1.0, %v12497_v7  ;;  %11016 = vmatprep.subr.bf16.mxu1 %v15071_v28  ;;  %v15093_v7 = vld [vmem:[#allocation65_spill] sm:$0xff] }
 0x31a   :  { %12498 = vrcp.f32 %v1550_v19  ;;  %v15094_v19 = vld [vmem:[#allocation67_spill] sm:$0xff] }
 0x31b   :  { %11018 = vmatpush3.bf16.msra.mxu1 %v15087_v61  ;;  %12500 = vtanh.f32 %v1624_v38 }
 0x31c   :  { %11043 = vmatprep.subr.bf16.mxu1 %v15071_v28 }
 0x31e   :  { %8461 = vmatmul.mubr.f32.vlgmr.msra.gmra.mrb[22].mxu1 %v13575_v49 }
 0x31f   :  { %11045 = vmatpush3.bf16.msra.mxu1 %v15088_v58  ;;  %8530 = vmatprep.mubr.msk.f32.mxu1 %vm12844_vm0, %v15072_v20 }
 0x320   :  { %11046 = vmatprep.subr.bf16.mxu1 %v15071_v28 }
 0x323   :  { %11048 = vmatpush3.bf16.msra.mxu1 %v15089_v0 }
 0x324   :  { %v12499_v53 = vpop.eup %12498  ;;  %11049 = vmatprep.subr.bf16.mxu1 %v15071_v28 }
 0x325   :  { %v1626_v44 = vsub.f32 1.0, %v12499_v53  ;;  %v12501_v6 = vpop.eup %12500  ;;  %v1628_v38 = vmul.f32 %v12499_v53, %v13377_v51  ;;  %v15092_v51 = vld [vmem:[#allocation63_spill] sm:$0xff]  ;;  %v15095_v53 = vld [vmem:[#allocation69_spill] sm:$0xff] }
 0x327   :  { %v1627_v33 = vmul.f32 %v12501_v6, %v1626_v44  ;;  %11051 = vmatpush3.bf16.msra.mxu1 %v15090_v37  ;;  %v15096_v44 = vld [vmem:[#allocation23_spill] sm:$0xff]  ;;  %v15097_v6 = vld [vmem:[#allocation25_spill] sm:$0xff] }
 0x328   :  { %11052 = vmatprep.subr.bf16.mxu1 %v15071_v28 }
 0x329   :  { %v13607_v59 = vadd.f32 %v1628_v38, %v1627_v33  ;;  %v15098_v33 = vld [vmem:[#allocation27_spill] sm:$0xff]  ;;  %v15099_v38 = vld [vmem:[#allocation29_spill] sm:$0xff] }
 0x32b   :  { %11054 = vmatpush3.bf16.msra.mxu1 %v15091_v50  ;;  %8426 = vmatmul.mubr.f32.vlgmr.msra.gmra.mrb[28].mxu0 %v13607_v59 }
 0x32c   :  { %11021 = vmatpush3.bf16.msra.mxu0 %v13375_v12  ;;  %11055 = vmatprep.subr.bf16.mxu1 %v15071_v28 }
 0x32d   :  { %11022 = vmatprep.subr.bf16.mxu0 %v15071_v28  ;;  %8495 = vmatprep.mubr.msk.f32.mxu0 %vm12844_vm0, %v15072_v20 }
 0x32f   :  { %11057 = vmatpush3.bf16.msra.mxu1 %v15092_v51 }
 0x330   :  { %11024 = vmatpush3.bf16.msra.mxu0 %v13383_v63  ;;  %11058 = vmatprep.subr.bf16.mxu1 %v15071_v28 }
 0x331   :  { %11025 = vmatprep.subr.bf16.mxu0 %v15071_v28 }
 0x333   :  { %11060 = vmatpush3.bf16.msra.mxu1 %v15093_v7 }
 0x334   :  { %11027 = vmatpush3.bf16.msra.mxu0 %v13393_v48  ;;  %11061 = vmatprep.subr.bf16.mxu1 %v15071_v28 }
 0x335   :  { %11028 = vmatprep.subr.bf16.mxu0 %v15071_v28 }
 0x337   :  { %11063 = vmatpush3.bf16.msra.mxu1 %v15094_v19 }
 0x338   :  { %11030 = vmatpush3.bf16.msra.mxu0 %v13399_v35  ;;  %11064 = vmatprep.subr.bf16.mxu1 %v15071_v28 }
 0x339   :  { %11031 = vmatprep.subr.bf16.mxu0 %v15071_v28 }
 0x33b   :  { %11066 = vmatpush3.bf16.msra.mxu1 %v15095_v53 }
 0x33c   :  { %11033 = vmatpush3.bf16.msra.mxu0 %v13405_v60  ;;  %11091 = vmatprep.subr.bf16.mxu1 %v15071_v28 }
 0x33d   :  { %11034 = vmatprep.subr.bf16.mxu0 %v15071_v28 }
 0x33e   :  { %8531 = vmatmul.mubr.f32.vlgmr.msra.gmra.mrb[24].mxu1 %v13607_v59 }
 0x33f   :  { %11093 = vmatpush3.bf16.msra.mxu1 %v13039_v57  ;;  %8600 = vmatprep.mubr.msk.f32.mxu1 %vm12844_vm0, %v15072_v20 }
 0x340   :  { %11036 = vmatpush3.bf16.msra.mxu0 %v13411_v45  ;;  %11094 = vmatprep.subr.bf16.mxu1 %v15071_v28 }
 0x341   :  { %11037 = vmatprep.subr.bf16.mxu0 %v15071_v28 }
 0x343   :  { %11096 = vmatpush3.bf16.msra.mxu1 %v13049_v2 }
 0x344   :  { %11039 = vmatpush3.bf16.msra.mxu0 %v13419_v15  ;;  %11097 = vmatprep.subr.bf16.mxu1 %v15071_v28 }
 0x345   :  { %11040 = vmatprep.subr.bf16.mxu0 %v15071_v28 }
 0x347   :  { %11099 = vmatpush3.bf16.msra.mxu1 %v13061_v10 }
 0x348   :  { %11042 = vmatpush3.bf16.msra.mxu0 %v13425_v13  ;;  %11100 = vmatprep.subr.bf16.mxu1 %v15071_v28 }
 0x349   :  { %11067 = vmatprep.subr.bf16.mxu0 %v15071_v28 }
 0x34b   :  { %8496 = vmatmul.mubr.f32.vlgmr.msra.gmra.mrb[30].mxu0 %v13607_v59  ;;  %11102 = vmatpush3.bf16.msra.mxu1 %v13073_v18 }
 0x34c   :  { %11069 = vmatpush3.bf16.msra.mxu0 %v13431_v55  ;;  %11103 = vmatprep.subr.bf16.mxu1 %v15071_v28 }
 0x34d   :  { %11070 = vmatprep.subr.bf16.mxu0 %v15071_v28  ;;  %8565 = vmatprep.mubr.msk.f32.mxu0 %vm12844_vm0, %v15072_v20 }
 0x34f   :  { %11105 = vmatpush3.bf16.msra.mxu1 %v13081_v24 }
 0x350   :  { %11072 = vmatpush3.bf16.msra.mxu0 %v13439_v27  ;;  %11106 = vmatprep.subr.bf16.mxu1 %v15071_v28 }
 0x351   :  { %11073 = vmatprep.subr.bf16.mxu0 %v15071_v28 }
 0x353   :  { %11108 = vmatpush3.bf16.msra.mxu1 %v13088_v32 }
 0x354   :  { %11075 = vmatpush3.bf16.msra.mxu0 %v13449_v31  ;;  %11109 = vmatprep.subr.bf16.mxu1 %v15071_v28 }
 0x355   :  { %11076 = vmatprep.subr.bf16.mxu0 %v15071_v28 }
 0x357   :  { %11111 = vmatpush3.bf16.msra.mxu1 %v13092_v26 }
 0x358   :  { %11078 = vmatpush3.bf16.msra.mxu0 %v13455_v29  ;;  %11112 = vmatprep.subr.bf16.mxu1 %v15071_v28 }
 0x359   :  { %11079 = vmatprep.subr.bf16.mxu0 %v15071_v28 }
 0x35b   :  { %11114 = vmatpush3.bf16.msra.mxu1 %v13096_v41 }
 0x35c   :  { %11081 = vmatpush3.bf16.msra.mxu0 %v13461_v39  ;;  %11139 = vmatprep.subr.bf16.mxu1 %v15071_v28 }
 0x35d   :  { %11082 = vmatprep.subr.bf16.mxu0 %v15071_v28 }
 0x35e   :  { %8601 = vmatmul.mubr.f32.vlgmr.msra.gmra.mrb[26].mxu1 %v13607_v59 }
 0x35f   :  { %11141 = vmatpush3.bf16.msra.mxu1 %v15096_v44  ;;  %8670 = vmatprep.mubr.msk.f32.mxu1 %vm12844_vm0, %v15072_v20 }
 0x360   :  { %11084 = vmatpush3.bf16.msra.mxu0 %v13467_v21  ;;  %11142 = vmatprep.subr.bf16.mxu1 %v15071_v28 }
 0x361   :  { %11085 = vmatprep.subr.bf16.mxu0 %v15071_v28 }
 0x363   :  { %11144 = vmatpush3.bf16.msra.mxu1 %v15097_v6 }
 0x364   :  { %11087 = vmatpush3.bf16.msra.mxu0 %v13475_v47  ;;  %11145 = vmatprep.subr.bf16.mxu1 %v15071_v28  ;;  %v15116_v47 = vld [vmem:[#allocation94_spill] sm:$0xff] }
 0x365   :  { %11088 = vmatprep.subr.bf16.mxu0 %v15071_v28 }
 0x367   :  { %11147 = vmatpush3.bf16.msra.mxu1 %v15098_v33  ;;  %v15100_v33 = vld [vmem:[#allocation31_spill] sm:$0xff] }
 0x368   :  { %11090 = vmatpush3.bf16.msra.mxu0 %v13481_v11  ;;  %11148 = vmatprep.subr.bf16.mxu1 %v15071_v28 }
 0x369   :  { %11115 = vmatprep.subr.bf16.mxu0 %v15071_v28 }
 0x36b   :  { %8566 = vmatmul.mubr.f32.vlgmr.msra.gmra.mrb[32].mxu0 %v13575_v49  ;;  %11150 = vmatpush3.bf16.msra.mxu1 %v15099_v38 }
 0x36c   :  { %11117 = vmatpush3.bf16.msra.mxu0 %v13099_v46  ;;  %11151 = vmatprep.subr.bf16.mxu1 %v15071_v28 }
 0x36d   :  { %11118 = vmatprep.subr.bf16.mxu0 %v15071_v28  ;;  %8635 = vmatprep.mubr.msk.f32.mxu0 %vm12844_vm0, %v15072_v20 }
 0x36f   :  { %11153 = vmatpush3.bf16.msra.mxu1 %v15100_v33 }
 0x370   :  { %11120 = vmatpush3.bf16.msra.mxu0 %v13109_v52  ;;  %11154 = vmatprep.subr.bf16.mxu1 %v15071_v28 }
 0x371   :  { %11121 = vmatprep.subr.bf16.mxu0 %v15071_v28 }
 0x373   :  { %11156 = vmatpush3.bf16.msra.mxu1 %v13155_v17 }
 0x374   :  { %11123 = vmatpush3.bf16.msra.mxu0 %v13121_v56  ;;  %11157 = vmatprep.subr.bf16.mxu1 %v15071_v28 }
 0x375   :  { %11124 = vmatprep.subr.bf16.mxu0 %v15071_v28 }
 0x377   :  { %11159 = vmatpush3.bf16.msra.mxu1 %v13163_v25 }
 0x378   :  { %11126 = vmatpush3.bf16.msra.mxu0 %v13131_v3  ;;  %11160 = vmatprep.subr.bf16.mxu1 %v15071_v28 }
 0x379   :  { %11127 = vmatprep.subr.bf16.mxu0 %v15071_v28 }
 0x37b   :  { %11162 = vmatpush3.bf16.msra.mxu1 %v13171_v34 }
 0x37c   :  { %11129 = vmatpush3.bf16.msra.mxu0 %v13141_v9  ;;  %11187 = vmatprep.subr.bf16.mxu1 %v15071_v28  ;;  %v15103_v9 = vld [vmem:[#allocation38_spill] sm:$0xff] }
 0x37d   :  { %11130 = vmatprep.subr.bf16.mxu0 %v15071_v28 }
 0x37e   :  { %8671 = vmatmul.mubr.f32.vlgmr.msra.gmra.mrb[28].mxu1 %v13607_v59 }
 0x37f   :  { %11189 = vmatpush3.bf16.msra.mxu1 %v13251_v62  ;;  %8740 = vmatprep.mubr.msk.f32.mxu1 %vm12844_vm0, %v15072_v20  ;;  %v15101_v62 = vld [vmem:[#allocation36_spill] sm:$0xff] }
 0x380   :  { %11132 = vmatpush3.bf16.msra.mxu0 %v13151_v16  ;;  %11190 = vmatprep.subr.bf16.mxu1 %v15071_v28  ;;  %v15102_v16 = vld [vmem:[#allocation60_spill] sm:$0xff] }
 0x381   :  { %11133 = vmatprep.subr.bf16.mxu0 %v15071_v28 }
 0x383   :  { %11192 = vmatpush3.bf16.msra.mxu1 %v13262_v14  ;;  %v15109_v14 = vld [vmem:[#allocation41_spill] sm:$0xff] }
 0x384   :  { %11135 = vmatpush3.bf16.msra.mxu0 %v13159_v23  ;;  %11193 = vmatprep.subr.bf16.mxu1 %v15071_v28  ;;  %v15106_v23 = vld [vmem:[#allocation64_spill] sm:$0xff] }
 0x385   :  { %11136 = vmatprep.subr.bf16.mxu0 %v15071_v28 }
 0x387   :  { %11195 = vmatpush3.bf16.msra.mxu1 %v13270_v30  ;;  %v15104_v30 = vld [vmem:[#allocation62_spill] sm:$0xff] }
 0x388   :  { %11138 = vmatpush3.bf16.msra.mxu0 %v15101_v62  ;;  %11196 = vmatprep.subr.bf16.mxu1 %v15071_v28  ;;  %v15105_v62 = vld [vmem:[#allocation39_spill] sm:$0xff] }
 0x389   :  { %11163 = vmatprep.subr.bf16.mxu0 %v15071_v28 }
 0x38b   :  { %8636 = vmatmul.mubr.f32.vlgmr.msra.gmra.mrb[34].mxu0 %v13607_v59  ;;  %11198 = vmatpush3.bf16.msra.mxu1 %v15102_v16  ;;  %v15107_v16 = vld [vmem:[#allocation40_spill] sm:$0xff] }
 0x38c   :  { %11165 = vmatpush3.bf16.msra.mxu0 %v15103_v9  ;;  %8705 = vmatprep.mubr.msk.f32.mxu0 %vm12844_vm0, %v15072_v20  ;;  %v15108_v9 = vld [vmem:[#allocation66_spill] sm:$0xff] }
 0x38d   :  { %11166 = vmatprep.subr.bf16.mxu0 %v15071_v28  ;;  %11199 = vmatprep.subr.bf16.mxu1 %v15071_v28 }
 0x38f   :  { %11201 = vmatpush3.bf16.msra.mxu1 %v15104_v30  ;;  %v15111_v30 = vld [vmem:[#allocation42_spill] sm:$0xff] }
 0x390   :  { %11168 = vmatpush3.bf16.msra.mxu0 %v15105_v62  ;;  %11202 = vmatprep.subr.bf16.mxu1 %v15071_v28  ;;  %v15110_v62 = vld [vmem:[#allocation68_spill] sm:$0xff] }
 0x391   :  { %11169 = vmatprep.subr.bf16.mxu0 %v15071_v28 }
 0x393   :  { %11204 = vmatpush3.bf16.msra.mxu1 %v15106_v23  ;;  %v15113_v23 = vld [vmem:[#allocation44_spill] sm:$0xff] }
 0x394   :  { %11171 = vmatpush3.bf16.msra.mxu0 %v15107_v16  ;;  %11205 = vmatprep.subr.bf16.mxu1 %v15071_v28  ;;  %v15112_v16 = vld [vmem:[#allocation43_spill] sm:$0xff] }
 0x395   :  { %11172 = vmatprep.subr.bf16.mxu0 %v15071_v28 }
 0x397   :  { %11207 = vmatpush3.bf16.msra.mxu1 %v15108_v9 }
 0x398   :  { %11174 = vmatpush3.bf16.msra.mxu0 %v15109_v14  ;;  %11208 = vmatprep.subr.bf16.mxu1 %v15071_v28  ;;  %v15114_v14 = vld [vmem:[#allocation45_spill] sm:$0xff] }
 0x399   :  { %11175 = vmatprep.subr.bf16.mxu0 %v15071_v28 }
 0x39b   :  { %11210 = vmatpush3.bf16.msra.mxu1 %v15110_v62 }
 0x39c   :  { %11177 = vmatpush3.bf16.msra.mxu0 %v15111_v30  ;;  %11235 = vmatprep.subr.bf16.mxu1 %v15071_v28 }
 0x39d   :  { %11178 = vmatprep.subr.bf16.mxu0 %v15071_v28 }
 0x3a0   :  { %11180 = vmatpush3.bf16.msra.mxu0 %v15112_v16  ;;  %v15115_v16 = vld [vmem:[#allocation93_spill] sm:$0xff] }
 0x3a1   :  { %11181 = vmatprep.subr.bf16.mxu0 %v15071_v28 }
 0x3a4   :  { %11183 = vmatpush3.bf16.msra.mxu0 %v15113_v23 }
 0x3a5   :  { %11184 = vmatprep.subr.bf16.mxu0 %v15071_v28 }
 0x3a8   :  { %11186 = vmatpush3.bf16.msra.mxu0 %v15114_v14 }
 0x3a9   :  { %11211 = vmatprep.subr.bf16.mxu0 %v15071_v28 }
 0x3d1   :  { %v1696_v9 = vpop.f32.mrb[20].mxu1 }
 0x3d2   :  { %v8392_v62 = vpop.f32.mrb[21].mxu1 }
 0x3f1   :  { %v1843_v34 = vpop.f32.mrb[22].mxu1 }
 0x3f2   :  { %v8462_v30 = vpop.f32.mrb[23].mxu1 }
 0x3f3   :  { %v15117_v30 = vld [vmem:[#allocation72_spill] sm:$0xff] }
 0x3fe   :  { %v1766_v3 = vpop.f32.mrb[28].mxu0 }
 0x3ff   :  { %v1767_v25 = vadd.f32 %v1766_v3, %v1696_v9  ;;  %v8427_v56 = vpop.f32.mrb[29].mxu0 }
 0x401   :  { %v1770_v33 = vadd.f32 %v15115_v16, %v1767_v25 }
 0x403   :  { %v6431_v11 = vmul.f32 -1.442695, %v1770_v33 }
 0x405   :  { %12502 = vpow2.f32 %v6431_v11 }
 0x40f   :  { %v12503_v21 = vpop.eup %12502 }
 0x410   :  { %v1774_v44 = vadd.f32 1.0, %v12503_v21 }
 0x411   :  { %v1990_v17 = vpop.f32.mrb[24].mxu1 }
 0x412   :  { %v8532_v52 = vpop.f32.mrb[25].mxu1 }
 0x41e   :  { %v1913_v46 = vpop.f32.mrb[30].mxu0 }
 0x41f   :  { %v1914_v38 = vadd.f32 %v1913_v46, %v1843_v34  ;;  %v8497_v23 = vpop.f32.mrb[31].mxu0  ;;  %v1991_v34 = vadd.f32 %v13569_v40, %v1990_v17 }
 0x421   :  { %v1917_v14 = vadd.f32 %v15116_v47, %v1914_v38 }
 0x423   :  { %v6432_v6 = vmul.f32 -1.442695, %v1917_v14 }
 0x425   :  { %12504 = vpow2.f32 %v6432_v6 }
 0x426   :  { %12506 = vrcp.f32 %v1774_v44 }
 0x42f   :  { %v12505_v52 = vpop.eup %12504 }
 0x430   :  { %v1921_v9 = vadd.f32 1.0, %v12505_v52  ;;  %v12507_v11 = vpop.eup %12506 }
 0x431   :  { %v2137_v62 = vpop.f32.mrb[26].mxu1 }
 0x432   :  { %v2141_v39 = vadd.f32 %v2137_v62, %v15117_v30  ;;  %v8602_v3 = vpop.f32.mrb[27].mxu1 }
 0x434   :  { %v6433_v56 = vmul.f32 -1.442695, %v2141_v39 }
 0x436   :  { %12508 = vpow2.f32 %v6433_v56 }
 0x437   :  { %12510 = vrcp.f32 %v1921_v9 }
 0x43e   :  { %v2060_v25 = vpop.f32.mrb[32].mxu0 }
 0x43f   :  { %v2061_v46 = vadd.f32 %v13564_v54, %v2060_v25  ;;  %v8567_v23 = vpop.f32.mrb[33].mxu0 }
 0x440   :  { %v12509_v6 = vpop.eup %12508 }
 0x441   :  { %v2064_v14 = vmul.f32 %v12507_v11, %v2061_v46  ;;  %v2145_v21 = vadd.f32 1.0, %v12509_v6  ;;  %v12511_v38 = vpop.eup %12510  ;;  %v15118_v46 = vld [vmem:[#allocation84_spill] sm:$0xff] }
 0x442   :  { %v2067_v39 = vsub.f32 1.0, %v12511_v38  ;;  %v2069_v30 = vmul.f32 %v12511_v38, %v13575_v49  ;;  %v15119_v49 = vld [vmem:[#allocation74_spill] sm:$0xff] }
 0x443   :  { %v2065_v33 = vadd.f32 %v2064_v14, %v1991_v34 }
 0x445   :  { %12512 = vtanh.f32 %v2065_v33 }
 0x446   :  { %12514 = vrcp.f32 %v2145_v21 }
 0x44f   :  { %v12513_v44 = vpop.eup %12512 }
 0x450   :  { %v2068_v62 = vmul.f32 %v12513_v44, %v2067_v39  ;;  %v12515_v17 = vpop.eup %12514 }
 0x451   :  { %v2291_v3 = vpop.f32.mrb[28].mxu1 }
 0x452   :  { %v2292_v56 = vadd.f32 %v13372_v5, %v2291_v3  ;;  %v8672_v52 = vpop.f32.mrb[29].mxu1  ;;  %v13759_v25 = vadd.f32 %v2069_v30, %v2068_v62  ;;  %v15121_v3 = vld [vmem:[#allocation23_spill] sm:$0xff] }
 0x453   :  { %v15123_v52 = vld [vmem:[#allocation25_spill] sm:$0xff] }
 0x454   :  { %v2295_v9 = vmul.f32 %v12515_v17, %v2292_v56  ;;  %8706 = vmatmul.mubr.f32.vlgmr.msra.gmra.mrb[36].mxu0 %v13759_v25  ;;  %v15122_v56 = vld [vmem:[#allocation90_spill] sm:$0xff]  ;;  %v15124_v17 = vld [vmem:[#allocation91_spill] sm:$0xff] }
 0x455   :  { %11213 = vmatpush3.bf16.msra.mxu0 %v15079_v36  ;;  %8775 = vmatprep.mubr.msk.f32.mxu0 %vm12844_vm0, %v15072_v20 }
 0x456   :  { %v2296_v23 = vadd.f32 %v2295_v9, %v15118_v46  ;;  %11214 = vmatprep.subr.bf16.mxu0 %v15071_v28  ;;  %v15125_v9 = vld [vmem:[#allocation27_spill] sm:$0xff]  ;;  %v15126_v46 = vld [vmem:[#allocation92_spill] sm:$0xff] }
 0x459   :  { %11216 = vmatpush3.bf16.msra.mxu0 %v15080_v22 }
 0x45a   :  { %11217 = vmatprep.subr.bf16.mxu0 %v15071_v28 }
 0x45d   :  { %11219 = vmatpush3.bf16.msra.mxu0 %v15081_v43 }
 0x45e   :  { %v2214_v5 = vpop.f32.mrb[34].mxu0  ;;  %11220 = vmatprep.subr.bf16.mxu0 %v15071_v28 }
 0x45f   :  { %v2218_v11 = vadd.f32 %v2214_v5, %v15119_v49  ;;  %v8637_v34 = vpop.f32.mrb[35].mxu0  ;;  %v15128_v5 = vld [vmem:[#allocation22_spill] sm:$0xff]  ;;  %v15129_v49 = vld [vmem:[#allocation31_spill] sm:$0xff] }
 0x460   :  { %v15131_v34 = vld [vmem:[#allocation33_spill] sm:$0xff] }
 0x461   :  { %v6434_v14 = vmul.f32 -1.442695, %v2218_v11  ;;  %11222 = vmatpush3.bf16.msra.mxu0 %v15083_v8  ;;  %v15130_v11 = vld [vmem:[#allocation24_spill] sm:$0xff] }
 0x462   :  { %11223 = vmatprep.subr.bf16.mxu0 %v15071_v28 }
 0x463   :  { %12516 = vpow2.f32 %v6434_v14  ;;  %v15132_v14 = vld [vmem:[#allocation26_spill] sm:$0xff] }
 0x465   :  { %11225 = vmatpush3.bf16.msra.mxu0 %v15084_v1 }
 0x466   :  { %11226 = vmatprep.subr.bf16.mxu0 %v15071_v28 }
 0x469   :  { %11228 = vmatpush3.bf16.msra.mxu0 %v15085_v42 }
 0x46a   :  { %11229 = vmatprep.subr.bf16.mxu0 %v15071_v28 }
 0x46d   :  { %v12517_v6 = vpop.eup %12516  ;;  %11231 = vmatpush3.bf16.msra.mxu0 %v15086_v4 }
 0x46e   :  { %v2222_v33 = vadd.f32 1.0, %v12517_v6  ;;  %11232 = vmatprep.subr.bf16.mxu0 %v15071_v28  ;;  %v15133_v6 = vld [vmem:[#allocation35_spill] sm:$0xff] }
 0x470   :  { %12518 = vrcp.f32 %v2222_v33  ;;  %v15134_v33 = vld [vmem:[#allocation28_spill] sm:$0xff] }
 0x471   :  { %11234 = vmatpush3.bf16.msra.mxu0 %v15087_v61  ;;  %12520 = vtanh.f32 %v2296_v23  ;;  %v15127_v23 = vld [vmem:[#allocation29_spill] sm:$0xff] }
 0x472   :  { %11259 = vmatprep.subr.bf16.mxu0 %v15071_v28 }
 0x474   :  { %8776 = vmatmul.mubr.f32.vlgmr.msra.gmra.mrb[38].mxu0 %v13759_v25 }
 0x475   :  { %11261 = vmatpush3.bf16.msra.mxu0 %v15088_v58  ;;  %8845 = vmatprep.mubr.msk.f32.mxu0 %vm12844_vm0, %v15072_v20 }
 0x476   :  { %11262 = vmatprep.subr.bf16.mxu0 %v15071_v28 }
 0x479   :  { %11264 = vmatpush3.bf16.msra.mxu0 %v15089_v0 }
 0x47a   :  { %v12519_v21 = vpop.eup %12518  ;;  %11265 = vmatprep.subr.bf16.mxu0 %v15071_v28 }
 0x47b   :  { %v2298_v38 = vsub.f32 1.0, %v12519_v21  ;;  %v12521_v39 = vpop.eup %12520  ;;  %v2300_v62 = vmul.f32 %v12519_v21, %v13607_v59  ;;  %v15120_v59 = vld [vmem:[#allocation89_spill] sm:$0xff] }
 0x47c   :  { %v15135_v21 = vld [vmem:[#allocation37_spill] sm:$0xff] }
 0x47d   :  { %v2299_v44 = vmul.f32 %v12521_v39, %v2298_v38  ;;  %11267 = vmatpush3.bf16.msra.mxu0 %v15090_v37  ;;  %v15136_v38 = vld [vmem:[#allocation30_spill] sm:$0xff] }
 0x47e   :  { %11268 = vmatprep.subr.bf16.mxu0 %v15071_v28  ;;  %v15137_v39 = vld [vmem:[#allocation54_spill] sm:$0xff] }
 0x47f   :  { %v13792_v30 = vadd.f32 %v2300_v62, %v2299_v44  ;;  %v15138_v44 = vld [vmem:[#allocation32_spill] sm:$0xff] }
 0x480   :  { %v15139_v62 = vld [vmem:[#allocation56_spill] sm:$0xff] }
 0x481   :  { %11270 = vmatpush3.bf16.msra.mxu0 %v15091_v50  ;;  %8741 = vmatmul.mubr.f32.vlgmr.msra.gmra.mrb[30].mxu1 %v13792_v30 }
 0x482   :  { %11237 = vmatpush3.bf16.msra.mxu1 %v13375_v12  ;;  %11271 = vmatprep.subr.bf16.mxu0 %v15071_v28 }
 0x483   :  { %11238 = vmatprep.subr.bf16.mxu1 %v15071_v28  ;;  %8810 = vmatprep.mubr.msk.f32.mxu1 %vm12844_vm0, %v15072_v20 }
 0x485   :  { %11273 = vmatpush3.bf16.msra.mxu0 %v15092_v51 }
 0x486   :  { %11240 = vmatpush3.bf16.msra.mxu1 %v13383_v63  ;;  %11274 = vmatprep.subr.bf16.mxu0 %v15071_v28 }
 0x487   :  { %11241 = vmatprep.subr.bf16.mxu1 %v15071_v28 }
 0x489   :  { %11276 = vmatpush3.bf16.msra.mxu0 %v15093_v7 }
 0x48a   :  { %11243 = vmatpush3.bf16.msra.mxu1 %v13393_v48  ;;  %11277 = vmatprep.subr.bf16.mxu0 %v15071_v28 }
 0x48b   :  { %11244 = vmatprep.subr.bf16.mxu1 %v15071_v28 }
 0x48d   :  { %11279 = vmatpush3.bf16.msra.mxu0 %v15094_v19 }
 0x48e   :  { %11246 = vmatpush3.bf16.msra.mxu1 %v13399_v35  ;;  %11280 = vmatprep.subr.bf16.mxu0 %v15071_v28 }
 0x48f   :  { %11247 = vmatprep.subr.bf16.mxu1 %v15071_v28 }
 0x491   :  { %11282 = vmatpush3.bf16.msra.mxu0 %v15095_v53 }
 0x492   :  { %11249 = vmatpush3.bf16.msra.mxu1 %v13405_v60  ;;  %11307 = vmatprep.subr.bf16.mxu0 %v15071_v28 }
 0x493   :  { %11250 = vmatprep.subr.bf16.mxu1 %v15071_v28 }
 0x494   :  { %8846 = vmatmul.mubr.f32.vlgmr.msra.gmra.mrb[40].mxu0 %v13792_v30 }
 0x495   :  { %11309 = vmatpush3.bf16.msra.mxu0 %v13039_v57  ;;  %8915 = vmatprep.mubr.msk.f32.mxu0 %vm12844_vm0, %v15072_v20 }
 0x496   :  { %11252 = vmatpush3.bf16.msra.mxu1 %v13411_v45  ;;  %11310 = vmatprep.subr.bf16.mxu0 %v15071_v28 }
 0x497   :  { %11253 = vmatprep.subr.bf16.mxu1 %v15071_v28 }
 0x499   :  { %11312 = vmatpush3.bf16.msra.mxu0 %v13049_v2 }
 0x49a   :  { %11255 = vmatpush3.bf16.msra.mxu1 %v13419_v15  ;;  %11313 = vmatprep.subr.bf16.mxu0 %v15071_v28 }
 0x49b   :  { %11256 = vmatprep.subr.bf16.mxu1 %v15071_v28 }
 0x49d   :  { %11315 = vmatpush3.bf16.msra.mxu0 %v13061_v10 }
 0x49e   :  { %11258 = vmatpush3.bf16.msra.mxu1 %v13425_v13  ;;  %11316 = vmatprep.subr.bf16.mxu0 %v15071_v28 }
 0x49f   :  { %11283 = vmatprep.subr.bf16.mxu1 %v15071_v28 }
 0x4a1   :  { %8811 = vmatmul.mubr.f32.vlgmr.msra.gmra.mrb[32].mxu1 %v13792_v30  ;;  %11318 = vmatpush3.bf16.msra.mxu0 %v13073_v18 }
 0x4a2   :  { %11285 = vmatpush3.bf16.msra.mxu1 %v13431_v55  ;;  %11319 = vmatprep.subr.bf16.mxu0 %v15071_v28 }
 0x4a3   :  { %11286 = vmatprep.subr.bf16.mxu1 %v15071_v28  ;;  %8880 = vmatprep.mubr.msk.f32.mxu1 %vm12844_vm0, %v15072_v20 }
 0x4a5   :  { %11321 = vmatpush3.bf16.msra.mxu0 %v13081_v24 }
 0x4a6   :  { %11288 = vmatpush3.bf16.msra.mxu1 %v13439_v27  ;;  %11322 = vmatprep.subr.bf16.mxu0 %v15071_v28 }
 0x4a7   :  { %11289 = vmatprep.subr.bf16.mxu1 %v15071_v28 }
 0x4a9   :  { %11324 = vmatpush3.bf16.msra.mxu0 %v13088_v32 }
 0x4aa   :  { %11291 = vmatpush3.bf16.msra.mxu1 %v13449_v31  ;;  %11325 = vmatprep.subr.bf16.mxu0 %v15071_v28 }
 0x4ab   :  { %11292 = vmatprep.subr.bf16.mxu1 %v15071_v28 }
 0x4ad   :  { %11327 = vmatpush3.bf16.msra.mxu0 %v13092_v26 }
 0x4ae   :  { %11294 = vmatpush3.bf16.msra.mxu1 %v13455_v29  ;;  %11328 = vmatprep.subr.bf16.mxu0 %v15071_v28 }
 0x4af   :  { %11295 = vmatprep.subr.bf16.mxu1 %v15071_v28 }
 0x4b1   :  { %11330 = vmatpush3.bf16.msra.mxu0 %v13096_v41 }
 0x4b2   :  { %11297 = vmatpush3.bf16.msra.mxu1 %v15120_v59  ;;  %11355 = vmatprep.subr.bf16.mxu0 %v15071_v28 }
 0x4b3   :  { %11298 = vmatprep.subr.bf16.mxu1 %v15071_v28 }
 0x4b4   :  { %8916 = vmatmul.mubr.f32.vlgmr.msra.gmra.mrb[42].mxu0 %v13792_v30 }
 0x4b5   :  { %11357 = vmatpush3.bf16.msra.mxu0 %v15121_v3  ;;  %8985 = vmatprep.mubr.msk.f32.mxu0 %vm12844_vm0, %v15072_v20 }
 0x4b6   :  { %11300 = vmatpush3.bf16.msra.mxu1 %v15122_v56  ;;  %11358 = vmatprep.subr.bf16.mxu0 %v15071_v28 }
 0x4b7   :  { %11301 = vmatprep.subr.bf16.mxu1 %v15071_v28 }
 0x4b9   :  { %11360 = vmatpush3.bf16.msra.mxu0 %v15123_v52 }
 0x4ba   :  { %11303 = vmatpush3.bf16.msra.mxu1 %v15124_v17  ;;  %11361 = vmatprep.subr.bf16.mxu0 %v15071_v28 }
 0x4bb   :  { %11304 = vmatprep.subr.bf16.mxu1 %v15071_v28 }
 0x4bd   :  { %11363 = vmatpush3.bf16.msra.mxu0 %v15125_v9 }
 0x4be   :  { %11306 = vmatpush3.bf16.msra.mxu1 %v15126_v46  ;;  %11364 = vmatprep.subr.bf16.mxu0 %v15071_v28 }
 0x4bf   :  { %11331 = vmatprep.subr.bf16.mxu1 %v15071_v28 }
 0x4c1   :  { %8881 = vmatmul.mubr.f32.vlgmr.msra.gmra.mrb[34].mxu1 %v13759_v25  ;;  %11366 = vmatpush3.bf16.msra.mxu0 %v15127_v23 }
 0x4c2   :  { %11333 = vmatpush3.bf16.msra.mxu1 %v15128_v5  ;;  %11367 = vmatprep.subr.bf16.mxu0 %v15071_v28 }
 0x4c3   :  { %11334 = vmatprep.subr.bf16.mxu1 %v15071_v28  ;;  %8950 = vmatprep.mubr.msk.f32.mxu1 %vm12844_vm0, %v15072_v20 }
 0x4c5   :  { %11369 = vmatpush3.bf16.msra.mxu0 %v15129_v49 }
 0x4c6   :  { %11336 = vmatpush3.bf16.msra.mxu1 %v15130_v11  ;;  %11370 = vmatprep.subr.bf16.mxu0 %v15071_v28 }
 0x4c7   :  { %11337 = vmatprep.subr.bf16.mxu1 %v15071_v28 }
 0x4c9   :  { %11372 = vmatpush3.bf16.msra.mxu0 %v15131_v34 }
 0x4ca   :  { %11339 = vmatpush3.bf16.msra.mxu1 %v15132_v14  ;;  %11373 = vmatprep.subr.bf16.mxu0 %v15071_v28 }
 0x4cb   :  { %11340 = vmatprep.subr.bf16.mxu1 %v15071_v28 }
 0x4cd   :  { %11375 = vmatpush3.bf16.msra.mxu0 %v15133_v6 }
 0x4ce   :  { %11342 = vmatpush3.bf16.msra.mxu1 %v15134_v33  ;;  %11376 = vmatprep.subr.bf16.mxu0 %v15071_v28  ;;  %v15144_v33 = vld [vmem:[#allocation38_spill] sm:$0xff] }
 0x4cf   :  { %11343 = vmatprep.subr.bf16.mxu1 %v15071_v28 }
 0x4d1   :  { %11378 = vmatpush3.bf16.msra.mxu0 %v15135_v21  ;;  %v15141_v21 = vld [vmem:[#allocation58_spill] sm:$0xff] }
 0x4d2   :  { %11345 = vmatpush3.bf16.msra.mxu1 %v15136_v38  ;;  %11403 = vmatprep.subr.bf16.mxu0 %v15071_v28  ;;  %v15140_v38 = vld [vmem:[#allocation34_spill] sm:$0xff] }
 0x4d3   :  { %11346 = vmatprep.subr.bf16.mxu1 %v15071_v28 }
 0x4d4   :  { %8986 = vmatmul.mubr.f32.vlgmr.msra.gmra.mrb[44].mxu0 %v13792_v30 }
 0x4d5   :  { %11405 = vmatpush3.bf16.msra.mxu0 %v15137_v39  ;;  %9055 = vmatprep.mubr.msk.f32.mxu0 %vm12844_vm0, %v15072_v20  ;;  %v15142_v39 = vld [vmem:[#allocation36_spill] sm:$0xff] }
 0x4d6   :  { %11348 = vmatpush3.bf16.msra.mxu1 %v15138_v44  ;;  %11406 = vmatprep.subr.bf16.mxu0 %v15071_v28  ;;  %v15143_v44 = vld [vmem:[#allocation60_spill] sm:$0xff] }
 0x4d7   :  { %11349 = vmatprep.subr.bf16.mxu1 %v15071_v28 }
 0x4d9   :  { %11408 = vmatpush3.bf16.msra.mxu0 %v15139_v62  ;;  %v15150_v62 = vld [vmem:[#allocation41_spill] sm:$0xff] }
 0x4da   :  { %11351 = vmatpush3.bf16.msra.mxu1 %v15140_v38  ;;  %11409 = vmatprep.subr.bf16.mxu0 %v15071_v28  ;;  %v15147_v38 = vld [vmem:[#allocation64_spill] sm:$0xff] }
 0x4db   :  { %11352 = vmatprep.subr.bf16.mxu1 %v15071_v28 }
 0x4dd   :  { %11411 = vmatpush3.bf16.msra.mxu0 %v15141_v21  ;;  %v15145_v21 = vld [vmem:[#allocation62_spill] sm:$0xff] }
 0x4de   :  { %11354 = vmatpush3.bf16.msra.mxu1 %v15142_v39  ;;  %11412 = vmatprep.subr.bf16.mxu0 %v15071_v28  ;;  %v15146_v39 = vld [vmem:[#allocation39_spill] sm:$0xff] }
 0x4df   :  { %11379 = vmatprep.subr.bf16.mxu1 %v15071_v28 }
 0x4e1   :  { %8951 = vmatmul.mubr.f32.vlgmr.msra.gmra.mrb[36].mxu1 %v13792_v30  ;;  %11414 = vmatpush3.bf16.msra.mxu0 %v15143_v44  ;;  %v15148_v44 = vld [vmem:[#allocation40_spill] sm:$0xff] }
 0x4e2   :  { %11381 = vmatpush3.bf16.msra.mxu1 %v15144_v33  ;;  %9020 = vmatprep.mubr.msk.f32.mxu1 %vm12844_vm0, %v15072_v20  ;;  %v15149_v33 = vld [vmem:[#allocation66_spill] sm:$0xff] }
 0x4e3   :  { %11382 = vmatprep.subr.bf16.mxu1 %v15071_v28  ;;  %11415 = vmatprep.subr.bf16.mxu0 %v15071_v28 }
 0x4e5   :  { %11417 = vmatpush3.bf16.msra.mxu0 %v15145_v21  ;;  %v15152_v21 = vld [vmem:[#allocation42_spill] sm:$0xff] }
 0x4e6   :  { %11384 = vmatpush3.bf16.msra.mxu1 %v15146_v39  ;;  %11418 = vmatprep.subr.bf16.mxu0 %v15071_v28  ;;  %v15151_v39 = vld [vmem:[#allocation68_spill] sm:$0xff] }
 0x4e7   :  { %11385 = vmatprep.subr.bf16.mxu1 %v15071_v28 }
 0x4e9   :  { %11420 = vmatpush3.bf16.msra.mxu0 %v15147_v38  ;;  %v15154_v38 = vld [vmem:[#allocation44_spill] sm:$0xff] }
 0x4ea   :  { %11387 = vmatpush3.bf16.msra.mxu1 %v15148_v44  ;;  %11421 = vmatprep.subr.bf16.mxu0 %v15071_v28  ;;  %v15153_v44 = vld [vmem:[#allocation43_spill] sm:$0xff] }
 0x4eb   :  { %11388 = vmatprep.subr.bf16.mxu1 %v15071_v28 }
 0x4ed   :  { %11423 = vmatpush3.bf16.msra.mxu0 %v15149_v33 }
 0x4ee   :  { %11390 = vmatpush3.bf16.msra.mxu1 %v15150_v62  ;;  %11424 = vmatprep.subr.bf16.mxu0 %v15071_v28  ;;  %v15155_v62 = vld [vmem:[#allocation45_spill] sm:$0xff] }
 0x4ef   :  { %11391 = vmatprep.subr.bf16.mxu1 %v15071_v28 }
 0x4f1   :  { %11426 = vmatpush3.bf16.msra.mxu0 %v15151_v39 }
 0x4f2   :  { %11393 = vmatpush3.bf16.msra.mxu1 %v15152_v21  ;;  %11451 = vmatprep.subr.bf16.mxu0 %v15071_v28 }
 0x4f3   :  { %11394 = vmatprep.subr.bf16.mxu1 %v15071_v28 }
 0x4f6   :  { %11396 = vmatpush3.bf16.msra.mxu1 %v15153_v44 }
 0x4f7   :  { %11397 = vmatprep.subr.bf16.mxu1 %v15071_v28 }
 0x4fa   :  { %11399 = vmatpush3.bf16.msra.mxu1 %v15154_v38 }
 0x4fb   :  { %11400 = vmatprep.subr.bf16.mxu1 %v15071_v28 }
 0x4fe   :  { %11402 = vmatpush3.bf16.msra.mxu1 %v15155_v62 }
 0x4ff   :  { %11427 = vmatprep.subr.bf16.mxu1 %v15071_v28 }
 0x527   :  { %v2368_v33 = vpop.f32.mrb[36].mxu0 }
 0x528   :  { %v8707_v39 = vpop.f32.mrb[37].mxu0 }
 0x547   :  { %v2515_v6 = vpop.f32.mrb[38].mxu0 }
 0x548   :  { %v8777_v21 = vpop.f32.mrb[39].mxu0 }
 0x549   :  { %v15156_v21 = vld [vmem:[#allocation71_spill] sm:$0xff] }
 0x554   :  { %v2438_v14 = vpop.f32.mrb[30].mxu1 }
 0x555   :  { %v2439_v34 = vadd.f32 %v2438_v14, %v2368_v33  ;;  %v8742_v11 = vpop.f32.mrb[31].mxu1 }
 0x557   :  { %v2442_v44 = vadd.f32 %v15115_v16, %v2439_v34 }
 0x559   :  { %v6435_v9 = vmul.f32 -1.442695, %v2442_v44 }
 0x55b   :  { %12522 = vpow2.f32 %v6435_v9 }
 0x565   :  { %v12523_v52 = vpop.eup %12522 }
 0x566   :  { %v2446_v56 = vadd.f32 1.0, %v12523_v52 }
 0x567   :  { %v2662_v49 = vpop.f32.mrb[40].mxu0 }
 0x568   :  { %v8847_v5 = vpop.f32.mrb[41].mxu0 }
 0x574   :  { %v2585_v23 = vpop.f32.mrb[32].mxu1 }
 0x575   :  { %v2586_v46 = vadd.f32 %v2585_v23, %v2515_v6  ;;  %v8812_v38 = vpop.f32.mrb[33].mxu1 }
 0x577   :  { %v2589_v62 = vadd.f32 %v15116_v47, %v2586_v46  ;;  %v2663_v47 = vadd.f32 %v13569_v40, %v2662_v49 }
 0x579   :  { %v6436_v17 = vmul.f32 -1.442695, %v2589_v62 }
 0x57b   :  { %12524 = vpow2.f32 %v6436_v17 }
 0x57c   :  { %12526 = vrcp.f32 %v2446_v56 }
 0x585   :  { %v12525_v5 = vpop.eup %12524 }
 0x586   :  { %v2593_v16 = vadd.f32 1.0, %v12525_v5  ;;  %v12527_v9 = vpop.eup %12526 }
 0x587   :  { %v2809_v39 = vpop.f32.mrb[42].mxu0 }
 0x588   :  { %v2813_v3 = vadd.f32 %v2809_v39, %v15156_v21  ;;  %v8917_v14 = vpop.f32.mrb[43].mxu0 }
 0x58a   :  { %v6437_v11 = vmul.f32 -1.442695, %v2813_v3 }
 0x58c   :  { %12528 = vpow2.f32 %v6437_v11 }
 0x58d   :  { %12530 = vrcp.f32 %v2593_v16 }
 0x594   :  { %v2732_v34 = vpop.f32.mrb[34].mxu1 }
 0x595   :  { %v2733_v23 = vadd.f32 %v13564_v54, %v2732_v34  ;;  %v8882_v6 = vpop.f32.mrb[35].mxu1  ;;  %v13946_v54 = vld [vmem:[%s14874_s3 + $0x3] ss:$0 sm:$0xff] }
 0x596   :  { %v12529_v17 = vpop.eup %12528  ;;  %v15158_v34 = vld [vmem:[#allocation73_spill] sm:$0xff] }
 0x597   :  { %v2736_v46 = vmul.f32 %v12527_v9, %v2733_v23  ;;  %v2817_v52 = vadd.f32 1.0, %v12529_v17  ;;  %v12531_v38 = vpop.eup %12530 }
 0x598   :  { %v2739_v3 = vsub.f32 1.0, %v12531_v38  ;;  %v2741_v62 = vmul.f32 %v12531_v38, %v13759_v25  ;;  %v15157_v25 = vld [vmem:[#allocation83_spill] sm:$0xff] }
 0x599   :  { %v2737_v33 = vadd.f32 %v2736_v46, %v2663_v47 }
 0x59b   :  { %12532 = vtanh.f32 %v2737_v33 }
 0x59c   :  { %12534 = vrcp.f32 %v2817_v52 }
 0x5a5   :  { %v12533_v56 = vpop.eup %12532 }
 0x5a6   :  { %v2740_v44 = vmul.f32 %v12533_v56, %v2739_v3  ;;  %v12535_v14 = vpop.eup %12534 }
 0x5a7   :  { %v2963_v39 = vpop.f32.mrb[44].mxu0 }
 0x5a8   :  { %v2964_v40 = vadd.f32 %v13946_v54, %v2963_v39  ;;  %v8987_v49 = vpop.f32.mrb[45].mxu0  ;;  %v13949_v21 = vadd.f32 %v2741_v62, %v2740_v44  ;;  %v15160_v44 = vld [vmem:[#allocation90_spill] sm:$0xff]  ;;  %v15161_v62 = vld [vmem:[#allocation25_spill] sm:$0xff]  ;;  %v15162_v39 = vld [vmem:[#allocation91_spill] sm:$0xff] }
 0x5a9   :  { %v15164_v49 = vld [vmem:[#allocation92_spill] sm:$0xff] }
 0x5aa   :  { %v2967_v11 = vmul.f32 %v12535_v14, %v2964_v40  ;;  %9021 = vmatmul.mubr.f32.vlgmr.msra.gmra.mrb[38].mxu1 %v13949_v21  ;;  %v15163_v40 = vld [vmem:[#allocation27_spill] sm:$0xff]  ;;  %v15165_v14 = vld [vmem:[#allocation29_spill] sm:$0xff] }
 0x5ab   :  { %11429 = vmatpush3.bf16.msra.mxu1 %v15079_v36  ;;  %9090 = vmatprep.mubr.msk.f32.mxu1 %vm12844_vm0, %v15072_v20 }
 0x5ac   :  { %v2968_v5 = vadd.f32 %v2967_v11, %v15157_v25  ;;  %11430 = vmatprep.subr.bf16.mxu1 %v15071_v28  ;;  %v15166_v11 = vld [vmem:[#allocation22_spill] sm:$0xff]  ;;  %v15167_v25 = vld [vmem:[#allocation31_spill] sm:$0xff] }
 0x5af   :  { %11432 = vmatpush3.bf16.msra.mxu1 %v15080_v22 }
 0x5b0   :  { %11433 = vmatprep.subr.bf16.mxu1 %v15071_v28 }
 0x5b3   :  { %11435 = vmatpush3.bf16.msra.mxu1 %v15081_v43 }
 0x5b4   :  { %v2886_v16 = vpop.f32.mrb[36].mxu1  ;;  %11436 = vmatprep.subr.bf16.mxu1 %v15071_v28 }
 0x5b5   :  { %v2890_v23 = vadd.f32 %v2886_v16, %v15158_v34  ;;  %v8952_v6 = vpop.f32.mrb[37].mxu1  ;;  %v15169_v16 = vld [vmem:[#allocation33_spill] sm:$0xff]  ;;  %v15170_v34 = vld [vmem:[#allocation26_spill] sm:$0xff] }
 0x5b6   :  { %v15172_v6 = vld [vmem:[#allocation28_spill] sm:$0xff] }
 0x5b7   :  { %v6438_v9 = vmul.f32 -1.442695, %v2890_v23  ;;  %11438 = vmatpush3.bf16.msra.mxu1 %v15083_v8  ;;  %v15171_v23 = vld [vmem:[#allocation35_spill] sm:$0xff] }
 0x5b8   :  { %11439 = vmatprep.subr.bf16.mxu1 %v15071_v28 }
 0x5b9   :  { %12536 = vpow2.f32 %v6438_v9  ;;  %v15173_v9 = vld [vmem:[#allocation37_spill] sm:$0xff] }
 0x5bb   :  { %11441 = vmatpush3.bf16.msra.mxu1 %v15084_v1 }
 0x5bc   :  { %11442 = vmatprep.subr.bf16.mxu1 %v15071_v28 }
 0x5bf   :  { %11444 = vmatpush3.bf16.msra.mxu1 %v15085_v42 }
 0x5c0   :  { %11445 = vmatprep.subr.bf16.mxu1 %v15071_v28 }
 0x5c3   :  { %v12537_v47 = vpop.eup %12536  ;;  %11447 = vmatpush3.bf16.msra.mxu1 %v15086_v4 }
 0x5c4   :  { %v2894_v46 = vadd.f32 1.0, %v12537_v47  ;;  %11448 = vmatprep.subr.bf16.mxu1 %v15071_v28  ;;  %v15174_v47 = vld [vmem:[#allocation30_spill] sm:$0xff] }
 0x5c6   :  { %12538 = vrcp.f32 %v2894_v46  ;;  %v15175_v46 = vld [vmem:[#allocation54_spill] sm:$0xff] }
 0x5c7   :  { %11450 = vmatpush3.bf16.msra.mxu1 %v15087_v61  ;;  %12540 = vtanh.f32 %v2968_v5  ;;  %v15168_v5 = vld [vmem:[#allocation24_spill] sm:$0xff] }
 0x5c8   :  { %11475 = vmatprep.subr.bf16.mxu1 %v15071_v28 }
 0x5ca   :  { %9091 = vmatmul.mubr.f32.vlgmr.msra.gmra.mrb[40].mxu1 %v13949_v21 }
 0x5cb   :  { %11477 = vmatpush3.bf16.msra.mxu1 %v15088_v58  ;;  %9160 = vmatprep.mubr.msk.f32.mxu1 %vm12844_vm0, %v15072_v20 }
 0x5cc   :  { %11478 = vmatprep.subr.bf16.mxu1 %v15071_v28 }
 0x5cf   :  { %11480 = vmatpush3.bf16.msra.mxu1 %v15089_v0 }
 0x5d0   :  { %v12539_v17 = vpop.eup %12538  ;;  %11481 = vmatprep.subr.bf16.mxu1 %v15071_v28 }
 0x5d1   :  { %v2970_v33 = vsub.f32 1.0, %v12539_v17  ;;  %v12541_v52 = vpop.eup %12540  ;;  %v2972_v3 = vmul.f32 %v12539_v17, %v13792_v30  ;;  %v15159_v30 = vld [vmem:[#allocation23_spill] sm:$0xff]  ;;  %v15176_v17 = vld [vmem:[#allocation32_spill] sm:$0xff] }
 0x5d3   :  { %v2971_v38 = vmul.f32 %v12541_v52, %v2970_v33  ;;  %11483 = vmatpush3.bf16.msra.mxu1 %v15090_v37  ;;  %v15177_v33 = vld [vmem:[#allocation56_spill] sm:$0xff]  ;;  %v15178_v52 = vld [vmem:[#allocation34_spill] sm:$0xff] }
 0x5d4   :  { %11484 = vmatprep.subr.bf16.mxu1 %v15071_v28 }
 0x5d5   :  { %v13982_v56 = vadd.f32 %v2972_v3, %v2971_v38  ;;  %v15179_v38 = vld [vmem:[#allocation58_spill] sm:$0xff]  ;;  %v15180_v3 = vld [vmem:[#allocation36_spill] sm:$0xff] }
 0x5d7   :  { %11486 = vmatpush3.bf16.msra.mxu1 %v15091_v50  ;;  %9056 = vmatmul.mubr.f32.vlgmr.msra.gmra.mrb[46].mxu0 %v13982_v56 }
 0x5d8   :  { %11453 = vmatpush3.bf16.msra.mxu0 %v13375_v12  ;;  %11487 = vmatprep.subr.bf16.mxu1 %v15071_v28 }
 0x5d9   :  { %11454 = vmatprep.subr.bf16.mxu0 %v15071_v28  ;;  %9125 = vmatprep.mubr.msk.f32.mxu0 %vm12844_vm0, %v15072_v20 }
 0x5db   :  { %11489 = vmatpush3.bf16.msra.mxu1 %v15092_v51 }
 0x5dc   :  { %11456 = vmatpush3.bf16.msra.mxu0 %v13383_v63  ;;  %11490 = vmatprep.subr.bf16.mxu1 %v15071_v28 }
 0x5dd   :  { %11457 = vmatprep.subr.bf16.mxu0 %v15071_v28 }
 0x5df   :  { %11492 = vmatpush3.bf16.msra.mxu1 %v15093_v7 }
 0x5e0   :  { %11459 = vmatpush3.bf16.msra.mxu0 %v13393_v48  ;;  %11493 = vmatprep.subr.bf16.mxu1 %v15071_v28 }
 0x5e1   :  { %11460 = vmatprep.subr.bf16.mxu0 %v15071_v28 }
 0x5e3   :  { %11495 = vmatpush3.bf16.msra.mxu1 %v15094_v19 }
 0x5e4   :  { %11462 = vmatpush3.bf16.msra.mxu0 %v13399_v35  ;;  %11496 = vmatprep.subr.bf16.mxu1 %v15071_v28 }
 0x5e5   :  { %11463 = vmatprep.subr.bf16.mxu0 %v15071_v28 }
 0x5e7   :  { %11498 = vmatpush3.bf16.msra.mxu1 %v15095_v53 }
 0x5e8   :  { %11465 = vmatpush3.bf16.msra.mxu0 %v13405_v60  ;;  %11523 = vmatprep.subr.bf16.mxu1 %v15071_v28 }
 0x5e9   :  { %11466 = vmatprep.subr.bf16.mxu0 %v15071_v28 }
 0x5ea   :  { %9161 = vmatmul.mubr.f32.vlgmr.msra.gmra.mrb[42].mxu1 %v13982_v56 }
 0x5eb   :  { %11525 = vmatpush3.bf16.msra.mxu1 %v13039_v57  ;;  %9230 = vmatprep.mubr.msk.f32.mxu1 %vm12844_vm0, %v15072_v20 }
 0x5ec   :  { %11468 = vmatpush3.bf16.msra.mxu0 %v13411_v45  ;;  %11526 = vmatprep.subr.bf16.mxu1 %v15071_v28 }
 0x5ed   :  { %11469 = vmatprep.subr.bf16.mxu0 %v15071_v28 }
 0x5ef   :  { %11528 = vmatpush3.bf16.msra.mxu1 %v13049_v2 }
 0x5f0   :  { %11471 = vmatpush3.bf16.msra.mxu0 %v13419_v15  ;;  %11529 = vmatprep.subr.bf16.mxu1 %v15071_v28 }
 0x5f1   :  { %11472 = vmatprep.subr.bf16.mxu0 %v15071_v28 }
 0x5f3   :  { %11531 = vmatpush3.bf16.msra.mxu1 %v13061_v10 }
 0x5f4   :  { %11474 = vmatpush3.bf16.msra.mxu0 %v13425_v13  ;;  %11532 = vmatprep.subr.bf16.mxu1 %v15071_v28 }
 0x5f5   :  { %11499 = vmatprep.subr.bf16.mxu0 %v15071_v28 }
 0x5f7   :  { %9126 = vmatmul.mubr.f32.vlgmr.msra.gmra.mrb[48].mxu0 %v13982_v56  ;;  %11534 = vmatpush3.bf16.msra.mxu1 %v13073_v18 }
 0x5f8   :  { %11501 = vmatpush3.bf16.msra.mxu0 %v13431_v55  ;;  %11535 = vmatprep.subr.bf16.mxu1 %v15071_v28 }
 0x5f9   :  { %11502 = vmatprep.subr.bf16.mxu0 %v15071_v28  ;;  %9195 = vmatprep.mubr.msk.f32.mxu0 %vm12844_vm0, %v15072_v20 }
 0x5fb   :  { %11537 = vmatpush3.bf16.msra.mxu1 %v13081_v24 }
 0x5fc   :  { %11504 = vmatpush3.bf16.msra.mxu0 %v13439_v27  ;;  %11538 = vmatprep.subr.bf16.mxu1 %v15071_v28 }
 0x5fd   :  { %11505 = vmatprep.subr.bf16.mxu0 %v15071_v28 }
 0x5ff   :  { %11540 = vmatpush3.bf16.msra.mxu1 %v13088_v32 }
 0x600   :  { %11507 = vmatpush3.bf16.msra.mxu0 %v13449_v31  ;;  %11541 = vmatprep.subr.bf16.mxu1 %v15071_v28 }
 0x601   :  { %11508 = vmatprep.subr.bf16.mxu0 %v15071_v28 }
 0x603   :  { %11543 = vmatpush3.bf16.msra.mxu1 %v13092_v26 }
 0x604   :  { %11510 = vmatpush3.bf16.msra.mxu0 %v13455_v29  ;;  %11544 = vmatprep.subr.bf16.mxu1 %v15071_v28 }
 0x605   :  { %11511 = vmatprep.subr.bf16.mxu0 %v15071_v28 }
 0x607   :  { %11546 = vmatpush3.bf16.msra.mxu1 %v13096_v41 }
 0x608   :  { %11513 = vmatpush3.bf16.msra.mxu0 %v15120_v59  ;;  %11571 = vmatprep.subr.bf16.mxu1 %v15071_v28 }
 0x609   :  { %11514 = vmatprep.subr.bf16.mxu0 %v15071_v28 }
 0x60a   :  { %9231 = vmatmul.mubr.f32.vlgmr.msra.gmra.mrb[44].mxu1 %v13982_v56 }
 0x60b   :  { %11573 = vmatpush3.bf16.msra.mxu1 %v15159_v30  ;;  %9300 = vmatprep.mubr.msk.f32.mxu1 %vm12844_vm0, %v15072_v20 }
 0x60c   :  { %11516 = vmatpush3.bf16.msra.mxu0 %v15160_v44  ;;  %11574 = vmatprep.subr.bf16.mxu1 %v15071_v28 }
 0x60d   :  { %11517 = vmatprep.subr.bf16.mxu0 %v15071_v28 }
 0x60f   :  { %11576 = vmatpush3.bf16.msra.mxu1 %v15161_v62 }
 0x610   :  { %11519 = vmatpush3.bf16.msra.mxu0 %v15162_v39  ;;  %11577 = vmatprep.subr.bf16.mxu1 %v15071_v28 }
 0x611   :  { %11520 = vmatprep.subr.bf16.mxu0 %v15071_v28 }
 0x613   :  { %11579 = vmatpush3.bf16.msra.mxu1 %v15163_v40 }
 0x614   :  { %11522 = vmatpush3.bf16.msra.mxu0 %v15164_v49  ;;  %11580 = vmatprep.subr.bf16.mxu1 %v15071_v28 }
 0x615   :  { %11547 = vmatprep.subr.bf16.mxu0 %v15071_v28 }
 0x617   :  { %9196 = vmatmul.mubr.f32.vlgmr.msra.gmra.mrb[50].mxu0 %v13949_v21  ;;  %11582 = vmatpush3.bf16.msra.mxu1 %v15165_v14  ;;  %v15196_v14 = vld [vmem:[#allocation76_spill] sm:$0xff] }
 0x618   :  { %11549 = vmatpush3.bf16.msra.mxu0 %v15166_v11  ;;  %11583 = vmatprep.subr.bf16.mxu1 %v15071_v28 }
 0x619   :  { %11550 = vmatprep.subr.bf16.mxu0 %v15071_v28  ;;  %9265 = vmatprep.mubr.msk.f32.mxu0 %vm12844_vm0, %v15072_v20 }
 0x61b   :  { %11585 = vmatpush3.bf16.msra.mxu1 %v15167_v25 }
 0x61c   :  { %11552 = vmatpush3.bf16.msra.mxu0 %v15168_v5  ;;  %11586 = vmatprep.subr.bf16.mxu1 %v15071_v28 }
 0x61d   :  { %11553 = vmatprep.subr.bf16.mxu0 %v15071_v28 }
 0x61f   :  { %11588 = vmatpush3.bf16.msra.mxu1 %v15169_v16 }
 0x620   :  { %11555 = vmatpush3.bf16.msra.mxu0 %v15170_v34  ;;  %11589 = vmatprep.subr.bf16.mxu1 %v15071_v28 }
 0x621   :  { %11556 = vmatprep.subr.bf16.mxu0 %v15071_v28 }
 0x623   :  { %11591 = vmatpush3.bf16.msra.mxu1 %v15171_v23 }
 0x624   :  { %11558 = vmatpush3.bf16.msra.mxu0 %v15172_v6  ;;  %11592 = vmatprep.subr.bf16.mxu1 %v15071_v28 }
 0x625   :  { %11559 = vmatprep.subr.bf16.mxu0 %v15071_v28 }
 0x627   :  { %11594 = vmatpush3.bf16.msra.mxu1 %v15173_v9 }
 0x628   :  { %11561 = vmatpush3.bf16.msra.mxu0 %v15174_v47  ;;  %11619 = vmatprep.subr.bf16.mxu1 %v15071_v28 }
 0x629   :  { %11562 = vmatprep.subr.bf16.mxu0 %v15071_v28 }
 0x62a   :  { %9301 = vmatmul.mubr.f32.vlgmr.msra.gmra.mrb[46].mxu1 %v13982_v56 }
 0x62b   :  { %11621 = vmatpush3.bf16.msra.mxu1 %v15175_v46  ;;  %9370 = vmatprep.mubr.msk.f32.mxu1 %vm12844_vm0, %v15072_v20  ;;  %v15182_v46 = vld [vmem:[#allocation38_spill] sm:$0xff] }
 0x62c   :  { %11564 = vmatpush3.bf16.msra.mxu0 %v15176_v17  ;;  %11622 = vmatprep.subr.bf16.mxu1 %v15071_v28  ;;  %v15181_v17 = vld [vmem:[#allocation60_spill] sm:$0xff] }
 0x62d   :  { %11565 = vmatprep.subr.bf16.mxu0 %v15071_v28 }
 0x62f   :  { %11624 = vmatpush3.bf16.msra.mxu1 %v15177_v33  ;;  %v15188_v33 = vld [vmem:[#allocation41_spill] sm:$0xff] }
 0x630   :  { %11567 = vmatpush3.bf16.msra.mxu0 %v15178_v52  ;;  %11625 = vmatprep.subr.bf16.mxu1 %v15071_v28  ;;  %v15185_v52 = vld [vmem:[#allocation64_spill] sm:$0xff] }
 0x631   :  { %11568 = vmatprep.subr.bf16.mxu0 %v15071_v28 }
 0x633   :  { %11627 = vmatpush3.bf16.msra.mxu1 %v15179_v38  ;;  %v15183_v38 = vld [vmem:[#allocation62_spill] sm:$0xff] }
 0x634   :  { %11570 = vmatpush3.bf16.msra.mxu0 %v15180_v3  ;;  %11628 = vmatprep.subr.bf16.mxu1 %v15071_v28  ;;  %v15184_v3 = vld [vmem:[#allocation39_spill] sm:$0xff] }
 0x635   :  { %11595 = vmatprep.subr.bf16.mxu0 %v15071_v28 }
 0x637   :  { %9266 = vmatmul.mubr.f32.vlgmr.msra.gmra.mrb[52].mxu0 %v13982_v56  ;;  %11630 = vmatpush3.bf16.msra.mxu1 %v15181_v17  ;;  %v15186_v17 = vld [vmem:[#allocation40_spill] sm:$0xff] }
 0x638   :  { %11597 = vmatpush3.bf16.msra.mxu0 %v15182_v46  ;;  %9335 = vmatprep.mubr.msk.f32.mxu0 %vm12844_vm0, %v15072_v20  ;;  %v15187_v46 = vld [vmem:[#allocation66_spill] sm:$0xff] }
 0x639   :  { %11598 = vmatprep.subr.bf16.mxu0 %v15071_v28  ;;  %11631 = vmatprep.subr.bf16.mxu1 %v15071_v28 }
 0x63b   :  { %11633 = vmatpush3.bf16.msra.mxu1 %v15183_v38  ;;  %v15190_v38 = vld [vmem:[#allocation42_spill] sm:$0xff] }
 0x63c   :  { %11600 = vmatpush3.bf16.msra.mxu0 %v15184_v3  ;;  %11634 = vmatprep.subr.bf16.mxu1 %v15071_v28  ;;  %v15189_v3 = vld [vmem:[#allocation68_spill] sm:$0xff] }
 0x63d   :  { %11601 = vmatprep.subr.bf16.mxu0 %v15071_v28 }
 0x63f   :  { %11636 = vmatpush3.bf16.msra.mxu1 %v15185_v52  ;;  %v15192_v52 = vld [vmem:[#allocation44_spill] sm:$0xff] }
 0x640   :  { %11603 = vmatpush3.bf16.msra.mxu0 %v15186_v17  ;;  %11637 = vmatprep.subr.bf16.mxu1 %v15071_v28  ;;  %v15191_v17 = vld [vmem:[#allocation43_spill] sm:$0xff] }
 0x641   :  { %11604 = vmatprep.subr.bf16.mxu0 %v15071_v28 }
 0x643   :  { %11639 = vmatpush3.bf16.msra.mxu1 %v15187_v46 }
 0x644   :  { %11606 = vmatpush3.bf16.msra.mxu0 %v15188_v33  ;;  %11640 = vmatprep.subr.bf16.mxu1 %v15071_v28  ;;  %v15193_v33 = vld [vmem:[#allocation45_spill] sm:$0xff] }
 0x645   :  { %11607 = vmatprep.subr.bf16.mxu0 %v15071_v28 }
 0x647   :  { %11642 = vmatpush3.bf16.msra.mxu1 %v15189_v3 }
 0x648   :  { %11609 = vmatpush3.bf16.msra.mxu0 %v15190_v38  ;;  %11667 = vmatprep.subr.bf16.mxu1 %v15071_v28 }
 0x649   :  { %11610 = vmatprep.subr.bf16.mxu0 %v15071_v28 }
 0x64c   :  { %11612 = vmatpush3.bf16.msra.mxu0 %v15191_v17  ;;  %v14130_v17 = vld [vmem:[%s14877_s6] ss:$0 sm:$0xff] }
 0x64d   :  { %11613 = vmatprep.subr.bf16.mxu0 %v15071_v28  ;;  %15194 = vst [vmem:[#allocation46_spill] sm:$0xff] %v14130_v17 }
 0x650   :  { %11615 = vmatpush3.bf16.msra.mxu0 %v15192_v52 }
 0x651   :  { %11616 = vmatprep.subr.bf16.mxu0 %v15071_v28 }
 0x654   :  { %11618 = vmatpush3.bf16.msra.mxu0 %v15193_v33 }
 0x655   :  { %11643 = vmatprep.subr.bf16.mxu0 %v15071_v28 }
 0x67d   :  { %v3040_v46 = vpop.f32.mrb[38].mxu1 }
 0x67e   :  { %v9022_v3 = vpop.f32.mrb[39].mxu1 }
 0x69d   :  { %v3187_v47 = vpop.f32.mrb[40].mxu1 }
 0x69e   :  { %v9092_v38 = vpop.f32.mrb[41].mxu1 }
 0x69f   :  { %v14136_v38 = vld [vmem:[%s14877_s6 + $0x1] ss:$0 sm:$0xff] }
 0x6a0   :  { %15195 = vst [vmem:[#allocation47_spill] sm:$0xff] %v14136_v38 }
 0x6aa   :  { %v3110_v9 = vpop.f32.mrb[46].mxu0 }
 0x6ab   :  { %v3111_v6 = vadd.f32 %v3110_v9, %v3040_v46  ;;  %v9057_v23 = vpop.f32.mrb[47].mxu0 }
 0x6ad   :  { %v3114_v52 = vadd.f32 %v14130_v17, %v3111_v6 }
 0x6af   :  { %v6439_v11 = vmul.f32 -1.442695, %v3114_v52 }
 0x6b1   :  { %12542 = vpow2.f32 %v6439_v11 }
 0x6bb   :  { %v12543_v9 = vpop.eup %12542 }
 0x6bc   :  { %v3118_v3 = vadd.f32 1.0, %v12543_v9 }
 0x6bd   :  { %v3334_v34 = vpop.f32.mrb[42].mxu1 }
 0x6be   :  { %v9162_v16 = vpop.f32.mrb[43].mxu1 }
 0x6ca   :  { %v3257_v5 = vpop.f32.mrb[48].mxu0 }
 0x6cb   :  { %v3258_v33 = vadd.f32 %v3257_v5, %v3187_v47  ;;  %v9127_v25 = vpop.f32.mrb[49].mxu0  ;;  %v14143_v47 = vld [vmem:[%s14877_s6 + $0x3] ss:$0 sm:$0xff] }
 0x6cc   :  { %15197 = vst [vmem:[#allocation48_spill] sm:$0xff] %v14143_v47 }
 0x6cd   :  { %v3261_v23 = vadd.f32 %v14136_v38, %v3258_v33 }
 0x6cf   :  { %v6440_v16 = vmul.f32 -1.442695, %v3261_v23 }
 0x6d1   :  { %12544 = vpow2.f32 %v6440_v16 }
 0x6d2   :  { %12546 = vrcp.f32 %v3118_v3 }
 0x6db   :  { %v12545_v25 = vpop.eup %12544 }
 0x6dc   :  { %v3265_v11 = vadd.f32 1.0, %v12545_v25  ;;  %v12547_v23 = vpop.eup %12546 }
 0x6dd   :  { %v3481_v46 = vpop.f32.mrb[44].mxu1 }
 0x6de   :  { %v3485_v49 = vadd.f32 %v3481_v46, %v15196_v14  ;;  %v9232_v6 = vpop.f32.mrb[45].mxu1  ;;  %v14149_v14 = vld [vmem:[%s14877_s6 + $0x2] ss:$0 sm:$0xff] }
 0x6e0   :  { %v6441_v17 = vmul.f32 -1.442695, %v3485_v49  ;;  %v3335_v49 = vadd.f32 %v14149_v14, %v3334_v34 }
 0x6e2   :  { %12548 = vpow2.f32 %v6441_v17 }
 0x6e3   :  { %12550 = vrcp.f32 %v3265_v11 }
 0x6ea   :  { %v3404_v5 = vpop.f32.mrb[50].mxu0 }
 0x6eb   :  { %v3405_v33 = vadd.f32 %v14143_v47, %v3404_v5  ;;  %v9197_v52 = vpop.f32.mrb[51].mxu0 }
 0x6ec   :  { %v12549_v16 = vpop.eup %12548 }
 0x6ed   :  { %v3408_v17 = vmul.f32 %v12547_v23, %v3405_v33  ;;  %v3489_v46 = vadd.f32 1.0, %v12549_v16  ;;  %v12551_v3 = vpop.eup %12550  ;;  %v15198_v33 = vld [vmem:[#allocation86_spill] sm:$0xff] }
 0x6ee   :  { %v3411_v6 = vsub.f32 1.0, %v12551_v3  ;;  %v3413_v52 = vmul.f32 %v12551_v3, %v13949_v21 }
 0x6ef   :  { %v3409_v9 = vadd.f32 %v3408_v17, %v3335_v49 }
 0x6f1   :  { %12552 = vtanh.f32 %v3409_v9 }
 0x6f2   :  { %12554 = vrcp.f32 %v3489_v46 }
 0x6fb   :  { %v12553_v25 = vpop.eup %12552 }
 0x6fc   :  { %v3412_v5 = vmul.f32 %v12553_v25, %v3411_v6  ;;  %v12555_v34 = vpop.eup %12554 }
 0x6fd   :  { %v3635_v47 = vpop.f32.mrb[46].mxu1 }
 0x6fe   :  { %v3636_v38 = vadd.f32 %v13946_v54, %v3635_v47  ;;  %v9302_v40 = vpop.f32.mrb[47].mxu1  ;;  %v14154_v39 = vadd.f32 %v3413_v52, %v3412_v5  ;;  %v15201_v52 = vld [vmem:[#allocation27_spill] sm:$0xff] }
 0x6ff   :  { %v15199_v40 = vld [vmem:[#allocation78_spill] sm:$0xff] }
 0x700   :  { %v3639_v11 = vmul.f32 %v12555_v34, %v3636_v38  ;;  %9336 = vmatmul.mubr.f32.vlgmr.msra.gmra.mrb[54].mxu0 %v14154_v39  ;;  %v15202_v34 = vld [vmem:[#allocation92_spill] sm:$0xff] }
 0x701   :  { %11645 = vmatpush3.bf16.msra.mxu0 %v15079_v36  ;;  %9405 = vmatprep.mubr.msk.f32.mxu0 %vm12844_vm0, %v15072_v20 }
 0x702   :  { %v3640_v23 = vadd.f32 %v3639_v11, %v15198_v33  ;;  %11646 = vmatprep.subr.bf16.mxu0 %v15071_v28  ;;  %v15203_v11 = vld [vmem:[#allocation29_spill] sm:$0xff]  ;;  %v15204_v33 = vld [vmem:[#allocation22_spill] sm:$0xff] }
 0x705   :  { %11648 = vmatpush3.bf16.msra.mxu0 %v15080_v22 }
 0x706   :  { %11649 = vmatprep.subr.bf16.mxu0 %v15071_v28 }
 0x709   :  { %11651 = vmatpush3.bf16.msra.mxu0 %v15081_v43 }
 0x70a   :  { %v3558_v21 = vpop.f32.mrb[52].mxu0  ;;  %11652 = vmatprep.subr.bf16.mxu0 %v15071_v28 }
 0x70b   :  { %v3562_v38 = vadd.f32 %v3558_v21, %v15199_v40  ;;  %v9267_v47 = vpop.f32.mrb[53].mxu0  ;;  %v15206_v21 = vld [vmem:[#allocation24_spill] sm:$0xff]  ;;  %v15207_v40 = vld [vmem:[#allocation33_spill] sm:$0xff] }
 0x70c   :  { %v15209_v47 = vld [vmem:[#allocation35_spill] sm:$0xff] }
 0x70d   :  { %v6442_v49 = vmul.f32 -1.442695, %v3562_v38  ;;  %11654 = vmatpush3.bf16.msra.mxu0 %v15083_v8  ;;  %v15208_v38 = vld [vmem:[#allocation26_spill] sm:$0xff] }
 0x70e   :  { %11655 = vmatprep.subr.bf16.mxu0 %v15071_v28 }
 0x70f   :  { %12556 = vpow2.f32 %v6442_v49  ;;  %v15210_v49 = vld [vmem:[#allocation28_spill] sm:$0xff] }
 0x711   :  { %11657 = vmatpush3.bf16.msra.mxu0 %v15084_v1 }
 0x712   :  { %11658 = vmatprep.subr.bf16.mxu0 %v15071_v28 }
 0x715   :  { %11660 = vmatpush3.bf16.msra.mxu0 %v15085_v42 }
 0x716   :  { %11661 = vmatprep.subr.bf16.mxu0 %v15071_v28 }
 0x719   :  { %v12557_v17 = vpop.eup %12556  ;;  %11663 = vmatpush3.bf16.msra.mxu0 %v15086_v4 }
 0x71a   :  { %v3566_v16 = vadd.f32 1.0, %v12557_v17  ;;  %11664 = vmatprep.subr.bf16.mxu0 %v15071_v28  ;;  %v15211_v17 = vld [vmem:[#allocation37_spill] sm:$0xff] }
 0x71c   :  { %12558 = vrcp.f32 %v3566_v16  ;;  %v15212_v16 = vld [vmem:[#allocation30_spill] sm:$0xff] }
 0x71d   :  { %11666 = vmatpush3.bf16.msra.mxu0 %v15087_v61  ;;  %12560 = vtanh.f32 %v3640_v23  ;;  %v15205_v23 = vld [vmem:[#allocation31_spill] sm:$0xff] }
 0x71e   :  { %11691 = vmatprep.subr.bf16.mxu0 %v15071_v28 }
 0x720   :  { %9406 = vmatmul.mubr.f32.vlgmr.msra.gmra.mrb[56].mxu0 %v14154_v39 }
 0x721   :  { %11693 = vmatpush3.bf16.msra.mxu0 %v15088_v58  ;;  %9475 = vmatprep.mubr.msk.f32.mxu0 %vm12844_vm0, %v15072_v20 }
 0x722   :  { %11694 = vmatprep.subr.bf16.mxu0 %v15071_v28 }
 0x725   :  { %11696 = vmatpush3.bf16.msra.mxu0 %v15089_v0 }
 0x726   :  { %v12559_v9 = vpop.eup %12558  ;;  %11697 = vmatprep.subr.bf16.mxu0 %v15071_v28 }
 0x727   :  { %v3642_v46 = vsub.f32 1.0, %v12559_v9  ;;  %v12561_v3 = vpop.eup %12560  ;;  %v3644_v25 = vmul.f32 %v12559_v9, %v13982_v56  ;;  %v15200_v56 = vld [vmem:[#allocation91_spill] sm:$0xff]  ;;  %v15213_v9 = vld [vmem:[#allocation54_spill] sm:$0xff] }
 0x729   :  { %v3643_v6 = vmul.f32 %v12561_v3, %v3642_v46  ;;  %11699 = vmatpush3.bf16.msra.mxu0 %v15090_v37  ;;  %v15214_v46 = vld [vmem:[#allocation32_spill] sm:$0xff] }
 0x72a   :  { %11700 = vmatprep.subr.bf16.mxu0 %v15071_v28  ;;  %v15215_v3 = vld [vmem:[#allocation56_spill] sm:$0xff] }
 0x72b   :  { %v14187_v5 = vadd.f32 %v3644_v25, %v3643_v6  ;;  %v15216_v6 = vld [vmem:[#allocation34_spill] sm:$0xff] }
 0x72c   :  { %v15217_v25 = vld [vmem:[#allocation58_spill] sm:$0xff] }
 0x72d   :  { %11702 = vmatpush3.bf16.msra.mxu0 %v15091_v50  ;;  %9371 = vmatmul.mubr.f32.vlgmr.msra.gmra.mrb[48].mxu1 %v14187_v5 }
 0x72e   :  { %11669 = vmatpush3.bf16.msra.mxu1 %v13375_v12  ;;  %11703 = vmatprep.subr.bf16.mxu0 %v15071_v28 }
 0x72f   :  { %11670 = vmatprep.subr.bf16.mxu1 %v15071_v28  ;;  %9440 = vmatprep.mubr.msk.f32.mxu1 %vm12844_vm0, %v15072_v20 }
 0x731   :  { %11705 = vmatpush3.bf16.msra.mxu0 %v15092_v51 }
 0x732   :  { %11672 = vmatpush3.bf16.msra.mxu1 %v13383_v63  ;;  %11706 = vmatprep.subr.bf16.mxu0 %v15071_v28 }
 0x733   :  { %11673 = vmatprep.subr.bf16.mxu1 %v15071_v28 }
 0x735   :  { %11708 = vmatpush3.bf16.msra.mxu0 %v15093_v7 }
 0x736   :  { %11675 = vmatpush3.bf16.msra.mxu1 %v13393_v48  ;;  %11709 = vmatprep.subr.bf16.mxu0 %v15071_v28 }
 0x737   :  { %11676 = vmatprep.subr.bf16.mxu1 %v15071_v28 }
 0x739   :  { %11711 = vmatpush3.bf16.msra.mxu0 %v15094_v19 }
 0x73a   :  { %11678 = vmatpush3.bf16.msra.mxu1 %v13399_v35  ;;  %11712 = vmatprep.subr.bf16.mxu0 %v15071_v28 }
 0x73b   :  { %11679 = vmatprep.subr.bf16.mxu1 %v15071_v28 }
 0x73d   :  { %11714 = vmatpush3.bf16.msra.mxu0 %v15095_v53 }
 0x73e   :  { %11681 = vmatpush3.bf16.msra.mxu1 %v13405_v60  ;;  %11739 = vmatprep.subr.bf16.mxu0 %v15071_v28 }
 0x73f   :  { %11682 = vmatprep.subr.bf16.mxu1 %v15071_v28 }
 0x740   :  { %9476 = vmatmul.mubr.f32.vlgmr.msra.gmra.mrb[58].mxu0 %v14187_v5 }
 0x741   :  { %11741 = vmatpush3.bf16.msra.mxu0 %v13039_v57  ;;  %9545 = vmatprep.mubr.msk.f32.mxu0 %vm12844_vm0, %v15072_v20 }
 0x742   :  { %11684 = vmatpush3.bf16.msra.mxu1 %v13411_v45  ;;  %11742 = vmatprep.subr.bf16.mxu0 %v15071_v28 }
 0x743   :  { %11685 = vmatprep.subr.bf16.mxu1 %v15071_v28 }
 0x745   :  { %11744 = vmatpush3.bf16.msra.mxu0 %v13049_v2 }
 0x746   :  { %11687 = vmatpush3.bf16.msra.mxu1 %v13419_v15  ;;  %11745 = vmatprep.subr.bf16.mxu0 %v15071_v28 }
 0x747   :  { %11688 = vmatprep.subr.bf16.mxu1 %v15071_v28 }
 0x749   :  { %11747 = vmatpush3.bf16.msra.mxu0 %v13061_v10 }
 0x74a   :  { %11690 = vmatpush3.bf16.msra.mxu1 %v13425_v13  ;;  %11748 = vmatprep.subr.bf16.mxu0 %v15071_v28 }
 0x74b   :  { %11715 = vmatprep.subr.bf16.mxu1 %v15071_v28 }
 0x74d   :  { %9441 = vmatmul.mubr.f32.vlgmr.msra.gmra.mrb[50].mxu1 %v14187_v5  ;;  %11750 = vmatpush3.bf16.msra.mxu0 %v13073_v18 }
 0x74e   :  { %11717 = vmatpush3.bf16.msra.mxu1 %v13431_v55  ;;  %11751 = vmatprep.subr.bf16.mxu0 %v15071_v28 }
 0x74f   :  { %11718 = vmatprep.subr.bf16.mxu1 %v15071_v28  ;;  %9510 = vmatprep.mubr.msk.f32.mxu1 %vm12844_vm0, %v15072_v20 }
 0x751   :  { %11753 = vmatpush3.bf16.msra.mxu0 %v13081_v24 }
 0x752   :  { %11720 = vmatpush3.bf16.msra.mxu1 %v13439_v27  ;;  %11754 = vmatprep.subr.bf16.mxu0 %v15071_v28 }
 0x753   :  { %11721 = vmatprep.subr.bf16.mxu1 %v15071_v28 }
 0x755   :  { %11756 = vmatpush3.bf16.msra.mxu0 %v13088_v32 }
 0x756   :  { %11723 = vmatpush3.bf16.msra.mxu1 %v13449_v31  ;;  %11757 = vmatprep.subr.bf16.mxu0 %v15071_v28 }
 0x757   :  { %11724 = vmatprep.subr.bf16.mxu1 %v15071_v28 }
 0x759   :  { %11759 = vmatpush3.bf16.msra.mxu0 %v13092_v26 }
 0x75a   :  { %11726 = vmatpush3.bf16.msra.mxu1 %v13455_v29  ;;  %11760 = vmatprep.subr.bf16.mxu0 %v15071_v28 }
 0x75b   :  { %11727 = vmatprep.subr.bf16.mxu1 %v15071_v28 }
 0x75d   :  { %11762 = vmatpush3.bf16.msra.mxu0 %v13096_v41 }
 0x75e   :  { %11729 = vmatpush3.bf16.msra.mxu1 %v15120_v59  ;;  %11787 = vmatprep.subr.bf16.mxu0 %v15071_v28 }
 0x75f   :  { %11730 = vmatprep.subr.bf16.mxu1 %v15071_v28 }
 0x760   :  { %9546 = vmatmul.mubr.f32.vlgmr.msra.gmra.mrb[60].mxu0 %v14187_v5 }
 0x761   :  { %11789 = vmatpush3.bf16.msra.mxu0 %v15159_v30  ;;  %9615 = vmatprep.mubr.msk.f32.mxu0 %vm12844_vm0, %v15072_v20 }
 0x762   :  { %11732 = vmatpush3.bf16.msra.mxu1 %v15160_v44  ;;  %11790 = vmatprep.subr.bf16.mxu0 %v15071_v28 }
 0x763   :  { %11733 = vmatprep.subr.bf16.mxu1 %v15071_v28 }
 0x765   :  { %11792 = vmatpush3.bf16.msra.mxu0 %v15161_v62 }
 0x766   :  { %11735 = vmatpush3.bf16.msra.mxu1 %v15200_v56  ;;  %11793 = vmatprep.subr.bf16.mxu0 %v15071_v28 }
 0x767   :  { %11736 = vmatprep.subr.bf16.mxu1 %v15071_v28 }
 0x769   :  { %11795 = vmatpush3.bf16.msra.mxu0 %v15201_v52  ;;  %v15233_v52 = vld [vmem:[#allocation47_spill] sm:$0xff] }
 0x76a   :  { %11738 = vmatpush3.bf16.msra.mxu1 %v15202_v34  ;;  %11796 = vmatprep.subr.bf16.mxu0 %v15071_v28 }
 0x76b   :  { %11763 = vmatprep.subr.bf16.mxu1 %v15071_v28 }
 0x76d   :  { %9511 = vmatmul.mubr.f32.vlgmr.msra.gmra.mrb[52].mxu1 %v14154_v39  ;;  %11798 = vmatpush3.bf16.msra.mxu0 %v15203_v11 }
 0x76e   :  { %11765 = vmatpush3.bf16.msra.mxu1 %v15204_v33  ;;  %11799 = vmatprep.subr.bf16.mxu0 %v15071_v28 }
 0x76f   :  { %11766 = vmatprep.subr.bf16.mxu1 %v15071_v28  ;;  %9580 = vmatprep.mubr.msk.f32.mxu1 %vm12844_vm0, %v15072_v20 }
 0x771   :  { %11801 = vmatpush3.bf16.msra.mxu0 %v15205_v23 }
 0x772   :  { %11768 = vmatpush3.bf16.msra.mxu1 %v15206_v21  ;;  %11802 = vmatprep.subr.bf16.mxu0 %v15071_v28 }
 0x773   :  { %11769 = vmatprep.subr.bf16.mxu1 %v15071_v28 }
 0x775   :  { %11804 = vmatpush3.bf16.msra.mxu0 %v15207_v40 }
 0x776   :  { %11771 = vmatpush3.bf16.msra.mxu1 %v15208_v38  ;;  %11805 = vmatprep.subr.bf16.mxu0 %v15071_v28 }
 0x777   :  { %11772 = vmatprep.subr.bf16.mxu1 %v15071_v28 }
 0x779   :  { %11807 = vmatpush3.bf16.msra.mxu0 %v15209_v47 }
 0x77a   :  { %11774 = vmatpush3.bf16.msra.mxu1 %v15210_v49  ;;  %11808 = vmatprep.subr.bf16.mxu0 %v15071_v28 }
 0x77b   :  { %11775 = vmatprep.subr.bf16.mxu1 %v15071_v28 }
 0x77d   :  { %11810 = vmatpush3.bf16.msra.mxu0 %v15211_v17 }
 0x77e   :  { %11777 = vmatpush3.bf16.msra.mxu1 %v15212_v16  ;;  %11835 = vmatprep.subr.bf16.mxu0 %v15071_v28  ;;  %v15220_v16 = vld [vmem:[#allocation38_spill] sm:$0xff] }
 0x77f   :  { %11778 = vmatprep.subr.bf16.mxu1 %v15071_v28 }
 0x780   :  { %9616 = vmatmul.mubr.f32.vlgmr.msra.gmra.mrb[62].mxu0 %v14187_v5 }
 0x781   :  { %11837 = vmatpush3.bf16.msra.mxu0 %v15213_v9  ;;  %9685 = vmatprep.mubr.msk.f32.mxu0 %vm12844_vm0, %v15072_v20  ;;  %v15218_v9 = vld [vmem:[#allocation36_spill] sm:$0xff] }
 0x782   :  { %11780 = vmatpush3.bf16.msra.mxu1 %v15214_v46  ;;  %11838 = vmatprep.subr.bf16.mxu0 %v15071_v28  ;;  %v15219_v46 = vld [vmem:[#allocation60_spill] sm:$0xff] }
 0x783   :  { %11781 = vmatprep.subr.bf16.mxu1 %v15071_v28 }
 0x785   :  { %11840 = vmatpush3.bf16.msra.mxu0 %v15215_v3  ;;  %v15226_v3 = vld [vmem:[#allocation41_spill] sm:$0xff] }
 0x786   :  { %11783 = vmatpush3.bf16.msra.mxu1 %v15216_v6  ;;  %11841 = vmatprep.subr.bf16.mxu0 %v15071_v28  ;;  %v15223_v6 = vld [vmem:[#allocation64_spill] sm:$0xff] }
 0x787   :  { %11784 = vmatprep.subr.bf16.mxu1 %v15071_v28 }
 0x789   :  { %11843 = vmatpush3.bf16.msra.mxu0 %v15217_v25  ;;  %v15221_v25 = vld [vmem:[#allocation62_spill] sm:$0xff] }
 0x78a   :  { %11786 = vmatpush3.bf16.msra.mxu1 %v15218_v9  ;;  %11844 = vmatprep.subr.bf16.mxu0 %v15071_v28  ;;  %v15222_v9 = vld [vmem:[#allocation39_spill] sm:$0xff] }
 0x78b   :  { %11811 = vmatprep.subr.bf16.mxu1 %v15071_v28 }
 0x78d   :  { %9581 = vmatmul.mubr.f32.vlgmr.msra.gmra.mrb[54].mxu1 %v14187_v5  ;;  %11846 = vmatpush3.bf16.msra.mxu0 %v15219_v46  ;;  %v15224_v46 = vld [vmem:[#allocation40_spill] sm:$0xff] }
 0x78e   :  { %11813 = vmatpush3.bf16.msra.mxu1 %v15220_v16  ;;  %9650 = vmatprep.mubr.msk.f32.mxu1 %vm12844_vm0, %v15072_v20  ;;  %v15225_v16 = vld [vmem:[#allocation66_spill] sm:$0xff] }
 0x78f   :  { %11814 = vmatprep.subr.bf16.mxu1 %v15071_v28  ;;  %11847 = vmatprep.subr.bf16.mxu0 %v15071_v28 }
 0x791   :  { %11849 = vmatpush3.bf16.msra.mxu0 %v15221_v25  ;;  %v15228_v25 = vld [vmem:[#allocation42_spill] sm:$0xff] }
 0x792   :  { %11816 = vmatpush3.bf16.msra.mxu1 %v15222_v9  ;;  %11850 = vmatprep.subr.bf16.mxu0 %v15071_v28  ;;  %v15227_v9 = vld [vmem:[#allocation68_spill] sm:$0xff] }
 0x793   :  { %11817 = vmatprep.subr.bf16.mxu1 %v15071_v28 }
 0x795   :  { %11852 = vmatpush3.bf16.msra.mxu0 %v15223_v6  ;;  %v15230_v6 = vld [vmem:[#allocation44_spill] sm:$0xff] }
 0x796   :  { %11819 = vmatpush3.bf16.msra.mxu1 %v15224_v46  ;;  %11853 = vmatprep.subr.bf16.mxu0 %v15071_v28  ;;  %v15229_v46 = vld [vmem:[#allocation43_spill] sm:$0xff] }
 0x797   :  { %11820 = vmatprep.subr.bf16.mxu1 %v15071_v28 }
 0x799   :  { %11855 = vmatpush3.bf16.msra.mxu0 %v15225_v16 }
 0x79a   :  { %11822 = vmatpush3.bf16.msra.mxu1 %v15226_v3  ;;  %11856 = vmatprep.subr.bf16.mxu0 %v15071_v28  ;;  %v15231_v3 = vld [vmem:[#allocation45_spill] sm:$0xff] }
 0x79b   :  { %11823 = vmatprep.subr.bf16.mxu1 %v15071_v28 }
 0x79d   :  { %11858 = vmatpush3.bf16.msra.mxu0 %v15227_v9 }
 0x79e   :  { %11825 = vmatpush3.bf16.msra.mxu1 %v15228_v25  ;;  %11883 = vmatprep.subr.bf16.mxu0 %v15071_v28 }
 0x79f   :  { %11826 = vmatprep.subr.bf16.mxu1 %v15071_v28 }
 0x7a2   :  { %11828 = vmatpush3.bf16.msra.mxu1 %v15229_v46  ;;  %v15232_v46 = vld [vmem:[#allocation46_spill] sm:$0xff] }
 0x7a3   :  { %11829 = vmatprep.subr.bf16.mxu1 %v15071_v28 }
 0x7a6   :  { %11831 = vmatpush3.bf16.msra.mxu1 %v15230_v6 }
 0x7a7   :  { %11832 = vmatprep.subr.bf16.mxu1 %v15071_v28 }
 0x7aa   :  { %11834 = vmatpush3.bf16.msra.mxu1 %v15231_v3 }
 0x7ab   :  { %11859 = vmatprep.subr.bf16.mxu1 %v15071_v28 }
 0x7d3   :  { %v3712_v16 = vpop.f32.mrb[54].mxu0 }
 0x7d4   :  { %v9337_v9 = vpop.f32.mrb[55].mxu0 }
 0x7f3   :  { %v3859_v17 = vpop.f32.mrb[56].mxu0 }
 0x7f4   :  { %v9407_v25 = vpop.f32.mrb[57].mxu0 }
 0x7f5   :  { %v15234_v25 = vld [vmem:[#allocation75_spill] sm:$0xff] }
 0x800   :  { %v3782_v49 = vpop.f32.mrb[48].mxu1 }
 0x801   :  { %v3783_v47 = vadd.f32 %v3782_v49, %v3712_v16  ;;  %v9372_v38 = vpop.f32.mrb[49].mxu1 }
 0x803   :  { %v3786_v23 = vadd.f32 %v15232_v46, %v3783_v47 }
 0x805   :  { %v6443_v34 = vmul.f32 -1.442695, %v3786_v23 }
 0x807   :  { %12562 = vpow2.f32 %v6443_v34 }
 0x811   :  { %v12563_v62 = vpop.eup %12562 }
 0x812   :  { %v3790_v44 = vadd.f32 1.0, %v12563_v62 }
 0x813   :  { %v4006_v40 = vpop.f32.mrb[58].mxu0 }
 0x814   :  { %v9477_v21 = vpop.f32.mrb[59].mxu0 }
 0x820   :  { %v3929_v33 = vpop.f32.mrb[50].mxu1 }
 0x821   :  { %v3930_v11 = vadd.f32 %v3929_v33, %v3859_v17  ;;  %v9442_v6 = vpop.f32.mrb[51].mxu1  ;;  %v15235_v33 = vld [vmem:[#allocation48_spill] sm:$0xff] }
 0x823   :  { %v3933_v3 = vadd.f32 %v15233_v52, %v3930_v11  ;;  %v4007_v11 = vadd.f32 %v14149_v14, %v4006_v40 }
 0x825   :  { %v6444_v56 = vmul.f32 -1.442695, %v3933_v3 }
 0x827   :  { %12564 = vpow2.f32 %v6444_v56 }
 0x828   :  { %12566 = vrcp.f32 %v3790_v44 }
 0x831   :  { %v12565_v21 = vpop.eup %12564 }
 0x832   :  { %v3937_v47 = vadd.f32 1.0, %v12565_v21  ;;  %v12567_v34 = vpop.eup %12566 }
 0x833   :  { %v4153_v9 = vpop.f32.mrb[60].mxu0 }
 0x834   :  { %v4157_v30 = vadd.f32 %v4153_v9, %v15234_v25  ;;  %v9547_v49 = vpop.f32.mrb[61].mxu0 }
 0x836   :  { %v6445_v38 = vmul.f32 -1.442695, %v4157_v30 }
 0x838   :  { %12568 = vpow2.f32 %v6445_v38 }
 0x839   :  { %12570 = vrcp.f32 %v3937_v47 }
 0x840   :  { %v4076_v16 = vpop.f32.mrb[52].mxu1 }
 0x841   :  { %v4077_v17 = vadd.f32 %v15235_v33, %v4076_v16  ;;  %v9512_v23 = vpop.f32.mrb[53].mxu1 }
 0x842   :  { %v12569_v56 = vpop.eup %12568 }
 0x843   :  { %v4080_v3 = vmul.f32 %v12567_v34, %v4077_v17  ;;  %v4161_v62 = vadd.f32 1.0, %v12569_v56  ;;  %v12571_v9 = vpop.eup %12570  ;;  %v15236_v17 = vld [vmem:[#allocation85_spill] sm:$0xff] }
 0x844   :  { %v4083_v30 = vsub.f32 1.0, %v12571_v9  ;;  %v4085_v49 = vmul.f32 %v12571_v9, %v14154_v39  ;;  %v15237_v39 = vld [vmem:[#allocation77_spill] sm:$0xff] }
 0x845   :  { %v4081_v6 = vadd.f32 %v4080_v3, %v4007_v11 }
 0x847   :  { %12572 = vtanh.f32 %v4081_v6 }
 0x848   :  { %12574 = vrcp.f32 %v4161_v62 }
 0x851   :  { %v12573_v44 = vpop.eup %12572 }
 0x852   :  { %v4084_v25 = vmul.f32 %v12573_v44, %v4083_v30  ;;  %v12575_v40 = vpop.eup %12574 }
 0x853   :  { %v4307_v38 = vpop.f32.mrb[62].mxu0 }
 0x854   :  { %v4308_v21 = vadd.f32 %v13946_v54, %v4307_v38  ;;  %v9617_v16 = vpop.f32.mrb[63].mxu0  ;;  %v14339_v23 = vadd.f32 %v4085_v49, %v4084_v25 }
 0x855   :  { %v15240_v16 = vld [vmem:[#allocation25_spill] sm:$0xff] }
 0x856   :  { %v4311_v47 = vmul.f32 %v12575_v40, %v4308_v21  ;;  %9651 = vmatmul.mubr.f32.vlgmr.msra.gmra.mrb[56].mxu1 %v14339_v23  ;;  %v15239_v21 = vld [vmem:[#allocation90_spill] sm:$0xff]  ;;  %v15241_v40 = vld [vmem:[#allocation91_spill] sm:$0xff] }
 0x857   :  { %11861 = vmatpush3.bf16.msra.mxu1 %v15079_v36  ;;  %9720 = vmatprep.mubr.msk.f32.mxu1 %vm12844_vm0, %v15072_v20 }
 0x858   :  { %v4312_v34 = vadd.f32 %v4311_v47, %v15236_v17  ;;  %11862 = vmatprep.subr.bf16.mxu1 %v15071_v28  ;;  %v15242_v47 = vld [vmem:[#allocation27_spill] sm:$0xff]  ;;  %v15243_v17 = vld [vmem:[#allocation92_spill] sm:$0xff] }
 0x85b   :  { %11864 = vmatpush3.bf16.msra.mxu1 %v15080_v22 }
 0x85c   :  { %11865 = vmatprep.subr.bf16.mxu1 %v15071_v28 }
 0x85f   :  { %11867 = vmatpush3.bf16.msra.mxu1 %v15081_v43 }
 0x860   :  { %v4230_v54 = vpop.f32.mrb[54].mxu1  ;;  %11868 = vmatprep.subr.bf16.mxu1 %v15071_v28 }
 0x861   :  { %v4234_v11 = vadd.f32 %v4230_v54, %v15237_v39  ;;  %v9582_v3 = vpop.f32.mrb[55].mxu1  ;;  %v15245_v54 = vld [vmem:[#allocation22_spill] sm:$0xff]  ;;  %v15246_v39 = vld [vmem:[#allocation31_spill] sm:$0xff] }
 0x862   :  { %v15248_v3 = vld [vmem:[#allocation33_spill] sm:$0xff] }
 0x863   :  { %v6446_v56 = vmul.f32 -1.442695, %v4234_v11  ;;  %11870 = vmatpush3.bf16.msra.mxu1 %v15083_v8  ;;  %v15247_v11 = vld [vmem:[#allocation24_spill] sm:$0xff] }
 0x864   :  { %11871 = vmatprep.subr.bf16.mxu1 %v15071_v28 }
 0x865   :  { %12576 = vpow2.f32 %v6446_v56  ;;  %v15249_v56 = vld [vmem:[#allocation26_spill] sm:$0xff] }
 0x867   :  { %11873 = vmatpush3.bf16.msra.mxu1 %v15084_v1 }
 0x868   :  { %11874 = vmatprep.subr.bf16.mxu1 %v15071_v28 }
 0x86b   :  { %11876 = vmatpush3.bf16.msra.mxu1 %v15085_v42 }
 0x86c   :  { %11877 = vmatprep.subr.bf16.mxu1 %v15071_v28 }
 0x86f   :  { %v12577_v6 = vpop.eup %12576  ;;  %11879 = vmatpush3.bf16.msra.mxu1 %v15086_v4 }
 0x870   :  { %v4238_v62 = vadd.f32 1.0, %v12577_v6  ;;  %11880 = vmatprep.subr.bf16.mxu1 %v15071_v28  ;;  %v15250_v6 = vld [vmem:[#allocation35_spill] sm:$0xff] }
 0x872   :  { %12578 = vrcp.f32 %v4238_v62  ;;  %v15251_v62 = vld [vmem:[#allocation28_spill] sm:$0xff] }
 0x873   :  { %11882 = vmatpush3.bf16.msra.mxu1 %v15087_v61  ;;  %12580 = vtanh.f32 %v4312_v34  ;;  %v15244_v34 = vld [vmem:[#allocation29_spill] sm:$0xff] }
 0x874   :  { %11907 = vmatprep.subr.bf16.mxu1 %v15071_v28 }
 0x876   :  { %9721 = vmatmul.mubr.f32.vlgmr.msra.gmra.mrb[58].mxu1 %v14339_v23 }
 0x877   :  { %11909 = vmatpush3.bf16.msra.mxu1 %v15088_v58  ;;  %9790 = vmatprep.mubr.msk.f32.mxu1 %vm12844_vm0, %v15072_v20 }
 0x878   :  { %11910 = vmatprep.subr.bf16.mxu1 %v15071_v28 }
 0x87b   :  { %11912 = vmatpush3.bf16.msra.mxu1 %v15089_v0 }
 0x87c   :  { %v12579_v9 = vpop.eup %12578  ;;  %11913 = vmatprep.subr.bf16.mxu1 %v15071_v28 }
 0x87d   :  { %v4314_v30 = vsub.f32 1.0, %v12579_v9  ;;  %v12581_v44 = vpop.eup %12580  ;;  %v4316_v49 = vmul.f32 %v12579_v9, %v14187_v5  ;;  %v15238_v5 = vld [vmem:[#allocation23_spill] sm:$0xff]  ;;  %v15252_v9 = vld [vmem:[#allocation37_spill] sm:$0xff] }
 0x87f   :  { %v4315_v25 = vmul.f32 %v12581_v44, %v4314_v30  ;;  %11915 = vmatpush3.bf16.msra.mxu1 %v15090_v37  ;;  %v15253_v30 = vld [vmem:[#allocation30_spill] sm:$0xff] }
 0x880   :  { %11916 = vmatprep.subr.bf16.mxu1 %v15071_v28  ;;  %v15254_v44 = vld [vmem:[#allocation54_spill] sm:$0xff] }
 0x881   :  { %v14372_v38 = vadd.f32 %v4316_v49, %v4315_v25  ;;  %v15255_v25 = vld [vmem:[#allocation32_spill] sm:$0xff] }
 0x882   :  { %v15256_v49 = vld [vmem:[#allocation56_spill] sm:$0xff] }
 0x883   :  { %11918 = vmatpush3.bf16.msra.mxu1 %v15091_v50  ;;  %9686 = vmatmul.mubr.f32.vlgmr.msra.gmra.mrb[64].mxu0 %v14372_v38 }
 0x884   :  { %11885 = vmatpush3.bf16.msra.mxu0 %v13375_v12  ;;  %11919 = vmatprep.subr.bf16.mxu1 %v15071_v28 }
 0x885   :  { %11886 = vmatprep.subr.bf16.mxu0 %v15071_v28  ;;  %9755 = vmatprep.mubr.msk.f32.mxu0 %vm12844_vm0, %v15072_v20 }
 0x887   :  { %11921 = vmatpush3.bf16.msra.mxu1 %v15092_v51 }
 0x888   :  { %11888 = vmatpush3.bf16.msra.mxu0 %v13383_v63  ;;  %11922 = vmatprep.subr.bf16.mxu1 %v15071_v28 }
 0x889   :  { %11889 = vmatprep.subr.bf16.mxu0 %v15071_v28 }
 0x88b   :  { %11924 = vmatpush3.bf16.msra.mxu1 %v15093_v7 }
 0x88c   :  { %11891 = vmatpush3.bf16.msra.mxu0 %v13393_v48  ;;  %11925 = vmatprep.subr.bf16.mxu1 %v15071_v28 }
 0x88d   :  { %11892 = vmatprep.subr.bf16.mxu0 %v15071_v28 }
 0x88f   :  { %11927 = vmatpush3.bf16.msra.mxu1 %v15094_v19 }
 0x890   :  { %11894 = vmatpush3.bf16.msra.mxu0 %v13399_v35  ;;  %11928 = vmatprep.subr.bf16.mxu1 %v15071_v28 }
 0x891   :  { %11895 = vmatprep.subr.bf16.mxu0 %v15071_v28 }
 0x893   :  { %11930 = vmatpush3.bf16.msra.mxu1 %v15095_v53 }
 0x894   :  { %11897 = vmatpush3.bf16.msra.mxu0 %v13405_v60  ;;  %11955 = vmatprep.subr.bf16.mxu1 %v15071_v28 }
 0x895   :  { %11898 = vmatprep.subr.bf16.mxu0 %v15071_v28 }
 0x896   :  { %9791 = vmatmul.mubr.f32.vlgmr.msra.gmra.mrb[60].mxu1 %v14372_v38 }
 0x897   :  { %11957 = vmatpush3.bf16.msra.mxu1 %v13039_v57  ;;  %9860 = vmatprep.mubr.msk.f32.mxu1 %vm12844_vm0, %v15072_v20 }
 0x898   :  { %11900 = vmatpush3.bf16.msra.mxu0 %v13411_v45  ;;  %11958 = vmatprep.subr.bf16.mxu1 %v15071_v28 }
 0x899   :  { %11901 = vmatprep.subr.bf16.mxu0 %v15071_v28 }
 0x89b   :  { %11960 = vmatpush3.bf16.msra.mxu1 %v13049_v2 }
 0x89c   :  { %11903 = vmatpush3.bf16.msra.mxu0 %v13419_v15  ;;  %11961 = vmatprep.subr.bf16.mxu1 %v15071_v28 }
 0x89d   :  { %11904 = vmatprep.subr.bf16.mxu0 %v15071_v28 }
 0x89f   :  { %11963 = vmatpush3.bf16.msra.mxu1 %v13061_v10 }
 0x8a0   :  { %11906 = vmatpush3.bf16.msra.mxu0 %v13425_v13  ;;  %11964 = vmatprep.subr.bf16.mxu1 %v15071_v28 }
 0x8a1   :  { %11931 = vmatprep.subr.bf16.mxu0 %v15071_v28 }
 0x8a3   :  { %9756 = vmatmul.mubr.f32.vlgmr.msra.gmra.mrb[66].mxu0 %v14372_v38  ;;  %11966 = vmatpush3.bf16.msra.mxu1 %v13073_v18 }
 0x8a4   :  { %11933 = vmatpush3.bf16.msra.mxu0 %v13431_v55  ;;  %11967 = vmatprep.subr.bf16.mxu1 %v15071_v28 }
 0x8a5   :  { %11934 = vmatprep.subr.bf16.mxu0 %v15071_v28  ;;  %9825 = vmatprep.mubr.msk.f32.mxu0 %vm12844_vm0, %v15072_v20 }
 0x8a7   :  { %11969 = vmatpush3.bf16.msra.mxu1 %v13081_v24 }
 0x8a8   :  { %11936 = vmatpush3.bf16.msra.mxu0 %v13439_v27  ;;  %11970 = vmatprep.subr.bf16.mxu1 %v15071_v28 }
 0x8a9   :  { %11937 = vmatprep.subr.bf16.mxu0 %v15071_v28 }
 0x8ab   :  { %11972 = vmatpush3.bf16.msra.mxu1 %v13088_v32 }
 0x8ac   :  { %11939 = vmatpush3.bf16.msra.mxu0 %v13449_v31  ;;  %11973 = vmatprep.subr.bf16.mxu1 %v15071_v28 }
 0x8ad   :  { %11940 = vmatprep.subr.bf16.mxu0 %v15071_v28 }
 0x8af   :  { %11975 = vmatpush3.bf16.msra.mxu1 %v13092_v26 }
 0x8b0   :  { %11942 = vmatpush3.bf16.msra.mxu0 %v13455_v29  ;;  %11976 = vmatprep.subr.bf16.mxu1 %v15071_v28 }
 0x8b1   :  { %11943 = vmatprep.subr.bf16.mxu0 %v15071_v28 }
 0x8b3   :  { %11978 = vmatpush3.bf16.msra.mxu1 %v13096_v41 }
 0x8b4   :  { %11945 = vmatpush3.bf16.msra.mxu0 %v15120_v59  ;;  %12003 = vmatprep.subr.bf16.mxu1 %v15071_v28 }
 0x8b5   :  { %11946 = vmatprep.subr.bf16.mxu0 %v15071_v28 }
 0x8b6   :  { %9861 = vmatmul.mubr.f32.vlgmr.msra.gmra.mrb[62].mxu1 %v14372_v38 }
 0x8b7   :  { %12005 = vmatpush3.bf16.msra.mxu1 %v15238_v5  ;;  %9930 = vmatprep.mubr.msk.f32.mxu1 %vm12844_vm0, %v15072_v20 }
 0x8b8   :  { %11948 = vmatpush3.bf16.msra.mxu0 %v15239_v21  ;;  %12006 = vmatprep.subr.bf16.mxu1 %v15071_v28 }
 0x8b9   :  { %11949 = vmatprep.subr.bf16.mxu0 %v15071_v28 }
 0x8bb   :  { %12008 = vmatpush3.bf16.msra.mxu1 %v15240_v16 }
 0x8bc   :  { %11951 = vmatpush3.bf16.msra.mxu0 %v15241_v40  ;;  %12009 = vmatprep.subr.bf16.mxu1 %v15071_v28 }
 0x8bd   :  { %11952 = vmatprep.subr.bf16.mxu0 %v15071_v28 }
 0x8bf   :  { %12011 = vmatpush3.bf16.msra.mxu1 %v15242_v47 }
 0x8c0   :  { %11954 = vmatpush3.bf16.msra.mxu0 %v15243_v17  ;;  %12012 = vmatprep.subr.bf16.mxu1 %v15071_v28 }
 0x8c1   :  { %11979 = vmatprep.subr.bf16.mxu0 %v15071_v28 }
 0x8c3   :  { %9826 = vmatmul.mubr.f32.vlgmr.msra.gmra.mrb[68].mxu0 %v14339_v23  ;;  %12014 = vmatpush3.bf16.msra.mxu1 %v15244_v34 }
 0x8c4   :  { %11981 = vmatpush3.bf16.msra.mxu0 %v15245_v54  ;;  %12015 = vmatprep.subr.bf16.mxu1 %v15071_v28 }
 0x8c5   :  { %11982 = vmatprep.subr.bf16.mxu0 %v15071_v28  ;;  %9895 = vmatprep.mubr.msk.f32.mxu0 %vm12844_vm0, %v15072_v20 }
 0x8c7   :  { %12017 = vmatpush3.bf16.msra.mxu1 %v15246_v39 }
 0x8c8   :  { %11984 = vmatpush3.bf16.msra.mxu0 %v15247_v11  ;;  %12018 = vmatprep.subr.bf16.mxu1 %v15071_v28 }
 0x8c9   :  { %11985 = vmatprep.subr.bf16.mxu0 %v15071_v28 }
 0x8cb   :  { %12020 = vmatpush3.bf16.msra.mxu1 %v15248_v3 }
 0x8cc   :  { %11987 = vmatpush3.bf16.msra.mxu0 %v15249_v56  ;;  %12021 = vmatprep.subr.bf16.mxu1 %v15071_v28 }
 0x8cd   :  { %11988 = vmatprep.subr.bf16.mxu0 %v15071_v28 }
 0x8cf   :  { %12023 = vmatpush3.bf16.msra.mxu1 %v15250_v6 }
 0x8d0   :  { %11990 = vmatpush3.bf16.msra.mxu0 %v15251_v62  ;;  %12024 = vmatprep.subr.bf16.mxu1 %v15071_v28  ;;  %v15261_v62 = vld [vmem:[#allocation38_spill] sm:$0xff] }
 0x8d1   :  { %11991 = vmatprep.subr.bf16.mxu0 %v15071_v28 }
 0x8d3   :  { %12026 = vmatpush3.bf16.msra.mxu1 %v15252_v9  ;;  %v15258_v9 = vld [vmem:[#allocation58_spill] sm:$0xff] }
 0x8d4   :  { %11993 = vmatpush3.bf16.msra.mxu0 %v15253_v30  ;;  %12051 = vmatprep.subr.bf16.mxu1 %v15071_v28  ;;  %v15257_v30 = vld [vmem:[#allocation34_spill] sm:$0xff] }
 0x8d5   :  { %11994 = vmatprep.subr.bf16.mxu0 %v15071_v28 }
 0x8d6   :  { %9931 = vmatmul.mubr.f32.vlgmr.msra.gmra.mrb[64].mxu1 %v14372_v38 }
 0x8d7   :  { %12053 = vmatpush3.bf16.msra.mxu1 %v15254_v44  ;;  %10000 = vmatprep.mubr.msk.f32.mxu1 %vm12844_vm0, %v15072_v20  ;;  %v15259_v44 = vld [vmem:[#allocation36_spill] sm:$0xff] }
 0x8d8   :  { %11996 = vmatpush3.bf16.msra.mxu0 %v15255_v25  ;;  %12054 = vmatprep.subr.bf16.mxu1 %v15071_v28  ;;  %v15260_v25 = vld [vmem:[#allocation60_spill] sm:$0xff] }
 0x8d9   :  { %11997 = vmatprep.subr.bf16.mxu0 %v15071_v28 }
 0x8db   :  { %12056 = vmatpush3.bf16.msra.mxu1 %v15256_v49  ;;  %v15267_v49 = vld [vmem:[#allocation41_spill] sm:$0xff] }
 0x8dc   :  { %11999 = vmatpush3.bf16.msra.mxu0 %v15257_v30  ;;  %12057 = vmatprep.subr.bf16.mxu1 %v15071_v28  ;;  %v15264_v30 = vld [vmem:[#allocation64_spill] sm:$0xff] }
 0x8dd   :  { %12000 = vmatprep.subr.bf16.mxu0 %v15071_v28 }
 0x8df   :  { %12059 = vmatpush3.bf16.msra.mxu1 %v15258_v9  ;;  %v15262_v9 = vld [vmem:[#allocation62_spill] sm:$0xff] }
 0x8e0   :  { %12002 = vmatpush3.bf16.msra.mxu0 %v15259_v44  ;;  %12060 = vmatprep.subr.bf16.mxu1 %v15071_v28  ;;  %v15263_v44 = vld [vmem:[#allocation39_spill] sm:$0xff] }
 0x8e1   :  { %12027 = vmatprep.subr.bf16.mxu0 %v15071_v28 }
 0x8e3   :  { %9896 = vmatmul.mubr.f32.vlgmr.msra.gmra.mrb[70].mxu0 %v14372_v38  ;;  %12062 = vmatpush3.bf16.msra.mxu1 %v15260_v25  ;;  %v15265_v25 = vld [vmem:[#allocation40_spill] sm:$0xff] }
 0x8e4   :  { %12029 = vmatpush3.bf16.msra.mxu0 %v15261_v62  ;;  %9965 = vmatprep.mubr.msk.f32.mxu0 %vm12844_vm0, %v15072_v20  ;;  %v15266_v62 = vld [vmem:[#allocation66_spill] sm:$0xff] }
 0x8e5   :  { %12030 = vmatprep.subr.bf16.mxu0 %v15071_v28  ;;  %12063 = vmatprep.subr.bf16.mxu1 %v15071_v28 }
 0x8e7   :  { %12065 = vmatpush3.bf16.msra.mxu1 %v15262_v9  ;;  %v15269_v9 = vld [vmem:[#allocation42_spill] sm:$0xff] }
 0x8e8   :  { %12032 = vmatpush3.bf16.msra.mxu0 %v15263_v44  ;;  %12066 = vmatprep.subr.bf16.mxu1 %v15071_v28  ;;  %v15268_v44 = vld [vmem:[#allocation68_spill] sm:$0xff] }
 0x8e9   :  { %12033 = vmatprep.subr.bf16.mxu0 %v15071_v28 }
 0x8eb   :  { %12068 = vmatpush3.bf16.msra.mxu1 %v15264_v30  ;;  %v15271_v30 = vld [vmem:[#allocation44_spill] sm:$0xff] }
 0x8ec   :  { %12035 = vmatpush3.bf16.msra.mxu0 %v15265_v25  ;;  %12069 = vmatprep.subr.bf16.mxu1 %v15071_v28  ;;  %v15270_v25 = vld [vmem:[#allocation43_spill] sm:$0xff] }
 0x8ed   :  { %12036 = vmatprep.subr.bf16.mxu0 %v15071_v28 }
 0x8ef   :  { %12071 = vmatpush3.bf16.msra.mxu1 %v15266_v62 }
 0x8f0   :  { %12038 = vmatpush3.bf16.msra.mxu0 %v15267_v49  ;;  %12072 = vmatprep.subr.bf16.mxu1 %v15071_v28  ;;  %v15272_v49 = vld [vmem:[#allocation45_spill] sm:$0xff] }
 0x8f1   :  { %12039 = vmatprep.subr.bf16.mxu0 %v15071_v28 }
 0x8f3   :  { %12074 = vmatpush3.bf16.msra.mxu1 %v15268_v44 }
 0x8f4   :  { %12041 = vmatpush3.bf16.msra.mxu0 %v15269_v9  ;;  %12099 = vmatprep.subr.bf16.mxu1 %v15071_v28 }
 0x8f5   :  { %12042 = vmatprep.subr.bf16.mxu0 %v15071_v28 }
 0x8f8   :  { %12044 = vmatpush3.bf16.msra.mxu0 %v15270_v25 }
 0x8f9   :  { %12045 = vmatprep.subr.bf16.mxu0 %v15071_v28 }
 0x8fc   :  { %12047 = vmatpush3.bf16.msra.mxu0 %v15271_v30 }
 0x8fd   :  { %12048 = vmatprep.subr.bf16.mxu0 %v15071_v28 }
 0x900   :  { %12050 = vmatpush3.bf16.msra.mxu0 %v15272_v49 }
 0x901   :  { %12075 = vmatprep.subr.bf16.mxu0 %v15071_v28 }
 0x929   :  { %v4384_v62 = vpop.f32.mrb[56].mxu1 }
 0x92a   :  { %v9652_v44 = vpop.f32.mrb[57].mxu1 }
 0x949   :  { %v4531_v6 = vpop.f32.mrb[58].mxu1 }
 0x94a   :  { %v9722_v9 = vpop.f32.mrb[59].mxu1 }
 0x94b   :  { %v15273_v9 = vld [vmem:[#allocation80_spill] sm:$0xff] }
 0x956   :  { %v4454_v56 = vpop.f32.mrb[64].mxu0 }
 0x957   :  { %v4455_v3 = vadd.f32 %v4454_v56, %v4384_v62  ;;  %v9687_v11 = vpop.f32.mrb[65].mxu0 }
 0x959   :  { %v4458_v25 = vadd.f32 %v15232_v46, %v4455_v3 }
 0x95b   :  { %v6447_v47 = vmul.f32 -1.442695, %v4458_v25 }
 0x95d   :  { %12582 = vpow2.f32 %v6447_v47 }
 0x967   :  { %v12583_v16 = vpop.eup %12582 }
 0x968   :  { %v4462_v21 = vadd.f32 1.0, %v12583_v16 }
 0x969   :  { %v4678_v39 = vpop.f32.mrb[60].mxu1 }
 0x96a   :  { %v9792_v54 = vpop.f32.mrb[61].mxu1 }
 0x976   :  { %v4601_v34 = vpop.f32.mrb[66].mxu0 }
 0x977   :  { %v4602_v17 = vadd.f32 %v4601_v34, %v4531_v6  ;;  %v9757_v30 = vpop.f32.mrb[67].mxu0 }
 0x979   :  { %v4605_v49 = vadd.f32 %v15233_v52, %v4602_v17  ;;  %v4679_v52 = vadd.f32 %v14149_v14, %v4678_v39 }
 0x97b   :  { %v6448_v40 = vmul.f32 -1.442695, %v4605_v49 }
 0x97d   :  { %12584 = vpow2.f32 %v6448_v40 }
 0x97e   :  { %12586 = vrcp.f32 %v4462_v21 }
 0x987   :  { %v12585_v54 = vpop.eup %12584 }
 0x988   :  { %v4609_v46 = vadd.f32 1.0, %v12585_v54  ;;  %v12587_v47 = vpop.eup %12586 }
 0x989   :  { %v4825_v44 = vpop.f32.mrb[62].mxu1 }
 0x98a   :  { %v4829_v5 = vadd.f32 %v4825_v44, %v15273_v9  ;;  %v9862_v56 = vpop.f32.mrb[63].mxu1 }
 0x98c   :  { %v6449_v11 = vmul.f32 -1.442695, %v4829_v5 }
 0x98e   :  { %12588 = vpow2.f32 %v6449_v11 }
 0x98f   :  { %12590 = vrcp.f32 %v4609_v46 }
 0x996   :  { %v4748_v3 = vpop.f32.mrb[68].mxu0 }
 0x997   :  { %v4749_v34 = vadd.f32 %v15235_v33, %v4748_v3  ;;  %v9827_v6 = vpop.f32.mrb[69].mxu0  ;;  %v14526_v33 = vld [vmem:[%s14874_s3 + $0x3] ss:$0 sm:$0xff]  ;;  %v15275_v3 = vld [vmem:[#allocation82_spill] sm:$0xff] }
 0x998   :  { %v12589_v40 = vpop.eup %12588 }
 0x999   :  { %v4752_v17 = vmul.f32 %v12587_v47, %v4749_v34  ;;  %v4833_v16 = vadd.f32 1.0, %v12589_v40  ;;  %v12591_v30 = vpop.eup %12590 }
 0x99a   :  { %v4755_v5 = vsub.f32 1.0, %v12591_v30  ;;  %v4757_v49 = vmul.f32 %v12591_v30, %v14339_v23  ;;  %v15274_v23 = vld [vmem:[#allocation88_spill] sm:$0xff] }
 0x99b   :  { %v4753_v62 = vadd.f32 %v4752_v17, %v4679_v52 }
 0x99d   :  { %12592 = vtanh.f32 %v4753_v62 }
 0x99e   :  { %12594 = vrcp.f32 %v4833_v16 }
 0x9a7   :  { %v12593_v21 = vpop.eup %12592 }
 0x9a8   :  { %v4756_v25 = vmul.f32 %v12593_v21, %v4755_v5  ;;  %v12595_v56 = vpop.eup %12594 }
 0x9a9   :  { %v4979_v44 = vpop.f32.mrb[64].mxu1 }
 0x9aa   :  { %v4980_v14 = vadd.f32 %v14526_v33, %v4979_v44  ;;  %v9932_v39 = vpop.f32.mrb[65].mxu1  ;;  %v14529_v9 = vadd.f32 %v4757_v49, %v4756_v25  ;;  %v15285_v25 = vld [vmem:[#allocation24_spill] sm:$0xff]  ;;  %v15286_v49 = vld [vmem:[#allocation33_spill] sm:$0xff]  ;;  %v15287_v44 = vld [vmem:[#allocation26_spill] sm:$0xff] }
 0x9ab   :  { %v15289_v39 = vld [vmem:[#allocation28_spill] sm:$0xff] }
 0x9ac   :  { %v4983_v11 = vmul.f32 %v12595_v56, %v4980_v14  ;;  %9966 = vmatmul.mubr.f32.vlgmr.msra.gmra.mrb[72].mxu0 %v14529_v9  ;;  %v15288_v14 = vld [vmem:[#allocation35_spill] sm:$0xff]  ;;  %v15290_v56 = vld [vmem:[#allocation37_spill] sm:$0xff] }
 0x9ad   :  { %12077 = vmatpush3.bf16.msra.mxu0 %v15079_v36  ;;  %10035 = vmatprep.mubr.msk.f32.mxu0 %vm12844_vm0, %v15072_v20 }
 0x9ae   :  { %v4984_v54 = vadd.f32 %v4983_v11, %v15274_v23  ;;  %12078 = vmatprep.subr.bf16.mxu0 %v15071_v28  ;;  %v15291_v11 = vld [vmem:[#allocation30_spill] sm:$0xff] }
 0x9af   :  { %v15292_v23 = vld [vmem:[#allocation54_spill] sm:$0xff] }
 0x9b1   :  { %12080 = vmatpush3.bf16.msra.mxu0 %v15080_v22 }
 0x9b2   :  { %12081 = vmatprep.subr.bf16.mxu0 %v15071_v28 }
 0x9b5   :  { %12083 = vmatpush3.bf16.msra.mxu0 %v15081_v43 }
 0x9b6   :  { %v4902_v46 = vpop.f32.mrb[70].mxu0  ;;  %12084 = vmatprep.subr.bf16.mxu0 %v15071_v28 }
 0x9b7   :  { %v4906_v34 = vadd.f32 %v4902_v46, %v15275_v3  ;;  %v9897_v6 = vpop.f32.mrb[71].mxu0  ;;  %v15294_v46 = vld [vmem:[#allocation56_spill] sm:$0xff]  ;;  %v15295_v3 = vld [vmem:[#allocation34_spill] sm:$0xff] }
 0x9b8   :  { %v15297_v6 = vld [vmem:[#allocation36_spill] sm:$0xff] }
 0x9b9   :  { %v6450_v47 = vmul.f32 -1.442695, %v4906_v34  ;;  %12086 = vmatpush3.bf16.msra.mxu0 %v15083_v8  ;;  %v15296_v34 = vld [vmem:[#allocation58_spill] sm:$0xff] }
 0x9ba   :  { %12087 = vmatprep.subr.bf16.mxu0 %v15071_v28 }
 0x9bb   :  { %12596 = vpow2.f32 %v6450_v47  ;;  %v15298_v47 = vld [vmem:[#allocation60_spill] sm:$0xff] }
 0x9bd   :  { %12089 = vmatpush3.bf16.msra.mxu0 %v15084_v1 }
 0x9be   :  { %12090 = vmatprep.subr.bf16.mxu0 %v15071_v28 }
 0x9c1   :  { %12092 = vmatpush3.bf16.msra.mxu0 %v15085_v42 }
 0x9c2   :  { %12093 = vmatprep.subr.bf16.mxu0 %v15071_v28 }
 0x9c5   :  { %v12597_v52 = vpop.eup %12596  ;;  %12095 = vmatpush3.bf16.msra.mxu0 %v15086_v4 }
 0x9c6   :  { %v4910_v17 = vadd.f32 1.0, %v12597_v52  ;;  %12096 = vmatprep.subr.bf16.mxu0 %v15071_v28  ;;  %v15299_v52 = vld [vmem:[#allocation38_spill] sm:$0xff] }
 0x9c8   :  { %12598 = vrcp.f32 %v4910_v17  ;;  %v15300_v17 = vld [vmem:[#allocation62_spill] sm:$0xff] }
 0x9c9   :  { %12098 = vmatpush3.bf16.msra.mxu0 %v15087_v61  ;;  %12600 = vtanh.f32 %v4984_v54  ;;  %v15293_v54 = vld [vmem:[#allocation32_spill] sm:$0xff] }
 0x9ca   :  { %12123 = vmatprep.subr.bf16.mxu0 %v15071_v28 }
 0x9cc   :  { %10036 = vmatmul.mubr.f32.vlgmr.msra.gmra.mrb[74].mxu0 %v14529_v9 }
 0x9cd   :  { %12125 = vmatpush3.bf16.msra.mxu0 %v15088_v58  ;;  %10105 = vmatprep.mubr.msk.f32.mxu0 %vm12844_vm0, %v15072_v20 }
 0x9ce   :  { %12126 = vmatprep.subr.bf16.mxu0 %v15071_v28 }
 0x9d1   :  { %12128 = vmatpush3.bf16.msra.mxu0 %v15089_v0 }
 0x9d2   :  { %v12599_v40 = vpop.eup %12598  ;;  %12129 = vmatprep.subr.bf16.mxu0 %v15071_v28 }
 0x9d3   :  { %v4986_v62 = vsub.f32 1.0, %v12599_v40  ;;  %v12601_v16 = vpop.eup %12600  ;;  %v4988_v5 = vmul.f32 %v12599_v40, %v14372_v38  ;;  %v15284_v38 = vld [vmem:[#allocation31_spill] sm:$0xff] }
 0x9d4   :  { %v15301_v40 = vld [vmem:[#allocation39_spill] sm:$0xff] }
 0x9d5   :  { %v4987_v30 = vmul.f32 %v12601_v16, %v4986_v62  ;;  %12131 = vmatpush3.bf16.msra.mxu0 %v15090_v37  ;;  %v15302_v62 = vld [vmem:[#allocation64_spill] sm:$0xff] }
 0x9d6   :  { %12132 = vmatprep.subr.bf16.mxu0 %v15071_v28  ;;  %v15303_v16 = vld [vmem:[#allocation40_spill] sm:$0xff] }
 0x9d7   :  { %v14562_v21 = vadd.f32 %v4988_v5, %v4987_v30  ;;  %v15304_v30 = vld [vmem:[#allocation66_spill] sm:$0xff]  ;;  %v15305_v5 = vld [vmem:[#allocation41_spill] sm:$0xff] }
 0x9d9   :  { %12134 = vmatpush3.bf16.msra.mxu0 %v15091_v50  ;;  %10001 = vmatmul.mubr.f32.vlgmr.msra.gmra.mrb[66].mxu1 %v14562_v21 }
 0x9da   :  { %12101 = vmatpush3.bf16.msra.mxu1 %v13375_v12  ;;  %12135 = vmatprep.subr.bf16.mxu0 %v15071_v28 }
 0x9db   :  { %12102 = vmatprep.subr.bf16.mxu1 %v15071_v28  ;;  %10070 = vmatprep.mubr.msk.f32.mxu1 %vm12844_vm0, %v15072_v20 }
 0x9dd   :  { %12137 = vmatpush3.bf16.msra.mxu0 %v15092_v51 }
 0x9de   :  { %12104 = vmatpush3.bf16.msra.mxu1 %v13383_v63  ;;  %12138 = vmatprep.subr.bf16.mxu0 %v15071_v28 }
 0x9df   :  { %12105 = vmatprep.subr.bf16.mxu1 %v15071_v28 }
 0x9e1   :  { %12140 = vmatpush3.bf16.msra.mxu0 %v15093_v7 }
 0x9e2   :  { %12107 = vmatpush3.bf16.msra.mxu1 %v13393_v48  ;;  %12141 = vmatprep.subr.bf16.mxu0 %v15071_v28 }
 0x9e3   :  { %12108 = vmatprep.subr.bf16.mxu1 %v15071_v28 }
 0x9e5   :  { %12143 = vmatpush3.bf16.msra.mxu0 %v15094_v19 }
 0x9e6   :  { %12110 = vmatpush3.bf16.msra.mxu1 %v13399_v35  ;;  %12144 = vmatprep.subr.bf16.mxu0 %v15071_v28 }
 0x9e7   :  { %12111 = vmatprep.subr.bf16.mxu1 %v15071_v28 }
 0x9e9   :  { %12146 = vmatpush3.bf16.msra.mxu0 %v15095_v53 }
 0x9ea   :  { %12113 = vmatpush3.bf16.msra.mxu1 %v13405_v60  ;;  %12171 = vmatprep.subr.bf16.mxu0 %v15071_v28 }
 0x9eb   :  { %12114 = vmatprep.subr.bf16.mxu1 %v15071_v28 }
 0x9ec   :  { %10106 = vmatmul.mubr.f32.vlgmr.msra.gmra.mrb[76].mxu0 %v14562_v21 }
 0x9ed   :  { %12173 = vmatpush3.bf16.msra.mxu0 %v13039_v57  ;;  %10175 = vmatprep.mubr.msk.f32.mxu0 %vm12844_vm0, %v15072_v20  ;;  %v15276_v57 = vld [vmem:[#allocation23_spill] sm:$0xff] }
 0x9ee   :  { %12116 = vmatpush3.bf16.msra.mxu1 %v13411_v45  ;;  %12174 = vmatprep.subr.bf16.mxu0 %v15071_v28 }
 0x9ef   :  { %12117 = vmatprep.subr.bf16.mxu1 %v15071_v28 }
 0x9f1   :  { %12176 = vmatpush3.bf16.msra.mxu0 %v13049_v2  ;;  %v15277_v2 = vld [vmem:[#allocation90_spill] sm:$0xff] }
 0x9f2   :  { %12119 = vmatpush3.bf16.msra.mxu1 %v13419_v15  ;;  %12177 = vmatprep.subr.bf16.mxu0 %v15071_v28 }
 0x9f3   :  { %12120 = vmatprep.subr.bf16.mxu1 %v15071_v28 }
 0x9f5   :  { %12179 = vmatpush3.bf16.msra.mxu0 %v13061_v10  ;;  %v15278_v10 = vld [vmem:[#allocation25_spill] sm:$0xff] }
 0x9f6   :  { %12122 = vmatpush3.bf16.msra.mxu1 %v13425_v13  ;;  %12180 = vmatprep.subr.bf16.mxu0 %v15071_v28 }
 0x9f7   :  { %12147 = vmatprep.subr.bf16.mxu1 %v15071_v28 }
 0x9f9   :  { %10071 = vmatmul.mubr.f32.vlgmr.msra.gmra.mrb[68].mxu1 %v14562_v21  ;;  %12182 = vmatpush3.bf16.msra.mxu0 %v13073_v18  ;;  %v15279_v18 = vld [vmem:[#allocation91_spill] sm:$0xff] }
 0x9fa   :  { %12149 = vmatpush3.bf16.msra.mxu1 %v13431_v55  ;;  %12183 = vmatprep.subr.bf16.mxu0 %v15071_v28 }
 0x9fb   :  { %12150 = vmatprep.subr.bf16.mxu1 %v15071_v28  ;;  %10140 = vmatprep.mubr.msk.f32.mxu1 %vm12844_vm0, %v15072_v20 }
 0x9fd   :  { %12185 = vmatpush3.bf16.msra.mxu0 %v13081_v24  ;;  %v15280_v24 = vld [vmem:[#allocation27_spill] sm:$0xff] }
 0x9fe   :  { %12152 = vmatpush3.bf16.msra.mxu1 %v13439_v27  ;;  %12186 = vmatprep.subr.bf16.mxu0 %v15071_v28 }
 0x9ff   :  { %12153 = vmatprep.subr.bf16.mxu1 %v15071_v28 }
 0xa01   :  { %12188 = vmatpush3.bf16.msra.mxu0 %v13088_v32  ;;  %v15281_v32 = vld [vmem:[#allocation92_spill] sm:$0xff] }
 0xa02   :  { %12155 = vmatpush3.bf16.msra.mxu1 %v13449_v31  ;;  %12189 = vmatprep.subr.bf16.mxu0 %v15071_v28 }
 0xa03   :  { %12156 = vmatprep.subr.bf16.mxu1 %v15071_v28 }
 0xa05   :  { %12191 = vmatpush3.bf16.msra.mxu0 %v13092_v26  ;;  %v15282_v26 = vld [vmem:[#allocation29_spill] sm:$0xff] }
 0xa06   :  { %12158 = vmatpush3.bf16.msra.mxu1 %v13455_v29  ;;  %12192 = vmatprep.subr.bf16.mxu0 %v15071_v28 }
 0xa07   :  { %12159 = vmatprep.subr.bf16.mxu1 %v15071_v28 }
 0xa09   :  { %12194 = vmatpush3.bf16.msra.mxu0 %v13096_v41  ;;  %v15283_v41 = vld [vmem:[#allocation22_spill] sm:$0xff] }
 0xa0a   :  { %12161 = vmatpush3.bf16.msra.mxu1 %v15120_v59  ;;  %12219 = vmatprep.subr.bf16.mxu0 %v15071_v28 }
 0xa0b   :  { %12162 = vmatprep.subr.bf16.mxu1 %v15071_v28 }
 0xa0c   :  { %10176 = vmatmul.mubr.f32.vlgmr.msra.gmra.mrb[78].mxu0 %v14562_v21 }
 0xa0d   :  { %12221 = vmatpush3.bf16.msra.mxu0 %v15276_v57  ;;  %10245 = vmatprep.mubr.msk.f32.mxu0 %vm12844_vm0, %v15072_v20  ;;  %v15306_v57 = vld [vmem:[#allocation68_spill] sm:$0xff] }
 0xa0e   :  { %12164 = vmatpush3.bf16.msra.mxu1 %v15277_v2  ;;  %12222 = vmatprep.subr.bf16.mxu0 %v15071_v28 }
 0xa0f   :  { %12165 = vmatprep.subr.bf16.mxu1 %v15071_v28 }
 0xa11   :  { %12224 = vmatpush3.bf16.msra.mxu0 %v15278_v10  ;;  %v15307_v10 = vld [vmem:[#allocation42_spill] sm:$0xff] }
 0xa12   :  { %12167 = vmatpush3.bf16.msra.mxu1 %v15279_v18  ;;  %12225 = vmatprep.subr.bf16.mxu0 %v15071_v28 }
 0xa13   :  { %12168 = vmatprep.subr.bf16.mxu1 %v15071_v28 }
 0xa15   :  { %12227 = vmatpush3.bf16.msra.mxu0 %v15280_v24  ;;  %v15308_v24 = vld [vmem:[#allocation43_spill] sm:$0xff] }
 0xa16   :  { %12170 = vmatpush3.bf16.msra.mxu1 %v15281_v32  ;;  %12228 = vmatprep.subr.bf16.mxu0 %v15071_v28 }
 0xa17   :  { %12195 = vmatprep.subr.bf16.mxu1 %v15071_v28 }
 0xa19   :  { %10141 = vmatmul.mubr.f32.vlgmr.msra.gmra.mrb[70].mxu1 %v14529_v9  ;;  %12230 = vmatpush3.bf16.msra.mxu0 %v15282_v26  ;;  %v15309_v26 = vld [vmem:[#allocation44_spill] sm:$0xff] }
 0xa1a   :  { %12197 = vmatpush3.bf16.msra.mxu1 %v15283_v41  ;;  %12231 = vmatprep.subr.bf16.mxu0 %v15071_v28  ;;  %v15310_v41 = vld [vmem:[#allocation45_spill] sm:$0xff] }
 0xa1b   :  { %12198 = vmatprep.subr.bf16.mxu1 %v15071_v28  ;;  %10210 = vmatprep.mubr.msk.f32.mxu1 %vm12844_vm0, %v15072_v20 }
 0xa1d   :  { %12233 = vmatpush3.bf16.msra.mxu0 %v15284_v38 }
 0xa1e   :  { %12200 = vmatpush3.bf16.msra.mxu1 %v15285_v25  ;;  %12234 = vmatprep.subr.bf16.mxu0 %v15071_v28 }
 0xa1f   :  { %12201 = vmatprep.subr.bf16.mxu1 %v15071_v28 }
 0xa21   :  { %12236 = vmatpush3.bf16.msra.mxu0 %v15286_v49 }
 0xa22   :  { %12203 = vmatpush3.bf16.msra.mxu1 %v15287_v44  ;;  %12237 = vmatprep.subr.bf16.mxu0 %v15071_v28 }
 0xa23   :  { %12204 = vmatprep.subr.bf16.mxu1 %v15071_v28 }
 0xa25   :  { %12239 = vmatpush3.bf16.msra.mxu0 %v15288_v14 }
 0xa26   :  { %12206 = vmatpush3.bf16.msra.mxu1 %v15289_v39  ;;  %12240 = vmatprep.subr.bf16.mxu0 %v15071_v28 }
 0xa27   :  { %12207 = vmatprep.subr.bf16.mxu1 %v15071_v28 }
 0xa29   :  { %12242 = vmatpush3.bf16.msra.mxu0 %v15290_v56 }
 0xa2a   :  { %12209 = vmatpush3.bf16.msra.mxu1 %v15291_v11  ;;  %12267 = vmatprep.subr.bf16.mxu0 %v15071_v28 }
 0xa2b   :  { %12210 = vmatprep.subr.bf16.mxu1 %v15071_v28 }
 0xa2c   :  { %10246 = vmatmul.mubr.f32.vlgmr.msra.gmra.mrb[80].mxu0 %v14562_v21 }
 0xa2d   :  { %12269 = vmatpush3.bf16.msra.mxu0 %v15292_v23  ;;  %10315 = vmatprep.mubr.msk.f32.mxu0 %vm12844_vm0, %v15072_v20 }
 0xa2e   :  { %12212 = vmatpush3.bf16.msra.mxu1 %v15293_v54  ;;  %12270 = vmatprep.subr.bf16.mxu0 %v15071_v28  ;;  %v14710_v54 = vld [vmem:[%s14877_s6] ss:$0 sm:$0xff] }
 0xa2f   :  { %12213 = vmatprep.subr.bf16.mxu1 %v15071_v28 }
 0xa31   :  { %12272 = vmatpush3.bf16.msra.mxu0 %v15294_v46 }
 0xa32   :  { %12215 = vmatpush3.bf16.msra.mxu1 %v15295_v3  ;;  %12273 = vmatprep.subr.bf16.mxu0 %v15071_v28 }
 0xa33   :  { %12216 = vmatprep.subr.bf16.mxu1 %v15071_v28 }
 0xa35   :  { %12275 = vmatpush3.bf16.msra.mxu0 %v15296_v34 }
 0xa36   :  { %12218 = vmatpush3.bf16.msra.mxu1 %v15297_v6  ;;  %12276 = vmatprep.subr.bf16.mxu0 %v15071_v28 }
 0xa37   :  { %12243 = vmatprep.subr.bf16.mxu1 %v15071_v28 }
 0xa39   :  { %10211 = vmatmul.mubr.f32.vlgmr.msra.gmra.mrb[72].mxu1 %v14562_v21  ;;  %12278 = vmatpush3.bf16.msra.mxu0 %v15298_v47 }
 0xa3a   :  { %12245 = vmatpush3.bf16.msra.mxu1 %v15299_v52  ;;  %10280 = vmatprep.mubr.msk.f32.mxu1 %vm12844_vm0, %v15072_v20  ;;  %v14716_v52 = vld [vmem:[%s14877_s6 + $0x1] ss:$0 sm:$0xff] }
 0xa3b   :  { %12246 = vmatprep.subr.bf16.mxu1 %v15071_v28  ;;  %12279 = vmatprep.subr.bf16.mxu0 %v15071_v28 }
 0xa3d   :  { %12281 = vmatpush3.bf16.msra.mxu0 %v15300_v17 }
 0xa3e   :  { %12248 = vmatpush3.bf16.msra.mxu1 %v15301_v40  ;;  %12282 = vmatprep.subr.bf16.mxu0 %v15071_v28 }
 0xa3f   :  { %12249 = vmatprep.subr.bf16.mxu1 %v15071_v28 }
 0xa41   :  { %12284 = vmatpush3.bf16.msra.mxu0 %v15302_v62 }
 0xa42   :  { %12251 = vmatpush3.bf16.msra.mxu1 %v15303_v16  ;;  %12285 = vmatprep.subr.bf16.mxu0 %v15071_v28 }
 0xa43   :  { %12252 = vmatprep.subr.bf16.mxu1 %v15071_v28 }
 0xa45   :  { %12287 = vmatpush3.bf16.msra.mxu0 %v15304_v30 }
 0xa46   :  { %12254 = vmatpush3.bf16.msra.mxu1 %v15305_v5  ;;  %12288 = vmatprep.subr.bf16.mxu0 %v15071_v28  ;;  %v15311_v5 = vld [vmem:[#allocation79_spill] sm:$0xff] }
 0xa47   :  { %12255 = vmatprep.subr.bf16.mxu1 %v15071_v28 }
 0xa49   :  { %12290 = vmatpush3.bf16.msra.mxu0 %v15306_v57 }
 0xa4a   :  { %12257 = vmatpush3.bf16.msra.mxu1 %v15307_v10  ;;  %12315 = vmatprep.subr.bf16.mxu0 %v15071_v28 }
 0xa4b   :  { %12258 = vmatprep.subr.bf16.mxu1 %v15071_v28 }
 0xa4e   :  { %12260 = vmatpush3.bf16.msra.mxu1 %v15308_v24 }
 0xa4f   :  { %12261 = vmatprep.subr.bf16.mxu1 %v15071_v28 }
 0xa52   :  { %12263 = vmatpush3.bf16.msra.mxu1 %v15309_v26 }
 0xa53   :  { %12264 = vmatprep.subr.bf16.mxu1 %v15071_v28 }
 0xa56   :  { %12266 = vmatpush3.bf16.msra.mxu1 %v15310_v41 }
 0xa57   :  { %12291 = vmatprep.subr.bf16.mxu1 %v15071_v28 }
 0xa7f   :  { %v5056_v38 = vpop.f32.mrb[72].mxu0 }
 0xa80   :  { %v9967_v25 = vpop.f32.mrb[73].mxu0 }
 0xa81   :  { %v14723_v25 = vld [vmem:[%s14877_s6 + $0x3] ss:$0 sm:$0xff] }
 0xa9f   :  { %v5203_v49 = vpop.f32.mrb[74].mxu0 }
 0xaa0   :  { %v10037_v44 = vpop.f32.mrb[75].mxu0 }
 0xaac   :  { %v5126_v14 = vpop.f32.mrb[66].mxu1 }
 0xaad   :  { %v5127_v39 = vadd.f32 %v5126_v14, %v5056_v38  ;;  %v10002_v56 = vpop.f32.mrb[67].mxu1 }
 0xaaf   :  { %v5130_v46 = vadd.f32 %v14710_v54, %v5127_v39  ;;  %v14729_v39 = vld [vmem:[%s14877_s6 + $0x2] ss:$0 sm:$0xff] }
 0xab1   :  { %v6451_v47 = vmul.f32 -1.442695, %v5130_v46 }
 0xab3   :  { %12602 = vpow2.f32 %v6451_v47 }
 0xabd   :  { %v12603_v62 = vpop.eup %12602 }
 0xabe   :  { %v5134_v30 = vadd.f32 1.0, %v12603_v62 }
 0xabf   :  { %v5350_v11 = vpop.f32.mrb[76].mxu0 }
 0xac0   :  { %v10107_v23 = vpop.f32.mrb[77].mxu0  ;;  %v5351_v56 = vadd.f32 %v14729_v39, %v5350_v11 }
 0xacc   :  { %v5273_v3 = vpop.f32.mrb[68].mxu1 }
 0xacd   :  { %v5274_v34 = vadd.f32 %v5273_v3, %v5203_v49  ;;  %v10072_v6 = vpop.f32.mrb[69].mxu1 }
 0xacf   :  { %v5277_v17 = vadd.f32 %v14716_v52, %v5274_v34 }
 0xad1   :  { %v6452_v40 = vmul.f32 -1.442695, %v5277_v17 }
 0xad3   :  { %12604 = vpow2.f32 %v6452_v40 }
 0xad4   :  { %12606 = vrcp.f32 %v5134_v30 }
 0xadd   :  { %v12605_v26 = vpop.eup %12604 }
 0xade   :  { %v5281_v41 = vadd.f32 1.0, %v12605_v26  ;;  %v12607_v14 = vpop.eup %12606 }
 0xadf   :  { %v5497_v16 = vpop.f32.mrb[78].mxu0 }
 0xae0   :  { %v5501_v57 = vadd.f32 %v5497_v16, %v15311_v5  ;;  %v10177_v10 = vpop.f32.mrb[79].mxu0 }
 0xae2   :  { %v6453_v24 = vmul.f32 -1.442695, %v5501_v57 }
 0xae4   :  { %12608 = vpow2.f32 %v6453_v24  ;;  %v15312_v24 = vld [vmem:[#allocation87_spill] sm:$0xff] }
 0xae5   :  { %12610 = vrcp.f32 %v5281_v41 }
 0xaec   :  { %v5420_v38 = vpop.f32.mrb[70].mxu1 }
 0xaed   :  { %v5421_v49 = vadd.f32 %v14723_v25, %v5420_v38  ;;  %v10142_v44 = vpop.f32.mrb[71].mxu1 }
 0xaee   :  { %v12609_v46 = vpop.eup %12608  ;;  %v6126_v44 = vld [vmem:[#allocation13 + $0x88] sm:$0xff] }
 0xaef   :  { %v5424_v23 = vmul.f32 %v12607_v14, %v5421_v49  ;;  %v5505_v34 = vadd.f32 1.0, %v12609_v46  ;;  %v12611_v6 = vpop.eup %12610  ;;  %v6125_v49 = vld [vmem:[#allocation13 + $0x80] sm:$0xff]  ;;  %v6127_v14 = vld [vmem:[#allocation13 + $0x90] sm:$0xff] }
 0xaf0   :  { %v5427_v47 = vsub.f32 1.0, %v12611_v6  ;;  %v5429_v62 = vmul.f32 %v12611_v6, %v14529_v9  ;;  %v15313_v9 = vld [vmem:[#allocation81_spill] sm:$0xff] }
 0xaf1   :  { %v5425_v3 = vadd.f32 %v5424_v23, %v5351_v56  ;;  %v12388_v56 = vpack.c.bf16 %v6126_v44, %v6125_v49  ;;  %v6128_v23 = vld [vmem:[#allocation13 + $0x98] sm:$0xff]  ;;  %v6292_v44 = vld [vmem:[#allocation15 + $0x10] sm:$0xff] }
 0xaf2   :  { %v12391_v46 = vpack.c.bf16 %v6128_v23, %v6127_v14 }
 0xaf3   :  { %12612 = vtanh.f32 %v5425_v3  ;;  %v6129_v3 = vld [vmem:[#allocation13 + $0xa0] sm:$0xff] }
 0xaf4   :  { %12614 = vrcp.f32 %v5505_v34  ;;  %v6130_v34 = vld [vmem:[#allocation13 + $0xa8] sm:$0xff] }
 0xaf5   :  { %v12394_v6 = vpack.c.bf16 %v6130_v34, %v6129_v3 }
 0xafd   :  { %v12613_v17 = vpop.eup %12612 }
 0xafe   :  { %v5428_v40 = vmul.f32 %v12613_v17, %v5427_v47  ;;  %v12615_v11 = vpop.eup %12614  ;;  %v6131_v47 = vld [vmem:[#allocation13 + $0xb0] sm:$0xff]  ;;  %v6132_v17 = vld [vmem:[#allocation13 + $0xb8] sm:$0xff] }
 0xaff   :  { %v5651_v16 = vpop.f32.mrb[80].mxu0 }
 0xb00   :  { %v5652_v30 = vadd.f32 %v14526_v33, %v5651_v16  ;;  %v10247_v5 = vpop.f32.mrb[81].mxu0  ;;  %v14734_v57 = vadd.f32 %v5429_v62, %v5428_v40  ;;  %v12397_v40 = vpack.c.bf16 %v6132_v17, %v6131_v47  ;;  %v6133_v62 = vld [vmem:[#allocation13 + $0xc0] sm:$0xff]  ;;  %v6134_v16 = vld [vmem:[#allocation13 + $0xc8] sm:$0xff] }
 0xb01   :  { %v6135_v5 = vld [vmem:[#allocation13 + $0xd0] sm:$0xff]  ;;  %v6299_v47 = vld [vmem:[#allocation15 + $0x48] sm:$0xff] }
 0xb02   :  { %v5655_v10 = vmul.f32 %v12615_v11, %v5652_v30  ;;  %10281 = vmatmul.mubr.f32.vlgmr.msra.gmra.mrb[74].mxu1 %v14734_v57  ;;  %v12400_v30 = vpack.c.bf16 %v6134_v16, %v6133_v62  ;;  %v6136_v11 = vld [vmem:[#allocation13 + $0xd8] sm:$0xff] }
 0xb03   :  { %12293 = vmatpush3.bf16.msra.mxu1 %v15079_v36  ;;  %10350 = vmatprep.mubr.msk.f32.mxu1 %vm12844_vm0, %v15072_v20  ;;  %v6301_v62 = vld [vmem:[#allocation15 + $0x58] sm:$0xff] }
 0xb04   :  { %v5656_v26 = vadd.f32 %v5655_v10, %v15312_v24  ;;  %12294 = vmatprep.subr.bf16.mxu1 %v15071_v28  ;;  %v12403_v10 = vpack.c.bf16 %v6136_v11, %v6135_v5  ;;  %v6137_v24 = vld [vmem:[#allocation13 + $0xe0] sm:$0xff]  ;;  %v6303_v5 = vld [vmem:[#allocation15 + $0x68] sm:$0xff] }
 0xb07   :  { %12296 = vmatpush3.bf16.msra.mxu1 %v15080_v22 }
 0xb08   :  { %12297 = vmatprep.subr.bf16.mxu1 %v15071_v28 }
 0xb0b   :  { %12299 = vmatpush3.bf16.msra.mxu1 %v15081_v43 }
 0xb0c   :  { %v5574_v33 = vpop.f32.mrb[72].mxu1  ;;  %12300 = vmatprep.subr.bf16.mxu1 %v15071_v28 }
 0xb0d   :  { %v5578_v41 = vadd.f32 %v5574_v33, %v15313_v9  ;;  %v10212_v38 = vpop.f32.mrb[73].mxu1  ;;  %v6139_v9 = vld [vmem:[#allocation13 + $0xf0] sm:$0xff] }
 0xb0f   :  { %v6454_v36 = vmul.f32 -1.442695, %v5578_v41  ;;  %12302 = vmatpush3.bf16.msra.mxu1 %v15083_v8  ;;  %v6140_v41 = vld [vmem:[#allocation13 + $0xf8] sm:$0xff] }
 0xb10   :  { %12303 = vmatprep.subr.bf16.mxu1 %v15071_v28  ;;  %v12409_v38 = vpack.c.bf16 %v6140_v41, %v6139_v9  ;;  %v6457_v9 = vld [vmem:[%s14879_s8] ss:$0 sm:$0xff]  ;;  %s12846_s8 = smov [#allocation16]  }
 0xb11   :  { %12616 = vpow2.f32 %v6454_v36  ;;  %s6399_s2 = sshll.u32 %s12846_s8, 4  ;;  %s6400_s2 = int_to_ptr.vmem [resolvable:$true] %s6399_s2 }
 0xb12   :  { %s12802_s13 = scalar_lea.vmem %s6400_s2, 128  ;;  %p12807_p1 = scmp.lt.s32.totalorder %s6400_s2, %s6400_s2 }
 0xb13   :  { %12305 = vmatpush3.bf16.msra.mxu1 %v15084_v1  ;;  %p12803_p0 = scmp.ne.s32.totalorder %s6400_s2, %s12802_s13  ;;  %p12808_p2 = scmp.lt.s32.totalorder %s12802_s13, %s12802_s13 }
 0xb14   :  { %12306 = vmatprep.subr.bf16.mxu1 %v15071_v28 }
 0xb15   :  { %p12809_p3 = por %p12808_p2, %p12807_p1 }
 0xb17   :  { %12308 = vmatpush3.bf16.msra.mxu1 %v15085_v42  ;;  %p12810_p4 = pnand %p12809_p3, %p12803_p0 }
 0xb18   :  { %12309 = vmatprep.subr.bf16.mxu1 %v15071_v28 }
 0xb1b   :  { %v12617_v22 = vpop.eup %12616  ;;  %12311 = vmatpush3.bf16.msra.mxu1 %v15086_v4 }
 0xb1c   :  { %v5582_v43 = vadd.f32 1.0, %v12617_v22  ;;  %12312 = vmatprep.subr.bf16.mxu1 %v15071_v28 }
 0xb1e   :  { %12618 = vrcp.f32 %v5582_v43 }
 0xb1f   :  { %12314 = vmatpush3.bf16.msra.mxu1 %v15087_v61  ;;  %12620 = vtanh.f32 %v5656_v26  ;;  %v6138_v26 = vld [vmem:[#allocation13 + $0xe8] sm:$0xff] }
 0xb20   :  { %12339 = vmatprep.subr.bf16.mxu1 %v15071_v28  ;;  %v12406_v33 = vpack.c.bf16 %v6138_v26, %v6137_v24  ;;  %v6305_v24 = vld [vmem:[#allocation15 + $0x78] sm:$0xff] }
 0xb22   :  { %10351 = vmatmul.mubr.f32.vlgmr.msra.gmra.mrb[76].mxu1 %v14734_v57 }
 0xb23   :  { %12341 = vmatpush3.bf16.msra.mxu1 %v15088_v58  ;;  %10420 = vmatprep.mubr.msk.f32.mxu1 %vm12844_vm0, %v15072_v20 }
 0xb24   :  { %12342 = vmatprep.subr.bf16.mxu1 %v15071_v28 }
 0xb27   :  { %12344 = vmatpush3.bf16.msra.mxu1 %v15089_v0  ;;  %v6116_v0 = vld [vmem:[#allocation13 + $0x40] sm:$0xff] }
 0xb28   :  { %v12619_v8 = vpop.eup %12618  ;;  %12345 = vmatprep.subr.bf16.mxu1 %v15071_v28 }
 0xb29   :  { %v5658_v1 = vsub.f32 1.0, %v12619_v8  ;;  %v12621_v42 = vpop.eup %12620  ;;  %v5660_v61 = vmul.f32 %v12619_v8, %v14562_v21 }
 0xb2b   :  { %12347 = vmatpush3.bf16.msra.mxu1 %v15090_v37  ;;  %v5659_v4 = vmul.f32 %v12621_v42, %v5658_v1  ;;  %v6117_v37 = vld [vmem:[#allocation13 + $0x48] sm:$0xff] }
 0xb2c   :  { %12348 = vmatprep.subr.bf16.mxu1 %v15071_v28 }
 0xb2d   :  { %v14767_v58 = vadd.f32 %v5660_v61, %v5659_v4 }
 0xb2f   :  { %12350 = vmatpush3.bf16.msra.mxu1 %v15091_v50  ;;  %10316 = vmatmul.mubr.f32.vlgmr.msra.gmra.mrb[82].mxu0 %v14767_v58  ;;  %v12424_v50 = vpack.c.bf16 %v6117_v37, %v6116_v0 }
 0xb30   :  { %12317 = vmatpush3.bf16.msra.mxu0 %v13375_v12  ;;  %12351 = vmatprep.subr.bf16.mxu1 %v15071_v28  ;;  %v6108_v12 = vld [vmem:[#allocation13] sm:$0xff] }
 0xb31   :  { %12318 = vmatprep.subr.bf16.mxu0 %v15071_v28  ;;  %10385 = vmatprep.mubr.msk.f32.mxu0 %vm12844_vm0, %v15072_v20 }
 0xb33   :  { %12353 = vmatpush3.bf16.msra.mxu1 %v15092_v51  ;;  %v6118_v51 = vld [vmem:[#allocation13 + $0x50] sm:$0xff] }
 0xb34   :  { %12320 = vmatpush3.bf16.msra.mxu0 %v13383_v63  ;;  %12354 = vmatprep.subr.bf16.mxu1 %v15071_v28  ;;  %v6109_v63 = vld [vmem:[#allocation13 + $0x8] sm:$0xff] }
 0xb35   :  { %12321 = vmatprep.subr.bf16.mxu0 %v15071_v28 }
 0xb37   :  { %12356 = vmatpush3.bf16.msra.mxu1 %v15093_v7  ;;  %v6119_v7 = vld [vmem:[#allocation13 + $0x58] sm:$0xff] }
 0xb38   :  { %12323 = vmatpush3.bf16.msra.mxu0 %v13393_v48  ;;  %12357 = vmatprep.subr.bf16.mxu1 %v15071_v28  ;;  %v12412_v48 = vpack.c.bf16 %v6109_v63, %v6108_v12 }
 0xb39   :  { %12324 = vmatprep.subr.bf16.mxu0 %v15071_v28 }
 0xb3b   :  { %12359 = vmatpush3.bf16.msra.mxu1 %v15094_v19  ;;  %v12427_v19 = vpack.c.bf16 %v6119_v7, %v6118_v51 }
 0xb3c   :  { %12326 = vmatpush3.bf16.msra.mxu0 %v13399_v35  ;;  %12360 = vmatprep.subr.bf16.mxu1 %v15071_v28  ;;  %v6110_v35 = vld [vmem:[#allocation13 + $0x10] sm:$0xff] }
 0xb3d   :  { %12327 = vmatprep.subr.bf16.mxu0 %v15071_v28 }
 0xb3f   :  { %12362 = vmatpush3.bf16.msra.mxu1 %v15095_v53  ;;  %v6120_v53 = vld [vmem:[#allocation13 + $0x60] sm:$0xff] }
 0xb40   :  { %12329 = vmatpush3.bf16.msra.mxu0 %v13405_v60  ;;  %12387 = vmatprep.subr.bf16.mxu1 %v15071_v28  ;;  %v6111_v60 = vld [vmem:[#allocation13 + $0x18] sm:$0xff] }
 0xb41   :  { %12330 = vmatprep.subr.bf16.mxu0 %v15071_v28 }
 0xb42   :  { %10421 = vmatmul.mubr.f32.vlgmr.msra.gmra.mrb[78].mxu1 %v14767_v58 }
 0xb43   :  { %10490 = vmatprep.mubr.msk.f32.mxu1 %vm12844_vm0, %v15072_v20  ;;  %12389 = vmatpush3.bf16.msra.mxu1 %v12388_v56  ;;  %v6295_v56 = vld [vmem:[#allocation15 + $0x28] sm:$0xff] }
 0xb44   :  { %12332 = vmatpush3.bf16.msra.mxu0 %v13411_v45  ;;  %v12415_v45 = vpack.c.bf16 %v6111_v60, %v6110_v35  ;;  %12390 = vmatprep.subr.bf16.mxu1 %v15071_v28 }
 0xb45   :  { %12333 = vmatprep.subr.bf16.mxu0 %v15071_v28 }
 0xb47   :  { %12392 = vmatpush3.bf16.msra.mxu1 %v12391_v46  ;;  %v6296_v46 = vld [vmem:[#allocation15 + $0x30] sm:$0xff] }
 0xb48   :  { %12335 = vmatpush3.bf16.msra.mxu0 %v13419_v15  ;;  %v6112_v15 = vld [vmem:[#allocation13 + $0x20] sm:$0xff]  ;;  %12393 = vmatprep.subr.bf16.mxu1 %v15071_v28 }
 0xb49   :  { %12336 = vmatprep.subr.bf16.mxu0 %v15071_v28 }
 0xb4b   :  { %12395 = vmatpush3.bf16.msra.mxu1 %v12394_v6 }
 0xb4c   :  { %12338 = vmatpush3.bf16.msra.mxu0 %v13425_v13  ;;  %v6113_v13 = vld [vmem:[#allocation13 + $0x28] sm:$0xff]  ;;  %12396 = vmatprep.subr.bf16.mxu1 %v15071_v28 }
 0xb4d   :  { %12363 = vmatprep.subr.bf16.mxu0 %v15071_v28 }
 0xb4f   :  { %10386 = vmatmul.mubr.f32.vlgmr.msra.gmra.mrb[84].mxu0 %v14767_v58  ;;  %12398 = vmatpush3.bf16.msra.mxu1 %v12397_v40  ;;  %v6300_v40 = vld [vmem:[#allocation15 + $0x50] sm:$0xff] }
 0xb50   :  { %12365 = vmatpush3.bf16.msra.mxu0 %v13431_v55  ;;  %10455 = vmatprep.mubr.msk.f32.mxu0 %vm12844_vm0, %v15072_v20  ;;  %v12418_v55 = vpack.c.bf16 %v6113_v13, %v6112_v15  ;;  %v12451_v16 = vpack.c.bf16 %v6301_v62, %v6300_v40 }
 0xb51   :  { %12366 = vmatprep.subr.bf16.mxu0 %v15071_v28  ;;  %12399 = vmatprep.subr.bf16.mxu1 %v15071_v28 }
 0xb53   :  { %12401 = vmatpush3.bf16.msra.mxu1 %v12400_v30  ;;  %v6302_v30 = vld [vmem:[#allocation15 + $0x60] sm:$0xff] }
 0xb54   :  { %12368 = vmatpush3.bf16.msra.mxu0 %v13439_v27  ;;  %v6114_v27 = vld [vmem:[#allocation13 + $0x30] sm:$0xff]  ;;  %12402 = vmatprep.subr.bf16.mxu1 %v15071_v28  ;;  %v12454_v11 = vpack.c.bf16 %v6303_v5, %v6302_v30 }
 0xb55   :  { %12369 = vmatprep.subr.bf16.mxu0 %v15071_v28 }
 0xb57   :  { %12404 = vmatpush3.bf16.msra.mxu1 %v12403_v10  ;;  %v6304_v10 = vld [vmem:[#allocation15 + $0x70] sm:$0xff] }
 0xb58   :  { %12371 = vmatpush3.bf16.msra.mxu0 %v13449_v31  ;;  %v6115_v31 = vld [vmem:[#allocation13 + $0x38] sm:$0xff]  ;;  %12405 = vmatprep.subr.bf16.mxu1 %v15071_v28  ;;  %v12457_v26 = vpack.c.bf16 %v6305_v24, %v6304_v10 }
 0xb59   :  { %12372 = vmatprep.subr.bf16.mxu0 %v15071_v28 }
 0xb5b   :  { %12407 = vmatpush3.bf16.msra.mxu1 %v12406_v33 }
 0xb5c   :  { %12374 = vmatpush3.bf16.msra.mxu0 %v13455_v29  ;;  %v12421_v29 = vpack.c.bf16 %v6115_v31, %v6114_v27  ;;  %12408 = vmatprep.subr.bf16.mxu1 %v15071_v28 }
 0xb5d   :  { %12375 = vmatprep.subr.bf16.mxu0 %v15071_v28 }
 0xb5f   :  { %12410 = vmatpush3.bf16.msra.mxu1 %v12409_v38 }
 0xb60   :  { %12377 = vmatpush3.bf16.msra.mxu0 %v15120_v59  ;;  %v6121_v59 = vld [vmem:[#allocation13 + $0x68] sm:$0xff]  ;;  %12435 = vmatprep.subr.bf16.mxu1 %v15071_v28 }
 0xb61   :  { %12378 = vmatprep.subr.bf16.mxu0 %v15071_v28  ;;  %v12430_v21 = vpack.c.bf16 %v6121_v59, %v6120_v53  ;;  %v6290_v53 = vld [vmem:[#allocation15] sm:$0xff]  ;;  %v6291_v59 = vld [vmem:[#allocation15 + $0x8] sm:$0xff] }
 0xb64   :  { %12380 = vmatpush3.bf16.msra.mxu0 %v15277_v2  ;;  %v6122_v2 = vld [vmem:[#allocation13 + $0x70] sm:$0xff] }
 0xb65   :  { %12381 = vmatprep.subr.bf16.mxu0 %v15071_v28 }
 0xb68   :  { %12383 = vmatpush3.bf16.msra.mxu0 %v15279_v18  ;;  %v6123_v18 = vld [vmem:[#allocation13 + $0x78] sm:$0xff] }
 0xb69   :  { %12384 = vmatprep.subr.bf16.mxu0 %v15071_v28 }
 0xb6c   :  { %12386 = vmatpush3.bf16.msra.mxu0 %v15281_v32  ;;  %v12433_v32 = vpack.c.bf16 %v6123_v18, %v6122_v2 }
 0xb6d   :  { %12411 = vmatprep.subr.bf16.mxu0 %v15071_v28 }
 0xb6f   :  { %10456 = vmatmul.mubr.f32.vlgmr.msra.gmra.mrb[86].mxu0 %v14734_v57 }
 0xb70   :  { %12413 = vmatpush3.bf16.msra.mxu0 %v12412_v48  ;;  %10525 = vmatprep.mubr.msk.f32.mxu0 %vm12844_vm0, %v15072_v20 }
 0xb71   :  { %12414 = vmatprep.subr.bf16.mxu0 %v15071_v28 }
 0xb74   :  { %12416 = vmatpush3.bf16.msra.mxu0 %v12415_v45 }
 0xb75   :  { %12417 = vmatprep.subr.bf16.mxu0 %v15071_v28 }
 0xb78   :  { %12419 = vmatpush3.bf16.msra.mxu0 %v12418_v55 }
 0xb79   :  { %12420 = vmatprep.subr.bf16.mxu0 %v15071_v28 }
 0xb7c   :  { %12422 = vmatpush3.bf16.msra.mxu0 %v12421_v29 }
 0xb7d   :  { %12423 = vmatprep.subr.bf16.mxu0 %v15071_v28 }
 0xb80   :  { %12425 = vmatpush3.bf16.msra.mxu0 %v12424_v50 }
 0xb81   :  { %12426 = vmatprep.subr.bf16.mxu0 %v15071_v28 }
 0xb84   :  { %12428 = vmatpush3.bf16.msra.mxu0 %v12427_v19 }
 0xb85   :  { %12429 = vmatprep.subr.bf16.mxu0 %v15071_v28 }
 0xb88   :  { %12431 = vmatpush3.bf16.msra.mxu0 %v12430_v21 }
 0xb89   :  { %12432 = vmatprep.subr.bf16.mxu0 %v15071_v28 }
 0xb8c   :  { %12434 = vmatpush3.bf16.msra.mxu0 %v12433_v32  ;;  %v12436_v32 = vpack.c.bf16 %v6291_v59, %v6290_v53 }
 0xb8f   :  { %10526 = vmatmul.mubr.f32.vlgmr.msra.gmra.mrb[88].mxu0 %v14767_v58 }
 0xbd5   :  { %v5728_v36 = vpop.f32.mrb[74].mxu1 }
 0xbd6   :  { %v10282_v22 = vpop.f32.mrb[75].mxu1 }
 0xbf5   :  { %v5875_v43 = vpop.f32.mrb[76].mxu1 }
 0xbf6   :  { %v10352_v8 = vpop.f32.mrb[77].mxu1 }
 0xc02   :  { %v5798_v1 = vpop.f32.mrb[82].mxu0 }
 0xc03   :  { %v5799_v42 = vadd.f32 %v5798_v1, %v5728_v36  ;;  %v10317_v4 = vpop.f32.mrb[83].mxu0 }
 0xc05   :  { %v5802_v12 = vadd.f32 %v14710_v54, %v5799_v42 }
 0xc07   :  { %v6455_v60 = vmul.f32 -1.442695, %v5802_v12 }
 0xc09   :  { %12622 = vpow2.f32 %v6455_v60 }
 0xc13   :  { %v12623_v13 = vpop.eup %12622 }
 0xc14   :  { %v5806_v55 = vadd.f32 1.0, %v12623_v13 }
 0xc15   :  { %v6022_v61 = vpop.f32.mrb[78].mxu1 }
 0xc16   :  { %v10422_v58 = vpop.f32.mrb[79].mxu1  ;;  %v6023_v54 = vadd.f32 %v14729_v39, %v6022_v61  ;;  %v6294_v39 = vld [vmem:[#allocation15 + $0x20] sm:$0xff] }
 0xc17   :  { %v12442_v23 = vpack.c.bf16 %v6295_v56, %v6294_v39 }
 0xc22   :  { %v5945_v63 = vpop.f32.mrb[84].mxu0 }
 0xc23   :  { %v5946_v48 = vadd.f32 %v5945_v63, %v5875_v43  ;;  %v10387_v35 = vpop.f32.mrb[85].mxu0  ;;  %v6458_v43 = vld [vmem:[%s14881_s10] ss:$0 sm:$0xff] }
 0xc25   :  { %v5949_v45 = vadd.f32 %v14716_v52, %v5946_v48 }
 0xc27   :  { %v6456_v15 = vmul.f32 -1.442695, %v5949_v45 }
 0xc29   :  { %12624 = vpow2.f32 %v6456_v15 }
 0xc2a   :  { %12626 = vrcp.f32 %v5806_v55 }
 0xc33   :  { %v12625_v27 = vpop.eup %12624 }
 0xc34   :  { %v5953_v31 = vadd.f32 1.0, %v12625_v27  ;;  %v12627_v50 = vpop.eup %12626 }
 0xc36   :  { %12628 = vrcp.f32 %v5953_v31 }
 0xc40   :  { %v12629_v19 = vpop.eup %12628 }
 0xc41   :  { %v6099_v52 = vsub.f32 1.0, %v12629_v19  ;;  %v6101_v18 = vmul.f32 %v12629_v19, %v14734_v57  ;;  %v6297_v57 = vld [vmem:[#allocation15 + $0x38] sm:$0xff] }
 0xc42   :  { %v6092_v29 = vpop.f32.mrb[86].mxu0  ;;  %v12445_v3 = vpack.c.bf16 %v6297_v57, %v6296_v46 }
 0xc43   :  { %v6093_v0 = vadd.f32 %v14723_v25, %v6092_v29  ;;  %v10457_v37 = vpop.f32.mrb[87].mxu0  ;;  %v6293_v25 = vld [vmem:[#allocation15 + $0x18] sm:$0xff] }
 0xc44   :  { %v12439_v14 = vpack.c.bf16 %v6293_v25, %v6292_v44 }
 0xc45   :  { %v6096_v51 = vmul.f32 %v12627_v50, %v6093_v0 }
 0xc47   :  { %v6097_v7 = vadd.f32 %v6096_v51, %v6023_v54 }
 0xc49   :  { %12630 = vtanh.f32 %v6097_v7 }
 0xc53   :  { %v12631_v21 = vpop.eup %12630 }
 0xc54   :  { %v6100_v2 = vmul.f32 %v12631_v21, %v6099_v52 }
 0xc56   :  { %v6102_v49 = vadd.f32 %v6101_v18, %v6100_v2 }
 0xc58   :  { %10491 = vmatmul.mubr.f32.vlgmr.msra.gmra.mrb[80].mxu1 %v6102_v49 }
 0xc59   :  { %12437 = vmatpush3.bf16.msra.mxu1 %v12436_v32  ;;  %10560 = vmatprep.mubr.msk.f32.mxu1 %vm12844_vm0, %v15072_v20  ;;  %v6298_v20 = vld [vmem:[#allocation15 + $0x40] sm:$0xff] }
 0xc5a   :  { %12438 = vmatprep.subr.bf16.mxu1 %v15071_v28  ;;  %v12448_v17 = vpack.c.bf16 %v6299_v47, %v6298_v20 }
 0xc5d   :  { %12440 = vmatpush3.bf16.msra.mxu1 %v12439_v14 }
 0xc5e   :  { %12441 = vmatprep.subr.bf16.mxu1 %v15071_v28 }
 0xc61   :  { %12443 = vmatpush3.bf16.msra.mxu1 %v12442_v23 }
 0xc62   :  { %v6277_v34 = vpop.f32.mrb[88].mxu0  ;;  %12444 = vmatprep.subr.bf16.mxu1 %v15071_v28 }
 0xc63   :  { %v10527_v6 = vpop.f32.mrb[89].mxu0 }
 0xc65   :  { %12446 = vmatpush3.bf16.msra.mxu1 %v12445_v3 }
 0xc66   :  { %12447 = vmatprep.subr.bf16.mxu1 %v15071_v28 }
 0xc69   :  { %12449 = vmatpush3.bf16.msra.mxu1 %v12448_v17 }
 0xc6a   :  { %12450 = vmatprep.subr.bf16.mxu1 %v15071_v28 }
 0xc6d   :  { %12452 = vmatpush3.bf16.msra.mxu1 %v12451_v16 }
 0xc6e   :  { %12453 = vmatprep.subr.bf16.mxu1 %v15071_v28 }
 0xc71   :  { %12455 = vmatpush3.bf16.msra.mxu1 %v12454_v11 }
 0xc72   :  { %12456 = vmatprep.subr.bf16.mxu1 %v15071_v28 }
 0xc75   :  { %12458 = vmatpush3.bf16.msra.mxu1 %v12457_v26 }
 0xd2b   :  { %v6207_v33 = vpop.f32.mrb[80].mxu1 }
 0xd2c   :  { %v6278_v41 = vadd.f32 %v6277_v34, %v6207_v33  ;;  %v10492_v38 = vpop.f32.mrb[81].mxu1 }
 0xd2e   :  { %v6288_v36 = vadd.f32 %v6457_v9, %v6278_v41 }
 0xd30   :  { %12632 = vtanh.f32 %v6288_v36 }
 0xd3a   :  { %v12633_v22 = vpop.eup %12632 }
 0xd3b   :  { %10561 = vmatmul.mubr.f32.vlgmr.msra.gmra.mrb[82].mxu1 %v12633_v22 }
 0xe0e   :  { %v6379_v8 = vpop.f32.mrb[82].mxu1 }
 0xe0f   :  { %v6380_v1 = vadd.f32 %v6458_v43, %v6379_v8  ;;  %v10562_v42 = vpop.f32.mrb[83].mxu1 }
 0xe11   :  { %6383 = vmax.xlane.f32.xlu0 %v6380_v1 }
 0xe9e   :  { %v6384_v28 = vpop.xlane.xlu0 %6383 }
 0xe9f   :  { %v6385_v4 = vsub.f32 %v6380_v1, %v6384_v28 }
 0xea1   :  { %v6386_v61 = vmul.f32 1.442695, %v6385_v4 }
 0xea3   :  { %12634 = vpow2.f32 %v6386_v61 }
 0xead   :  { %v12635_v58 = vpop.eup %12634 }
 0xeae   :  { %6388 = vadd.xlane.f32.xlu0 %v12635_v58 }
 0xf3b   :  { %v6389_v12 = vpop.xlane.xlu0 %6388 }
 0xf3c   :  { %12636 = vrcp.f32 %v6389_v12 }
 0xf46   :  { %v12637_v63 = vpop.eup %12636 }
 0xf47   :  { %v6391_v48 = vmul.f32 %v12637_v63, %v12635_v58 }
 0xf49   :  { %6392 = vst [vmem:[#allocation16] sm:$0xff] %v6391_v48 }
 0xf4a   :  { %12813 = shalt.err (!%p12810_p4)
}
 0xf4b   :  { %s12814_s16 = scalar_lea.hbm %s14882_s11, 128 }
 0xf4c   :  { %p12815_p5 = scmp.ne.s32.totalorder %s14882_s11, %s12814_s16  ;;  %p12818_p6 = scmp.lt.u32.totalorder %s12814_s16, %s14882_s11 }
 0xf4e   :  { %p12820_p7 = pnand %p12818_p6, %p12815_p5 }
 0xf50   :  { %12823 = shalt.err (!%p12820_p7)
}
 0xf51   :  { %6402 = dma.vmem_to_hbm [thread:$0]  %s6400_s2, 128, %s14882_s11, [#allocation6]  }
 0xf52   :  { %12832 = dma.done.wait [#allocation6], 128  }
 0xf53   :  { %12833 = vsyncadd [#allocation6], 4294967168 }
 0xf54   :  { %6406 = vsyncpa [#allocation5], 1 }
 0xf55   :  { %6407 = vsyncpa [#allocation8], 1 }
 0xf56   :  { %6408 = vsyncpa [#allocation11], 1 }
 0xf57   :  { %6409 = vsyncpa [#allocation14], 1 }
 0xf58   :  { %6410 = vsyncpa [#allocation6], 1 }

</bundles_post_ra>
